<compile_context>
chip_gen: v7x
topology: tpu7x:2x2x1
jax: 0.10.0
libtpu: 0.0.40
codegen_flags: <defaults>
</compile_context>

<pallas_src>
import jax
import jax.numpy as jnp
from jax.experimental import pallas as pl
from jax.experimental.pallas import tpu as pltpu


# ----------------------------- Pallas kernel --------------------------------
def _dcn_mix_kernel(emb_ref, Vc_ref, Cb_ref, Uc_ref, Gc_ref, Gx_ref, cb_ref,
                    W1_ref, b1_ref, W2_ref, b2_ref, W3_ref, b3_ref, out_ref):
    f32 = jnp.float32
    L = Vc_ref.shape[0]
    mm = Vc_ref.dtype                     # matmul operand dtype (f32 or bf16)

    x0 = emb_ref[...].astype(f32)         # (TB, N)
    x_l = x0
    for l in range(L):                    # static unroll over cross layers
        xm = x_l.astype(mm)

        # ---- gating: single matmul + softmax (no per-expert XLU reductions)
        gl = jnp.dot(xm, Gc_ref[l], preferred_element_type=f32)        # (TB, E)
        gl = gl - jnp.max(gl, axis=-1, keepdims=True)
        gw = jnp.exp(gl)
        gw = gw / jnp.sum(gw, axis=-1, keepdims=True)                  # (TB, E)
        # broadcast each gate weight across its expert's rank block -> (TB, E*R)
        gw_rep = jnp.dot(gw, Gx_ref[...], preferred_element_type=f32)

        # ---- fused low-rank experts: 3 wide matmuls instead of 3*E tiny ones
        v = jnp.dot(xm, Vc_ref[l], preferred_element_type=f32)         # (TB, E*R)
        v = jnp.dot(v.astype(mm), Cb_ref[l], preferred_element_type=f32)
        v = v * gw_rep                                                 # gate-scale
        uv = jnp.dot(v.astype(mm), Uc_ref[l], preferred_element_type=f32)  # (TB, N)

        # sum_e gw_e == 1  =>  cbias factors out of the gated sum exactly
        x_l = x0 * (uv + cb_ref[l]) + x_l                              # residual

    # ---- DNN tower (BatchNorm folded into the Linears; Dropout = identity)
    h = jnp.dot(x_l.astype(mm), W1_ref[...], preferred_element_type=f32) + b1_ref[...]
    h = jnp.maximum(h, 0.0)
    h = jnp.dot(h.astype(mm), W2_ref[...], preferred_element_type=f32) + b2_ref[...]
    h = jnp.maximum(h, 0.0)
    out = jnp.dot(h.astype(mm), W3_ref[...], preferred_element_type=f32) + b3_ref[...]
    out_ref[...] = out.astype(out_ref.dtype)                            # (TB, 1)


# ------------------------------- wrapper -------------------------------------
def dcn_mix_pallas(emb, packed, *, tb=512):
    """emb: (B, N) float32 flattened embeddings; packed: output of pack_params."""
    B, N = emb.shape
    n_tiles = (B + tb - 1) // tb
    B_pad = n_tiles * tb
    if B_pad != B:
        emb = jnp.pad(emb, ((0, B_pad - B), (0, 0)))   # padded rows stay finite

    def const_spec(a):                      # weight: DMA'd once, stays resident
        nd = a.ndim
        return pl.BlockSpec(a.shape, lambda i, _nd=nd: (0,) * _nd)

    out = pl.pallas_call(
        _dcn_mix_kernel,
        out_shape=jax.ShapeDtypeStruct((B_pad, 1), jnp.float32),
        grid=(n_tiles,),
        in_specs=[pl.BlockSpec((tb, N), lambda i: (i, 0))]
                 + [const_spec(a) for a in packed],
        out_specs=pl.BlockSpec((tb, 1), lambda i: (i, 0)),
        compiler_params=pltpu.CompilerParams(
            dimension_semantics=("parallel",)),   # shards tiles across v7x TCs
    )(emb, *packed)
    return out[:B, 0]                        # scores.squeeze(-1) -> (B,)


# ------------------- host-side weight packing / BN folding -------------------
def pack_params(params, mm_dtype=jnp.bfloat16, eps=1e-5):
    (U, V, C, G, cbias, W1, b1, bn1, W2, b2, bn2, W3, b3) = params
    L, E, N, R = U.shape
    ER = E * R

    # x @ V_cat gives all experts' V-projections side by side (column block e)
    Vcat = jnp.transpose(V, (0, 2, 1, 3)).reshape(L, N, ER)      # (L, N, E*R)
    # rows block e = U[l,e]^T  (pre-transposed on host)
    Ucat = jnp.transpose(U, (0, 1, 3, 2)).reshape(L, ER, N)      # (L, E*R, N)
    # block-diagonal with blocks C[l,e]^T (pre-transposed on host)
    Cbd = jnp.zeros((L, ER, ER), jnp.float32)
    for e in range(E):
        Cbd = Cbd.at[:, e * R:(e + 1) * R, e * R:(e + 1) * R].set(
            jnp.transpose(C[:, e], (0, 2, 1)))
    # gating weights as one (N, E) matrix per layer
    Gcat = jnp.transpose(G[:, :, 0, :], (0, 2, 1))               # (L, N, E)
    # gate-weight expansion: (E, E*R) 0/1 matrix, row e is 1 on block e
    Gexp = jnp.repeat(jnp.eye(E, dtype=jnp.float32), R, axis=1)

    def fold_bn(W, b, bn):   # exact for eval-mode BN (running stats)
        gamma, beta, mean, var = bn[0], bn[1], bn[2], bn[3]
        s = gamma * jax.lax.rsqrt(var + eps)
        return W * s[None, :], (b - mean[None, :]) * s[None, :] + beta[None, :]

    W1f, b1f = fold_bn(W1, b1, bn1)
    W2f, b2f = fold_bn(W2, b2, bn2)

    c = lambda a: a.astype(mm_dtype)        # matmul operands only
    return (c(Vcat), c(Cbd), c(Ucat), c(Gcat),
            Gexp, cbias.astype(jnp.float32),
            c(W1f), b1f.astype(jnp.float32),
            c(W2f), b2f.astype(jnp.float32),
            c(W3), b3.astype(jnp.float32))


# ------------------------ plain-JAX reference (check) ------------------------
def dcn_mix_ref(emb, params):
    (U, V, C, G, cbias, W1, b1, bn1, W2, b2, bn2, W3, b3) = params
    x0 = emb.astype(jnp.float32)
    L, E = U.shape[0], U.shape[1]
    x_l = x0
    for l in range(L):
        outs, gls = [], []
        for e in range(E):
            v = x_l @ V[l, e]
            v = v @ C[l, e].T
            uv = v @ U[l, e].T
            outs.append(x0 * (uv + cbias[l]))
            gls.append(jnp.sum(x_l * G[l, e], axis=-1, keepdims=True))
        gl = jnp.concatenate(gls, axis=-1)
        gw = jax.nn.softmax(gl, axis=-1)
        moe = sum(outs[e] * gw[:, e:e + 1] for e in range(E))
        x_l = moe + x_l
    eps = 1e-5

    def bn_relu(h, bn):
        h = (h - bn[2:3]) * jax.lax.rsqrt(bn[3:4] + eps) * bn[0:1] + bn[1:2]
        return jnp.maximum(h, 0.0)

    h = bn_relu(x_l @ W1 + b1, bn1)
    h = bn_relu(h @ W2 + b2, bn2)
    return (h @ W3 + b3)[:, 0]


# ------------------------------ param setup ---------------------------------
def init_params(key, field_dims, num_factor, hidden_sizes,
                num_layers, num_experts, rank):
    N = num_factor * len(field_dims)
    num_inputs = sum(field_dims)
    ks = jax.random.split(key, 16)

    # embedding: xavier_uniform
    bound = (6.0 / (num_inputs + num_factor)) ** 0.5
    emb_table = jax.random.uniform(ks[0], (num_inputs, num_factor),
                                   jnp.float32, -bound, bound)

    xav = lambda k, shape, fi, fo: jax.random.uniform(
        k, shape, jnp.float32, -(6.0 / (fi + fo)) ** 0.5, (6.0 / (fi + fo)) ** 0.5)

    U = xav(ks[1], (num_layers, num_experts, N, rank), N, rank)
    V = xav(ks[2], (num_layers, num_experts, N, rank), N, rank)
    C = xav(ks[3], (num_layers, num_experts, rank, rank), rank, rank)
    G = xav(ks[4], (num_layers, num_experts, 1, N), N, 1)        # gating (no bias)
    cbias = jnp.zeros((num_layers, 1, N), jnp.float32)           # cross-layer bias

    def linear(k, fan_in, fan_out):
        kw, kb = jax.random.split(k)
        b = 1.0 / (fan_in ** 0.5)
        W = jax.random.uniform(kw, (fan_in, fan_out), jnp.float32, -b, b)
        bias = jax.random.uniform(kb, (1, fan_out), jnp.float32, -b, b)
        return W, bias

    def bn_default(h):   # [gamma, beta, running_mean, running_var]
        return jnp.stack([jnp.ones((h,)), jnp.zeros((h,)),
                          jnp.zeros((h,)), jnp.ones((h,))]).astype(jnp.float32)

    h1, h2 = hidden_sizes
    W1, b1 = linear(ks[5], N, h1)
    W2, b2 = linear(ks[6], h1, h2)
    W3, b3 = linear(ks[7], h2, 1)
    params = (U, V, C, G, cbias,
              W1, b1, bn_default(h1),
              W2, b2, bn_default(h2),
              W3, b3)
    return emb_table, params


# ---------------------------------- main -------------------------------------
if __name__ == "__main__":
    field_dims = [5, 7, 9, 11]      # 4 fields
    num_factor = 8                  # embedding dim -> inp_size N = 32
    hidden_sizes = [32, 16]
    num_layers, num_experts, rank = 3, 4, 8
    B, TB = 300, 128                # 3 grid tiles, last one padded (tests masking)

    key = jax.random.PRNGKey(0)
    k_emb, k_x = jax.random.split(key)
    emb_table, params = init_params(k_emb, field_dims, num_factor,
                                    hidden_sizes, num_layers, num_experts, rank)

    # integer categorical inputs, one id per field
    maxv = jnp.array(field_dims, jnp.int32)
    x = (jax.random.randint(k_x, (B, len(field_dims)), 0, 10 ** 6) % maxv
         ).astype(jnp.int32)                                      # (B, F)

    # TODO(synk): embedding gather + offsets (data-dependent gather) stay in
    # plain JAX outside the kernel.
    offsets = jnp.concatenate(
        [jnp.zeros((1,), jnp.int32),
         jnp.cumsum(jnp.array(field_dims[:-1], jnp.int32))]).astype(jnp.int32)
    emb = emb_table[x + offsets[None, :]].reshape(B, -1)          # (B, N)

    ref = dcn_mix_ref(emb, params)

    # exact-math build (f32 matmul operands) -> tight check
    scores_f32 = jax.block_until_ready(
        dcn_mix_pallas(emb, pack_params(params, jnp.float32), tb=TB))
    assert scores_f32.shape == (B,)
    assert jnp.allclose(scores_f32, ref, rtol=1e-3, atol=1e-3), (scores_f32, ref)

    # perf build (bf16 matmul operands, f32 accumulate) -> loose check
    scores_bf16 = jax.block_until_ready(
        dcn_mix_pallas(emb, pack_params(params, jnp.bfloat16), tb=TB))
    assert scores_bf16.shape == (B,)
    assert jnp.allclose(scores_bf16, ref, rtol=5e-2, atol=5e-2), (scores_bf16, ref)

    # TODO(synk): Dropout / BatchNorm implemented in eval (inference) mode only.
    print("KERNEL_OK")
</pallas_src>

<mosaic_0001>
module attributes {stable_mosaic.version = 11 : i64} {
  func.func @_dcn_mix_kernel(%arg0: i32, %arg1: memref<128x32xf32, #tpu.memory_space<vmem>>, %arg2: memref<3x32x32xf32, #tpu.memory_space<vmem>>, %arg3: memref<3x32x32xf32, #tpu.memory_space<vmem>>, %arg4: memref<3x32x32xf32, #tpu.memory_space<vmem>>, %arg5: memref<3x32x4xf32, #tpu.memory_space<vmem>>, %arg6: memref<4x32xf32, #tpu.memory_space<vmem>>, %arg7: memref<3x1x32xf32, #tpu.memory_space<vmem>>, %arg8: memref<32x32xf32, #tpu.memory_space<vmem>>, %arg9: memref<1x32xf32, #tpu.memory_space<vmem>>, %arg10: memref<32x16xf32, #tpu.memory_space<vmem>>, %arg11: memref<1x16xf32, #tpu.memory_space<vmem>>, %arg12: memref<16x1xf32, #tpu.memory_space<vmem>>, %arg13: memref<1x1xf32, #tpu.memory_space<vmem>>, %arg14: memref<128x1xf32, #tpu.memory_space<vmem>>) attributes {dimension_semantics = [#tpu.dimension_semantics<parallel>], iteration_bounds = array<i64: 3>, scalar_prefetch = 0 : i64, scratch_operands = 0 : i64, tpu.core_type = #tpu.core_type<tc>, window_params = [{transform_indices = @transform_0, window_bounds = array<i64: 128, 32>}, {pipeline_mode = #tpu.pipeline_mode<synchronous>, transform_indices = @transform_1, window_bounds = array<i64: 3, 32, 32>}, {pipeline_mode = #tpu.pipeline_mode<synchronous>, transform_indices = @transform_2, window_bounds = array<i64: 3, 32, 32>}, {pipeline_mode = #tpu.pipeline_mode<synchronous>, transform_indices = @transform_3, window_bounds = array<i64: 3, 32, 32>}, {pipeline_mode = #tpu.pipeline_mode<synchronous>, transform_indices = @transform_4, window_bounds = array<i64: 3, 32, 4>}, {pipeline_mode = #tpu.pipeline_mode<synchronous>, transform_indices = @transform_5, window_bounds = array<i64: 4, 32>}, {pipeline_mode = #tpu.pipeline_mode<synchronous>, transform_indices = @transform_6, window_bounds = array<i64: 3, 1, 32>}, {pipeline_mode = #tpu.pipeline_mode<synchronous>, transform_indices = @transform_7, window_bounds = array<i64: 32, 32>}, {pipeline_mode = #tpu.pipeline_mode<synchronous>, transform_indices = @transform_8, window_bounds = array<i64: 1, 32>}, {pipeline_mode = #tpu.pipeline_mode<synchronous>, transform_indices = @transform_9, window_bounds = array<i64: 32, 16>}, {pipeline_mode = #tpu.pipeline_mode<synchronous>, transform_indices = @transform_10, window_bounds = array<i64: 1, 16>}, {pipeline_mode = #tpu.pipeline_mode<synchronous>, transform_indices = @transform_11, window_bounds = array<i64: 16, 1>}, {pipeline_mode = #tpu.pipeline_mode<synchronous>, transform_indices = @transform_12, window_bounds = array<i64: 1, 1>}, {transform_indices = @transform_13, window_bounds = array<i64: 128, 1>}]} {
    %c0 = arith.constant 0 : index
    %c0_0 = arith.constant 0 : index
    %0 = vector.load %arg1[%c0, %c0_0] : memref<128x32xf32, #tpu.memory_space<vmem>>, vector<128x32xf32>
    %c0_1 = arith.constant 0 : index
    %c0_2 = arith.constant 0 : index
    %c0_3 = arith.constant 0 : index
    %1 = vector.load %arg5[%c0_1, %c0_2, %c0_3] : memref<3x32x4xf32, #tpu.memory_space<vmem>>, vector<1x32x4xf32>
    %2 = vector.shape_cast %1 : vector<1x32x4xf32> to vector<32x4xf32>
    %cst = arith.constant dense<0.000000e+00> : vector<128x4xf32>
    %3 = tpu.matmul %0, %2, %cst {dimension_numbers = #tpu.dot_dimension_numbers<[1], [0], [0], [1], [0, 0, 1, 1], [], []>} : vector<128x32xf32>, vector<32x4xf32>, vector<128x4xf32> -> vector<128x4xf32>
    %cst_4 = arith.constant dense<0xFF800000> : vector<128xf32>
    %4 = vector.multi_reduction <maximumf>, %3, %cst_4 [1] : vector<128x4xf32> to vector<128xf32>
    %5 = vector.shape_cast %4 : vector<128xf32> to vector<128x1xf32>
    %6 = vector.broadcast %5 : vector<128x1xf32> to vector<128x4xf32>
    %7 = arith.subf %3, %6 : vector<128x4xf32>
    %8 = math.exp %7 : vector<128x4xf32>
    %cst_5 = arith.constant dense<0.000000e+00> : vector<128xf32>
    %9 = vector.multi_reduction <add>, %8, %cst_5 [1] : vector<128x4xf32> to vector<128xf32>
    %10 = vector.shape_cast %9 : vector<128xf32> to vector<128x1xf32>
    %11 = vector.broadcast %10 : vector<128x1xf32> to vector<128x4xf32>
    %12 = arith.divf %8, %11 : vector<128x4xf32>
    %c0_6 = arith.constant 0 : index
    %c0_7 = arith.constant 0 : index
    %13 = vector.load %arg6[%c0_6, %c0_7] : memref<4x32xf32, #tpu.memory_space<vmem>>, vector<4x32xf32>
    %cst_8 = arith.constant dense<0.000000e+00> : vector<128x32xf32>
    %14 = tpu.matmul %12, %13, %cst_8 {dimension_numbers = #tpu.dot_dimension_numbers<[1], [0], [0], [1], [0, 0, 1, 1], [], []>} : vector<128x4xf32>, vector<4x32xf32>, vector<128x32xf32> -> vector<128x32xf32>
    %c0_9 = arith.constant 0 : index
    %c0_10 = arith.constant 0 : index
    %c0_11 = arith.constant 0 : index
    %15 = vector.load %arg2[%c0_9, %c0_10, %c0_11] : memref<3x32x32xf32, #tpu.memory_space<vmem>>, vector<1x32x32xf32>
    %16 = vector.shape_cast %15 : vector<1x32x32xf32> to vector<32x32xf32>
    %cst_12 = arith.constant dense<0.000000e+00> : vector<128x32xf32>
    %17 = tpu.matmul %0, %16, %cst_12 {dimension_numbers = #tpu.dot_dimension_numbers<[1], [0], [0], [1], [0, 0, 1, 1], [], []>} : vector<128x32xf32>, vector<32x32xf32>, vector<128x32xf32> -> vector<128x32xf32>
    %c0_13 = arith.constant 0 : index
    %c0_14 = arith.constant 0 : index
    %c0_15 = arith.constant 0 : index
    %18 = vector.load %arg3[%c0_13, %c0_14, %c0_15] : memref<3x32x32xf32, #tpu.memory_space<vmem>>, vector<1x32x32xf32>
    %19 = vector.shape_cast %18 : vector<1x32x32xf32> to vector<32x32xf32>
    %cst_16 = arith.constant dense<0.000000e+00> : vector<128x32xf32>
    %20 = tpu.matmul %17, %19, %cst_16 {dimension_numbers = #tpu.dot_dimension_numbers<[1], [0], [0], [1], [0, 0, 1, 1], [], []>} : vector<128x32xf32>, vector<32x32xf32>, vector<128x32xf32> -> vector<128x32xf32>
    %21 = arith.mulf %20, %14 : vector<128x32xf32>
    %c0_17 = arith.constant 0 : index
    %c0_18 = arith.constant 0 : index
    %c0_19 = arith.constant 0 : index
    %22 = vector.load %arg4[%c0_17, %c0_18, %c0_19] : memref<3x32x32xf32, #tpu.memory_space<vmem>>, vector<1x32x32xf32>
    %23 = vector.shape_cast %22 : vector<1x32x32xf32> to vector<32x32xf32>
    %cst_20 = arith.constant dense<0.000000e+00> : vector<128x32xf32>
    %24 = tpu.matmul %21, %23, %cst_20 {dimension_numbers = #tpu.dot_dimension_numbers<[1], [0], [0], [1], [0, 0, 1, 1], [], []>} : vector<128x32xf32>, vector<32x32xf32>, vector<128x32xf32> -> vector<128x32xf32>
    %c0_21 = arith.constant 0 : index
    %c0_22 = arith.constant 0 : index
    %c0_23 = arith.constant 0 : index
    %25 = vector.load %arg7[%c0_21, %c0_22, %c0_23] : memref<3x1x32xf32, #tpu.memory_space<vmem>>, vector<1x1x32xf32>
    %26 = vector.shape_cast %25 : vector<1x1x32xf32> to vector<1x32xf32>
    %27 = vector.broadcast %26 : vector<1x32xf32> to vector<128x32xf32>
    %28 = arith.addf %24, %27 : vector<128x32xf32>
    %29 = arith.mulf %0, %28 : vector<128x32xf32>
    %30 = arith.addf %29, %0 : vector<128x32xf32>
    %c1 = arith.constant 1 : index
    %c0_24 = arith.constant 0 : index
    %c0_25 = arith.constant 0 : index
    %31 = vector.load %arg5[%c1, %c0_24, %c0_25] : memref<3x32x4xf32, #tpu.memory_space<vmem>>, vector<1x32x4xf32>
    %32 = vector.shape_cast %31 : vector<1x32x4xf32> to vector<32x4xf32>
    %cst_26 = arith.constant dense<0.000000e+00> : vector<128x4xf32>
    %33 = tpu.matmul %30, %32, %cst_26 {dimension_numbers = #tpu.dot_dimension_numbers<[1], [0], [0], [1], [0, 0, 1, 1], [], []>} : vector<128x32xf32>, vector<32x4xf32>, vector<128x4xf32> -> vector<128x4xf32>
    %cst_27 = arith.constant dense<0xFF800000> : vector<128xf32>
    %34 = vector.multi_reduction <maximumf>, %33, %cst_27 [1] : vector<128x4xf32> to vector<128xf32>
    %35 = vector.shape_cast %34 : vector<128xf32> to vector<128x1xf32>
    %36 = vector.broadcast %35 : vector<128x1xf32> to vector<128x4xf32>
    %37 = arith.subf %33, %36 : vector<128x4xf32>
    %38 = math.exp %37 : vector<128x4xf32>
    %cst_28 = arith.constant dense<0.000000e+00> : vector<128xf32>
    %39 = vector.multi_reduction <add>, %38, %cst_28 [1] : vector<128x4xf32> to vector<128xf32>
    %40 = vector.shape_cast %39 : vector<128xf32> to vector<128x1xf32>
    %41 = vector.broadcast %40 : vector<128x1xf32> to vector<128x4xf32>
    %42 = arith.divf %38, %41 : vector<128x4xf32>
    %c0_29 = arith.constant 0 : index
    %c0_30 = arith.constant 0 : index
    %43 = vector.load %arg6[%c0_29, %c0_30] : memref<4x32xf32, #tpu.memory_space<vmem>>, vector<4x32xf32>
    %cst_31 = arith.constant dense<0.000000e+00> : vector<128x32xf32>
    %44 = tpu.matmul %42, %43, %cst_31 {dimension_numbers = #tpu.dot_dimension_numbers<[1], [0], [0], [1], [0, 0, 1, 1], [], []>} : vector<128x4xf32>, vector<4x32xf32>, vector<128x32xf32> -> vector<128x32xf32>
    %c1_32 = arith.constant 1 : index
    %c0_33 = arith.constant 0 : index
    %c0_34 = arith.constant 0 : index
    %45 = vector.load %arg2[%c1_32, %c0_33, %c0_34] : memref<3x32x32xf32, #tpu.memory_space<vmem>>, vector<1x32x32xf32>
    %46 = vector.shape_cast %45 : vector<1x32x32xf32> to vector<32x32xf32>
    %cst_35 = arith.constant dense<0.000000e+00> : vector<128x32xf32>
    %47 = tpu.matmul %30, %46, %cst_35 {dimension_numbers = #tpu.dot_dimension_numbers<[1], [0], [0], [1], [0, 0, 1, 1], [], []>} : vector<128x32xf32>, vector<32x32xf32>, vector<128x32xf32> -> vector<128x32xf32>
    %c1_36 = arith.constant 1 : index
    %c0_37 = arith.constant 0 : index
    %c0_38 = arith.constant 0 : index
    %48 = vector.load %arg3[%c1_36, %c0_37, %c0_38] : memref<3x32x32xf32, #tpu.memory_space<vmem>>, vector<1x32x32xf32>
    %49 = vector.shape_cast %48 : vector<1x32x32xf32> to vector<32x32xf32>
    %cst_39 = arith.constant dense<0.000000e+00> : vector<128x32xf32>
    %50 = tpu.matmul %47, %49, %cst_39 {dimension_numbers = #tpu.dot_dimension_numbers<[1], [0], [0], [1], [0, 0, 1, 1], [], []>} : vector<128x32xf32>, vector<32x32xf32>, vector<128x32xf32> -> vector<128x32xf32>
    %51 = arith.mulf %50, %44 : vector<128x32xf32>
    %c1_40 = arith.constant 1 : index
    %c0_41 = arith.constant 0 : index
    %c0_42 = arith.constant 0 : index
    %52 = vector.load %arg4[%c1_40, %c0_41, %c0_42] : memref<3x32x32xf32, #tpu.memory_space<vmem>>, vector<1x32x32xf32>
    %53 = vector.shape_cast %52 : vector<1x32x32xf32> to vector<32x32xf32>
    %cst_43 = arith.constant dense<0.000000e+00> : vector<128x32xf32>
    %54 = tpu.matmul %51, %53, %cst_43 {dimension_numbers = #tpu.dot_dimension_numbers<[1], [0], [0], [1], [0, 0, 1, 1], [], []>} : vector<128x32xf32>, vector<32x32xf32>, vector<128x32xf32> -> vector<128x32xf32>
    %c1_44 = arith.constant 1 : index
    %c0_45 = arith.constant 0 : index
    %c0_46 = arith.constant 0 : index
    %55 = vector.load %arg7[%c1_44, %c0_45, %c0_46] : memref<3x1x32xf32, #tpu.memory_space<vmem>>, vector<1x1x32xf32>
    %56 = vector.shape_cast %55 : vector<1x1x32xf32> to vector<1x32xf32>
    %57 = vector.broadcast %56 : vector<1x32xf32> to vector<128x32xf32>
    %58 = arith.addf %54, %57 : vector<128x32xf32>
    %59 = arith.mulf %0, %58 : vector<128x32xf32>
    %60 = arith.addf %59, %30 : vector<128x32xf32>
    %c2 = arith.constant 2 : index
    %c0_47 = arith.constant 0 : index
    %c0_48 = arith.constant 0 : index
    %61 = vector.load %arg5[%c2, %c0_47, %c0_48] : memref<3x32x4xf32, #tpu.memory_space<vmem>>, vector<1x32x4xf32>
    %62 = vector.shape_cast %61 : vector<1x32x4xf32> to vector<32x4xf32>
    %cst_49 = arith.constant dense<0.000000e+00> : vector<128x4xf32>
    %63 = tpu.matmul %60, %62, %cst_49 {dimension_numbers = #tpu.dot_dimension_numbers<[1], [0], [0], [1], [0, 0, 1, 1], [], []>} : vector<128x32xf32>, vector<32x4xf32>, vector<128x4xf32> -> vector<128x4xf32>
    %cst_50 = arith.constant dense<0xFF800000> : vector<128xf32>
    %64 = vector.multi_reduction <maximumf>, %63, %cst_50 [1] : vector<128x4xf32> to vector<128xf32>
    %65 = vector.shape_cast %64 : vector<128xf32> to vector<128x1xf32>
    %66 = vector.broadcast %65 : vector<128x1xf32> to vector<128x4xf32>
    %67 = arith.subf %63, %66 : vector<128x4xf32>
    %68 = math.exp %67 : vector<128x4xf32>
    %cst_51 = arith.constant dense<0.000000e+00> : vector<128xf32>
    %69 = vector.multi_reduction <add>, %68, %cst_51 [1] : vector<128x4xf32> to vector<128xf32>
    %70 = vector.shape_cast %69 : vector<128xf32> to vector<128x1xf32>
    %71 = vector.broadcast %70 : vector<128x1xf32> to vector<128x4xf32>
    %72 = arith.divf %68, %71 : vector<128x4xf32>
    %c0_52 = arith.constant 0 : index
    %c0_53 = arith.constant 0 : index
    %73 = vector.load %arg6[%c0_52, %c0_53] : memref<4x32xf32, #tpu.memory_space<vmem>>, vector<4x32xf32>
    %cst_54 = arith.constant dense<0.000000e+00> : vector<128x32xf32>
    %74 = tpu.matmul %72, %73, %cst_54 {dimension_numbers = #tpu.dot_dimension_numbers<[1], [0], [0], [1], [0, 0, 1, 1], [], []>} : vector<128x4xf32>, vector<4x32xf32>, vector<128x32xf32> -> vector<128x32xf32>
    %c2_55 = arith.constant 2 : index
    %c0_56 = arith.constant 0 : index
    %c0_57 = arith.constant 0 : index
    %75 = vector.load %arg2[%c2_55, %c0_56, %c0_57] : memref<3x32x32xf32, #tpu.memory_space<vmem>>, vector<1x32x32xf32>
    %76 = vector.shape_cast %75 : vector<1x32x32xf32> to vector<32x32xf32>
    %cst_58 = arith.constant dense<0.000000e+00> : vector<128x32xf32>
    %77 = tpu.matmul %60, %76, %cst_58 {dimension_numbers = #tpu.dot_dimension_numbers<[1], [0], [0], [1], [0, 0, 1, 1], [], []>} : vector<128x32xf32>, vector<32x32xf32>, vector<128x32xf32> -> vector<128x32xf32>
    %c2_59 = arith.constant 2 : index
    %c0_60 = arith.constant 0 : index
    %c0_61 = arith.constant 0 : index
    %78 = vector.load %arg3[%c2_59, %c0_60, %c0_61] : memref<3x32x32xf32, #tpu.memory_space<vmem>>, vector<1x32x32xf32>
    %79 = vector.shape_cast %78 : vector<1x32x32xf32> to vector<32x32xf32>
    %cst_62 = arith.constant dense<0.000000e+00> : vector<128x32xf32>
    %80 = tpu.matmul %77, %79, %cst_62 {dimension_numbers = #tpu.dot_dimension_numbers<[1], [0], [0], [1], [0, 0, 1, 1], [], []>} : vector<128x32xf32>, vector<32x32xf32>, vector<128x32xf32> -> vector<128x32xf32>
    %81 = arith.mulf %80, %74 : vector<128x32xf32>
    %c2_63 = arith.constant 2 : index
    %c0_64 = arith.constant 0 : index
    %c0_65 = arith.constant 0 : index
    %82 = vector.load %arg4[%c2_63, %c0_64, %c0_65] : memref<3x32x32xf32, #tpu.memory_space<vmem>>, vector<1x32x32xf32>
    %83 = vector.shape_cast %82 : vector<1x32x32xf32> to vector<32x32xf32>
    %cst_66 = arith.constant dense<0.000000e+00> : vector<128x32xf32>
    %84 = tpu.matmul %81, %83, %cst_66 {dimension_numbers = #tpu.dot_dimension_numbers<[1], [0], [0], [1], [0, 0, 1, 1], [], []>} : vector<128x32xf32>, vector<32x32xf32>, vector<128x32xf32> -> vector<128x32xf32>
    %c2_67 = arith.constant 2 : index
    %c0_68 = arith.constant 0 : index
    %c0_69 = arith.constant 0 : index
    %85 = vector.load %arg7[%c2_67, %c0_68, %c0_69] : memref<3x1x32xf32, #tpu.memory_space<vmem>>, vector<1x1x32xf32>
    %86 = vector.shape_cast %85 : vector<1x1x32xf32> to vector<1x32xf32>
    %87 = vector.broadcast %86 : vector<1x32xf32> to vector<128x32xf32>
    %88 = arith.addf %84, %87 : vector<128x32xf32>
    %89 = arith.mulf %0, %88 : vector<128x32xf32>
    %90 = arith.addf %89, %60 : vector<128x32xf32>
    %c0_70 = arith.constant 0 : index
    %c0_71 = arith.constant 0 : index
    %91 = vector.load %arg8[%c0_70, %c0_71] : memref<32x32xf32, #tpu.memory_space<vmem>>, vector<32x32xf32>
    %cst_72 = arith.constant dense<0.000000e+00> : vector<128x32xf32>
    %92 = tpu.matmul %90, %91, %cst_72 {dimension_numbers = #tpu.dot_dimension_numbers<[1], [0], [0], [1], [0, 0, 1, 1], [], []>} : vector<128x32xf32>, vector<32x32xf32>, vector<128x32xf32> -> vector<128x32xf32>
    %c0_73 = arith.constant 0 : index
    %c0_74 = arith.constant 0 : index
    %93 = vector.load %arg9[%c0_73, %c0_74] : memref<1x32xf32, #tpu.memory_space<vmem>>, vector<1x32xf32>
    %94 = vector.broadcast %93 : vector<1x32xf32> to vector<128x32xf32>
    %95 = arith.addf %92, %94 : vector<128x32xf32>
    %cst_75 = arith.constant 0.000000e+00 : f32
    %96 = vector.broadcast %cst_75 : f32 to vector<128x32xf32>
    %97 = arith.maximumf %95, %96 : vector<128x32xf32>
    %c0_76 = arith.constant 0 : index
    %c0_77 = arith.constant 0 : index
    %98 = vector.load %arg10[%c0_76, %c0_77] : memref<32x16xf32, #tpu.memory_space<vmem>>, vector<32x16xf32>
    %cst_78 = arith.constant dense<0.000000e+00> : vector<128x16xf32>
    %99 = tpu.matmul %97, %98, %cst_78 {dimension_numbers = #tpu.dot_dimension_numbers<[1], [0], [0], [1], [0, 0, 1, 1], [], []>} : vector<128x32xf32>, vector<32x16xf32>, vector<128x16xf32> -> vector<128x16xf32>
    %c0_79 = arith.constant 0 : index
    %c0_80 = arith.constant 0 : index
    %100 = vector.load %arg11[%c0_79, %c0_80] : memref<1x16xf32, #tpu.memory_space<vmem>>, vector<1x16xf32>
    %101 = vector.broadcast %100 : vector<1x16xf32> to vector<128x16xf32>
    %102 = arith.addf %99, %101 : vector<128x16xf32>
    %cst_81 = arith.constant 0.000000e+00 : f32
    %103 = vector.broadcast %cst_81 : f32 to vector<128x16xf32>
    %104 = arith.maximumf %102, %103 : vector<128x16xf32>
    %c0_82 = arith.constant 0 : index
    %c0_83 = arith.constant 0 : index
    %105 = vector.load %arg12[%c0_82, %c0_83] : memref<16x1xf32, #tpu.memory_space<vmem>>, vector<16x1xf32>
    %cst_84 = arith.constant dense<0.000000e+00> : vector<128x1xf32>
    %106 = tpu.matmul %104, %105, %cst_84 {dimension_numbers = #tpu.dot_dimension_numbers<[1], [0], [0], [1], [0, 0, 1, 1], [], []>} : vector<128x16xf32>, vector<16x1xf32>, vector<128x1xf32> -> vector<128x1xf32>
    %c0_85 = arith.constant 0 : index
    %c0_86 = arith.constant 0 : index
    %107 = vector.load %arg13[%c0_85, %c0_86] : memref<1x1xf32, #tpu.memory_space<vmem>>, vector<1x1xf32>
    %108 = vector.broadcast %107 : vector<1x1xf32> to vector<128x1xf32>
    %109 = arith.addf %106, %108 : vector<128x1xf32>
    %c0_87 = arith.constant 0 : index
    %c0_88 = arith.constant 0 : index
    %110 = vector.load %arg14[%c0_87, %c0_88] : memref<128x1xf32, #tpu.memory_space<vmem>>, vector<128x1xf32>
    tpu.vector_store %arg14[%c0_87, %c0_88], %109 {strides = array<i32>} : memref<128x1xf32, #tpu.memory_space<vmem>>, vector<128x1xf32>,
    return
  }
  func.func @transform_0(%arg0: i32) -> (i32, i32) {
    %c0_i32 = arith.constant 0 : i32
    %c0_i32_0 = arith.constant 0 : i32
    return %arg0, %c0_i32 : i32, i32
  }
  func.func @transform_1(%arg0: i32) -> (i32, i32, i32) {
    %c0_i32 = arith.constant 0 : i32
    %c0_i32_0 = arith.constant 0 : i32
    %c0_i32_1 = arith.constant 0 : i32
    %c0_i32_2 = arith.constant 0 : i32
    return %c0_i32, %c0_i32_0, %c0_i32_1 : i32, i32, i32
  }
  func.func @transform_2(%arg0: i32) -> (i32, i32, i32) {
    %c0_i32 = arith.constant 0 : i32
    %c0_i32_0 = arith.constant 0 : i32
    %c0_i32_1 = arith.constant 0 : i32
    %c0_i32_2 = arith.constant 0 : i32
    return %c0_i32, %c0_i32_0, %c0_i32_1 : i32, i32, i32
  }
  func.func @transform_3(%arg0: i32) -> (i32, i32, i32) {
    %c0_i32 = arith.constant 0 : i32
    %c0_i32_0 = arith.constant 0 : i32
    %c0_i32_1 = arith.constant 0 : i32
    %c0_i32_2 = arith.constant 0 : i32
    return %c0_i32, %c0_i32_0, %c0_i32_1 : i32, i32, i32
  }
  func.func @transform_4(%arg0: i32) -> (i32, i32, i32) {
    %c0_i32 = arith.constant 0 : i32
    %c0_i32_0 = arith.constant 0 : i32
    %c0_i32_1 = arith.constant 0 : i32
    %c0_i32_2 = arith.constant 0 : i32
    return %c0_i32, %c0_i32_0, %c0_i32_1 : i32, i32, i32
  }
  func.func @transform_5(%arg0: i32) -> (i32, i32) {
    %c0_i32 = arith.constant 0 : i32
    %c0_i32_0 = arith.constant 0 : i32
    %c0_i32_1 = arith.constant 0 : i32
    return %c0_i32, %c0_i32_0 : i32, i32
  }
  func.func @transform_6(%arg0: i32) -> (i32, i32, i32) {
    %c0_i32 = arith.constant 0 : i32
    %c0_i32_0 = arith.constant 0 : i32
    %c0_i32_1 = arith.constant 0 : i32
    %c0_i32_2 = arith.constant 0 : i32
    return %c0_i32, %c0_i32_0, %c0_i32_1 : i32, i32, i32
  }
  func.func @transform_7(%arg0: i32) -> (i32, i32) {
    %c0_i32 = arith.constant 0 : i32
    %c0_i32_0 = arith.constant 0 : i32
    %c0_i32_1 = arith.constant 0 : i32
    return %c0_i32, %c0_i32_0 : i32, i32
  }
  func.func @transform_8(%arg0: i32) -> (i32, i32) {
    %c0_i32 = arith.constant 0 : i32
    %c0_i32_0 = arith.constant 0 : i32
    %c0_i32_1 = arith.constant 0 : i32
    return %c0_i32, %c0_i32_0 : i32, i32
  }
  func.func @transform_9(%arg0: i32) -> (i32, i32) {
    %c0_i32 = arith.constant 0 : i32
    %c0_i32_0 = arith.constant 0 : i32
    %c0_i32_1 = arith.constant 0 : i32
    return %c0_i32, %c0_i32_0 : i32, i32
  }
  func.func @transform_10(%arg0: i32) -> (i32, i32) {
    %c0_i32 = arith.constant 0 : i32
    %c0_i32_0 = arith.constant 0 : i32
    %c0_i32_1 = arith.constant 0 : i32
    return %c0_i32, %c0_i32_0 : i32, i32
  }
  func.func @transform_11(%arg0: i32) -> (i32, i32) {
    %c0_i32 = arith.constant 0 : i32
    %c0_i32_0 = arith.constant 0 : i32
    %c0_i32_1 = arith.constant 0 : i32
    return %c0_i32, %c0_i32_0 : i32, i32
  }
  func.func @transform_12(%arg0: i32) -> (i32, i32) {
    %c0_i32 = arith.constant 0 : i32
    %c0_i32_0 = arith.constant 0 : i32
    %c0_i32_1 = arith.constant 0 : i32
    return %c0_i32, %c0_i32_0 : i32, i32
  }
  func.func @transform_13(%arg0: i32) -> (i32, i32) {
    %c0_i32 = arith.constant 0 : i32
    %c0_i32_0 = arith.constant 0 : i32
    return %arg0, %c0_i32 : i32, i32
  }
}

</mosaic_0001>

<bundles_post_ra>
// kernel: tpu_custom_call.1
= control target key start
LH: loop header
LB: loop body
LE: loop exit
PB: predicated region body
PF: predicated region fallthrough
CT: control target
= control target key end

     0   :  { %s6346_s27 = smov 0   ;;  %s7894_s0 = inlined_call_operand.vmem [shape: f32[384,32], index: 0, kind: input, shape index: {}]   ;;  %s7895_s1 = inlined_call_operand.vmem [shape: f32[3,32,32], index: 1, kind: input, shape index: {}]   ;;  %s7896_s2 = inlined_call_operand.vmem [shape: f32[3,32,32], index: 2, kind: input, shape index: {}]   ;;  %s7897_s3 = inlined_call_operand.vmem [shape: f32[3,32,32], index: 3, kind: input, shape index: {}]   ;;  %s7898_s4 = inlined_call_operand.vmem [shape: f32[3,32,4], index: 4, kind: input, shape index: {}]   ;;  %s7899_s5 = inlined_call_operand.vmem [shape: f32[4,32], index: 5, kind: input, shape index: {}]   ;;  %s7900_s6 = inlined_call_operand.vmem [shape: f32[3,1,32], index: 6, kind: input, shape index: {}]   ;;  %s7901_s7 = inlined_call_operand.vmem [shape: f32[32,32], index: 7, kind: input, shape index: {}]   ;;  %s7902_s8 = inlined_call_operand.vmem [shape: f32[1,32], index: 8, kind: input, shape index: {}]   ;;  %s7903_s9 = inlined_call_operand.vmem [shape: f32[32,16], index: 9, kind: input, shape index: {}]   ;;  %s7904_s10 = inlined_call_operand.vmem [shape: f32[1,16], index: 10, kind: input, shape index: {}]   ;;  %s7905_s11 = inlined_call_operand.vmem [shape: f32[16,1], index: 11, kind: input, shape index: {}]   ;;  %s7906_s12 = inlined_call_operand.<no memory space> [shape: f32[1,1], index: 12, kind: input, shape index: {}]   ;;  %s7907_s13 = inlined_call_operand.vmem [shape: f32[384,1], index: 13, kind: output, shape index: {}]  }
   0x1   :  { %v18_v0 = vstv %s7906_s12 }
   0x2   :  { %19 = vst [vmem:[#allocation2] sm:$0x1] %v18_v0 }
   0x3 LB: > { %s4687_s28 = sadd.s32 4294967295, %s6271_s27   ;;  %p4691_p0 = scmp.ge.s32.totalorder %s6271_s27, 1  ;;  %s6271_s27 = sphi %s6346_s27, %s25_s27  }
   0x4   : > { %p390_p1 = scmp.lt.s32.totalorder %s6271_s27, 4 }
   0x6   : > { %p391_p2 = pnand %p4691_p0, %p390_p1 }
   0x8   : > { %394 = sbr.rel (%p391_p2) target bundleno = 3911 (0xf47), region = 72 }
   0xf   : > { %v462_v1 = vld [vmem:[%s7898_s4] sm:$0xff]  ;;  %v463_v2 = vld [vmem:[%s7898_s4 + $0x8] sm:$0xff]  ;;  %v464_v3 = vld [vmem:[%s7898_s4 + $0x10] sm:$0xff]  ;;  %s4692_s17 = sshll.u32 %s4687_s28, 4  ;;  %vm466_vm0 = vcmask 261120   ;;  %vm660_vm1 = vcmask 31744  }
  0x10   : > { %v5932_v4 = vpack.c.bf16 %v463_v2, %v462_v1  ;;  %v465_v5 = vld [vmem:[%s7898_s4 + $0x18] sm:$0xff]  ;;  %p435_p3 = scmp.lt.s32.totalorder %s4692_s17, 47  ;;  %vm886_vm2 = vcmask 1043456   ;;  %vm4420_vm3 = vcmask 130048   ;;  %vm4614_vm4 = vcmask 7168  }
  0x11   : > { %v5936_v6 = vpack.c.bf16 %v465_v5, %v464_v3 }
  0x12   : > { %5933 = vmatprep.subr.bf16.mxu0 %v5932_v4  ;;  %s7954_s17 = smov (!%p435_p3, %s4692_s17), 47 }
  0x13   : > { %5935 = vmatpush3.bf16.msra.mxu0 %v5932_v4  ;;  %s4693_s20 = sshll.u32 %s7954_s17, 3 }
  0x14   : > { %5937 = vmatprep.subr.bf16.mxu0 %v5936_v6  ;;  %s6374_s23 = scalar_lea.vmem %s7894_s0, %s4693_s20  ;;  %s7857_s16 = scalar_lea.vmem %s7907_s13, %s4693_s20 }
  0x15   : > { %v6377_v7 = vld [vmem:[%s6374_s23] sm:$0xff]  ;;  %v6382_v8 = vld [vmem:[%s6374_s23 + $0x8] sm:$0xff]  ;;  %v6385_v9 = vld [vmem:[%s6374_s23 + $0x10] sm:$0xff] }
  0x16   : > { %5386 = vmatprep.mubr.msk.f32.mxu0 %vm466_vm0, %v6377_v7  ;;  %v6392_v10 = vld [vmem:[%s6374_s23 + $0x18] sm:$0xff]  ;;  %v6395_v11 = vld [vmem:[%s6374_s23 + $0x20] sm:$0xff]  ;;  %v6402_v12 = vld [vmem:[%s6374_s23 + $0x28] sm:$0xff] }
  0x17   : > { %5939 = vmatpush3.bf16.msra.mxu0 %v5936_v6  ;;  %v6405_v13 = vld [vmem:[%s6374_s23 + $0x30] sm:$0xff]  ;;  %v6412_v14 = vld [vmem:[%s6374_s23 + $0x38] sm:$0xff]  ;;  %v6415_v15 = vld [vmem:[%s6374_s23 + $0x40] sm:$0xff] }
  0x18   : > { %v6422_v16 = vld [vmem:[%s6374_s23 + $0x48] sm:$0xff]  ;;  %v6425_v17 = vld [vmem:[%s6374_s23 + $0x50] sm:$0xff]  ;;  %v6432_v18 = vld [vmem:[%s6374_s23 + $0x58] sm:$0xff] }
  0x19   : > { %v6435_v19 = vld [vmem:[%s6374_s23 + $0x60] sm:$0xff]  ;;  %v6442_v20 = vld [vmem:[%s6374_s23 + $0x68] sm:$0xff]  ;;  %v6445_v21 = vld [vmem:[%s6374_s23 + $0x70] sm:$0xff] }
  0x1a   : > { %5387 = vmatmul.mubr.msk.f32.vlgmr.msra.gmra.mrb[0].mxu0 %vm466_vm0, %v6382_v8  ;;  %v6452_v22 = vld [vmem:[%s6374_s23 + $0x78] sm:$0xff] }
  0x1b   : > { %5389 = vmatprep.mubr.msk.f32.mxu0 %vm466_vm0, %v6385_v9 }
  0x1e   : > { %5390 = vmatmul.mubr.msk.f32.gmra.mrb[2].mxu0 %vm466_vm0, %v6392_v10 }
  0x1f   : > { %5392 = vmatprep.mubr.msk.f32.mxu0 %vm466_vm0, %v6395_v11 }
  0x22   : > { %5393 = vmatmul.mubr.msk.f32.gmra.mrb[4].mxu0 %vm466_vm0, %v6402_v12 }
  0x23   : > { %5395 = vmatprep.mubr.msk.f32.mxu0 %vm466_vm0, %v6405_v13 }
  0x26   : > { %5396 = vmatmul.mubr.msk.f32.gmra.mrb[6].mxu0 %vm466_vm0, %v6412_v14 }
  0x27   : > { %5398 = vmatprep.mubr.msk.f32.mxu0 %vm466_vm0, %v6415_v15 }
  0x2a   : > { %5399 = vmatmul.mubr.msk.f32.gmra.mrb[8].mxu0 %vm466_vm0, %v6422_v16 }
  0x2b   : > { %5401 = vmatprep.mubr.msk.f32.mxu0 %vm466_vm0, %v6425_v17 }
  0x2e   : > { %5402 = vmatmul.mubr.msk.f32.gmra.mrb[10].mxu0 %vm466_vm0, %v6432_v18 }
  0x2f   : > { %5404 = vmatprep.mubr.msk.f32.mxu0 %vm466_vm0, %v6435_v19 }
  0x32   : > { %5405 = vmatmul.mubr.msk.f32.gmra.mrb[12].mxu0 %vm466_vm0, %v6442_v20 }
  0x33   : > { %5407 = vmatprep.mubr.msk.f32.mxu0 %vm466_vm0, %v6445_v21 }
  0x36   : > { %5408 = vmatmul.mubr.msk.f32.gmra.mrb[14].mxu0 %vm466_vm0, %v6452_v22 }
  0xed   : > { %v5388_v23 = vpop.f32.mrb[0].mxu0 }
  0xee   : > { %v581_v24 = vpop.f32.mrb[1].mxu0  ;;  %v664_v28 = vsel %vm660_vm1, %v5388_v23, -inf }
  0xef   : > { %v661_v25 = vsel %vm660_vm1, %v581_v24, -inf }
  0xf0   : > { %662 = vmax.xlane.f32.xlu0 %v661_v25 }
  0xf1   : > { %v5391_v26 = vpop.f32.mrb[2].mxu0 }
  0xf2   : > { %v591_v27 = vpop.f32.mrb[3].mxu0  ;;  %v670_v32 = vsel %vm660_vm1, %v5391_v26, -inf }
  0xf3   : > { %v667_v29 = vsel %vm660_vm1, %v591_v27, -inf }
  0xf4   : > { %665 = vmax.xlane.f32.xlu0 %v664_v28  ;;  %668 = vmax.xlane.f32.xlu1 %v667_v29 }
  0xf5   : > { %v6459_v30 = vpop.f32.mrb[4].mxu0 }
  0xf6   : > { %v601_v31 = vpop.f32.mrb[5].mxu0  ;;  %v676_v36 = vsel %vm660_vm1, %v6459_v30, -inf }
  0xf7   : > { %v673_v33 = vsel %vm660_vm1, %v601_v31, -inf }
  0xf8   : > { %671 = vmax.xlane.f32.xlu1 %v670_v32  ;;  %674 = vmax.xlane.f32.xlu0 %v673_v33 }
  0xf9   : > { %v6463_v34 = vpop.f32.mrb[6].mxu0 }
  0xfa   : > { %v611_v35 = vpop.f32.mrb[7].mxu0  ;;  %v682_v40 = vsel %vm660_vm1, %v6463_v34, -inf }
  0xfb   : > { %v679_v37 = vsel %vm660_vm1, %v611_v35, -inf }
  0xfc   : > { %677 = vmax.xlane.f32.xlu1 %v676_v36  ;;  %680 = vmax.xlane.f32.xlu0 %v679_v37 }
  0xfd   : > { %v6468_v38 = vpop.f32.mrb[8].mxu0 }
  0xfe   : > { %v621_v39 = vpop.f32.mrb[9].mxu0  ;;  %v688_v44 = vsel %vm660_vm1, %v6468_v38, -inf }
  0xff   : > { %v685_v41 = vsel %vm660_vm1, %v621_v39, -inf }
 0x100   : > { %683 = vmax.xlane.f32.xlu1 %v682_v40  ;;  %686 = vmax.xlane.f32.xlu0 %v685_v41 }
 0x101   : > { %v6473_v42 = vpop.f32.mrb[10].mxu0 }
 0x102   : > { %v6475_v43 = vpop.f32.mrb[11].mxu0  ;;  %v694_v48 = vsel %vm660_vm1, %v6473_v42, -inf }
 0x103   : > { %v691_v45 = vsel %vm660_vm1, %v6475_v43, -inf }
 0x104   : > { %689 = vmax.xlane.f32.xlu1 %v688_v44  ;;  %692 = vmax.xlane.f32.xlu0 %v691_v45 }
 0x105   : > { %v6481_v46 = vpop.f32.mrb[12].mxu0 }
 0x106   : > { %v6483_v47 = vpop.f32.mrb[13].mxu0  ;;  %v700_v52 = vsel %vm660_vm1, %v6481_v46, -inf }
 0x107   : > { %v697_v49 = vsel %vm660_vm1, %v6483_v47, -inf }
 0x108   : > { %695 = vmax.xlane.f32.xlu1 %v694_v48  ;;  %698 = vmax.xlane.f32.xlu0 %v697_v49 }
 0x109   : > { %v6489_v50 = vpop.f32.mrb[14].mxu0 }
 0x10a   : > { %v6491_v51 = vpop.f32.mrb[15].mxu0  ;;  %v706_v54 = vsel %vm660_vm1, %v6489_v50, -inf }
 0x10b   : > { %v703_v53 = vsel %vm660_vm1, %v6491_v51, -inf }
 0x10c   : > { %701 = vmax.xlane.f32.xlu1 %v700_v52  ;;  %704 = vmax.xlane.f32.xlu0 %v703_v53 }
 0x110   : > { %707 = vmax.xlane.f32.xlu1 %v706_v54 }
 0x17d   : > { %v663_v55 = vpop.xlane.xlu0 %662 }
 0x17e   : > { %v709_v56 = vsub.f32 %v581_v24, %v663_v55 }
 0x180   : > { %v725_v57 = vmul.f32 1.442695, %v709_v56 }
 0x181   : > { %v666_v58 = vpop.xlane.xlu0 %665  ;;  %v669_v59 = vpop.xlane.xlu1 %668 }
 0x182   : > { %6056 = vpow2.f32 %v725_v57  ;;  %v710_v60 = vsub.f32 %v5388_v23, %v666_v58  ;;  %v711_v61 = vsub.f32 %v591_v27, %v669_v59 }
 0x184   : > { %v727_v62 = vmul.f32 1.442695, %v710_v60  ;;  %v729_v63 = vmul.f32 1.442695, %v711_v61 }
 0x185   : > { %v672_v0 = vpop.xlane.xlu1 %671  ;;  %v675_v1 = vpop.xlane.xlu0 %674 }
 0x186   : > { %6058 = vpow2.f32 %v727_v62  ;;  %v712_v2 = vsub.f32 %v5391_v26, %v672_v0  ;;  %v713_v3 = vsub.f32 %v601_v31, %v675_v1 }
 0x187   : > { %6060 = vpow2.f32 %v729_v63 }
 0x188   : > { %v731_v4 = vmul.f32 1.442695, %v712_v2  ;;  %v733_v5 = vmul.f32 1.442695, %v713_v3 }
 0x189   : > { %v678_v6 = vpop.xlane.xlu1 %677  ;;  %v681_v25 = vpop.xlane.xlu0 %680 }
 0x18a   : > { %6062 = vpow2.f32 %v731_v4  ;;  %v714_v24 = vsub.f32 %v6459_v30, %v678_v6  ;;  %v715_v28 = vsub.f32 %v611_v35, %v681_v25 }
 0x18b   : > { %6064 = vpow2.f32 %v733_v5 }
 0x18c   : > { %v6500_v29 = vpop.eup %6056  ;;  %v735_v23 = vmul.f32 1.442695, %v714_v24  ;;  %v737_v27 = vmul.f32 1.442695, %v715_v28 }
 0x18d   : > { %v684_v32 = vpop.xlane.xlu1 %683  ;;  %v687_v33 = vpop.xlane.xlu0 %686  ;;  %v757_v26 = vsel %vm660_vm1, %v6500_v29, 0.0 }
 0x18e   : > { %6066 = vpow2.f32 %v735_v23  ;;  %v716_v31 = vsub.f32 %v6463_v34, %v684_v32  ;;  %v717_v36 = vsub.f32 %v621_v39, %v687_v33  ;;  %758 = vadd.xlane.f32.xlu0 %v757_v26 }
 0x18f   : > { %6068 = vpow2.f32 %v737_v27 }
 0x190   : > { %v6505_v37 = vpop.eup %6058  ;;  %v739_v30 = vmul.f32 1.442695, %v716_v31  ;;  %v741_v35 = vmul.f32 1.442695, %v717_v36 }
 0x191   : > { %v6507_v40 = vpop.eup %6060  ;;  %v690_v41 = vpop.xlane.xlu1 %689  ;;  %v760_v45 = vsel %vm660_vm1, %v6505_v37, 0.0 }
 0x192   : > { %v693_v44 = vpop.xlane.xlu0 %692  ;;  %6070 = vpow2.f32 %v739_v30  ;;  %v718_v48 = vsub.f32 %v6468_v38, %v690_v41  ;;  %761 = vadd.xlane.f32.xlu1 %v760_v45  ;;  %v763_v34 = vsel %vm660_vm1, %v6507_v40, 0.0 }
 0x193   : > { %v719_v49 = vsub.f32 %v6475_v43, %v693_v44  ;;  %6072 = vpow2.f32 %v741_v35  ;;  %764 = vadd.xlane.f32.xlu0 %v763_v34  ;;  %v6569_v44 = vld [vmem:[%s7899_s5] sm:$0xf] }
 0x194   : > { %v6515_v39 = vpop.eup %6062  ;;  %v743_v52 = vmul.f32 1.442695, %v718_v48  ;;  %5410 = vmatprep.subr.msk.mxu1 %vm886_vm2, %v6569_v44  ;;  %v1035_v34 = vld [vmem:[%s7895_s1] sm:$0xff] }
 0x195   : > { %v745_v53 = vmul.f32 1.442695, %v719_v49  ;;  %v6517_v54 = vpop.eup %6064  ;;  %v696_v55 = vpop.xlane.xlu1 %695  ;;  %v766_v57 = vsel %vm660_vm1, %v6515_v39, 0.0  ;;  %5411 = vmatpush3.msk.msra.mxu1 %vm886_vm2, %v6569_v44 }
 0x196   : > { %v699_v56 = vpop.xlane.xlu0 %698  ;;  %6074 = vpow2.f32 %v743_v52  ;;  %v720_v38 = vsub.f32 %v6473_v42, %v696_v55  ;;  %767 = vadd.xlane.f32.xlu1 %v766_v57  ;;  %v769_v58 = vsel %vm660_vm1, %v6517_v54, 0.0  ;;  %v1036_v52 = vld [vmem:[%s7895_s1 + $0x8] sm:$0xff] }
 0x197   : > { %v721_v43 = vsub.f32 %v6483_v47, %v699_v56  ;;  %6076 = vpow2.f32 %v745_v53  ;;  %770 = vadd.xlane.f32.xlu0 %v769_v58  ;;  %v5940_v53 = vpack.c.bf16 %v1036_v52, %v1035_v34 }
 0x198   : > { %v6525_v59 = vpop.eup %6066  ;;  %v747_v60 = vmul.f32 1.442695, %v720_v38 }
 0x199   : > { %v749_v61 = vmul.f32 1.442695, %v721_v43  ;;  %v6527_v62 = vpop.eup %6068  ;;  %v702_v63 = vpop.xlane.xlu1 %701  ;;  %v772_v1 = vsel %vm660_vm1, %v6525_v59, 0.0  ;;  %5941 = vmatprep.subr.bf16.mxu1 %v5940_v53 }
 0x19a   : > { %v705_v0 = vpop.xlane.xlu0 %704  ;;  %6078 = vpow2.f32 %v747_v60  ;;  %v722_v42 = vsub.f32 %v6481_v46, %v702_v63  ;;  %773 = vadd.xlane.f32.xlu1 %v772_v1  ;;  %v775_v2 = vsel %vm660_vm1, %v6527_v62, 0.0  ;;  %v1038_v1 = vld [vmem:[%s7895_s1 + $0x18] sm:$0xff] }
 0x19b   : > { %v723_v47 = vsub.f32 %v6491_v51, %v705_v0  ;;  %6080 = vpow2.f32 %v749_v61  ;;  %776 = vadd.xlane.f32.xlu0 %v775_v2  ;;  %v1037_v0 = vld [vmem:[%s7895_s1 + $0x10] sm:$0xff] }
 0x19c   : > { %v6535_v3 = vpop.eup %6070  ;;  %v751_v4 = vmul.f32 1.442695, %v722_v42 }
 0x19d   : > { %v753_v5 = vmul.f32 1.442695, %v723_v47  ;;  %v6537_v6 = vpop.eup %6072  ;;  %v708_v25 = vpop.xlane.xlu1 %707  ;;  %v778_v24 = vsel %vm660_vm1, %v6535_v3, 0.0 }
 0x19e   : > { %6082 = vpow2.f32 %v751_v4  ;;  %v724_v46 = vsub.f32 %v6489_v50, %v708_v25  ;;  %779 = vadd.xlane.f32.xlu1 %v778_v24  ;;  %v781_v51 = vsel %vm660_vm1, %v6537_v6, 0.0 }
 0x19f   : > { %6084 = vpow2.f32 %v753_v5  ;;  %782 = vadd.xlane.f32.xlu0 %v781_v51  ;;  %v5944_v5 = vpack.c.bf16 %v1038_v1, %v1037_v0  ;;  %v1397_v1 = vld [vmem:[%s7897_s3] sm:$0xff] }
 0x1a0   : > { %v6544_v28 = vpop.eup %6074  ;;  %v755_v23 = vmul.f32 1.442695, %v724_v46 }
 0x1a1   : > { %v6546_v27 = vpop.eup %6076  ;;  %v784_v32 = vsel %vm660_vm1, %v6544_v28, 0.0 }
 0x1a2   : > { %6086 = vpow2.f32 %v755_v23  ;;  %785 = vadd.xlane.f32.xlu1 %v784_v32  ;;  %v787_v33 = vsel %vm660_vm1, %v6546_v27, 0.0 }
 0x1a3   : > { %788 = vadd.xlane.f32.xlu0 %v787_v33 }
 0x1a4   : > { %v6552_v50 = vpop.eup %6078 }
 0x1a5   : > { %v6554_v26 = vpop.eup %6080  ;;  %v790_v31 = vsel %vm660_vm1, %v6552_v50, 0.0 }
 0x1a6   : > { %791 = vadd.xlane.f32.xlu1 %v790_v31  ;;  %v793_v36 = vsel %vm660_vm1, %v6554_v26, 0.0 }
 0x1a7   : > { %794 = vadd.xlane.f32.xlu0 %v793_v36 }
 0x1a8   : > { %v6560_v30 = vpop.eup %6082 }
 0x1a9   : > { %v6562_v35 = vpop.eup %6084  ;;  %v796_v41 = vsel %vm660_vm1, %v6560_v30, 0.0 }
 0x1aa   : > { %797 = vadd.xlane.f32.xlu1 %v796_v41  ;;  %v799_v45 = vsel %vm660_vm1, %v6562_v35, 0.0 }
 0x1ab   : > { %800 = vadd.xlane.f32.xlu0 %v799_v45 }
 0x1ac   : > { %v6577_v48 = vpop.eup %6086 }
 0x1ad   : > { %v802_v49 = vsel %vm660_vm1, %v6577_v48, 0.0 }
 0x1ae   : > { %803 = vadd.xlane.f32.xlu1 %v802_v49 }
 0x21b   : > { %v759_v55 = vpop.xlane.xlu0 %758 }
 0x21c   : > { %6088 = vrcp.f32 %v759_v55 }
 0x21f   : > { %v762_v56 = vpop.xlane.xlu1 %761 }
 0x220   : > { %6090 = vrcp.f32 %v762_v56  ;;  %v765_v57 = vpop.xlane.xlu0 %764 }
 0x221   : > { %6092 = vrcp.f32 %v765_v57 }
 0x223   : > { %v768_v38 = vpop.xlane.xlu1 %767 }
 0x224   : > { %6094 = vrcp.f32 %v768_v38  ;;  %v771_v43 = vpop.xlane.xlu0 %770 }
 0x225   : > { %6096 = vrcp.f32 %v771_v43 }
 0x226   : > { %v6089_v58 = vpop.eup %6088 }
 0x227   : > { %v774_v60 = vpop.xlane.xlu1 %773  ;;  %v806_v61 = vmul.f32 %v6089_v58, %v6500_v29 }
 0x228   : > { %6098 = vrcp.f32 %v774_v60  ;;  %v777_v63 = vpop.xlane.xlu0 %776 }
 0x229   : > { %6100 = vrcp.f32 %v777_v63  ;;  %5412 = vmatprep.mubr.msk.f32.mxu1 %vm660_vm1, %v806_v61 }
 0x22a   : > { %v6091_v42 = vpop.eup %6090 }
 0x22b   : > { %v6093_v47 = vpop.eup %6092  ;;  %v780_v2 = vpop.xlane.xlu1 %779  ;;  %v808_v4 = vmul.f32 %v6091_v42, %v6505_v37  ;;  %v1398_v42 = vld [vmem:[%s7897_s3 + $0x8] sm:$0xff] }
 0x22c   : > { %6102 = vrcp.f32 %v780_v2  ;;  %v783_v29 = vpop.xlane.xlu0 %782  ;;  %v810_v25 = vmul.f32 %v6093_v47, %v6507_v40  ;;  %v1399_v47 = vld [vmem:[%s7897_s3 + $0x10] sm:$0xff]  ;;  %v5956_v2 = vpack.c.bf16 %v1398_v42, %v1397_v1 }
 0x22d   : > { %6104 = vrcp.f32 %v783_v29  ;;  %5413 = vmatmul.mubr.msk.f32.vlgmr.msra.gmra.mrb[0].mxu1 %vm660_vm1, %v808_v4  ;;  %v1400_v4 = vld [vmem:[%s7897_s3 + $0x18] sm:$0xff] }
 0x22e   : > { %v6095_v24 = vpop.eup %6094  ;;  %5943 = vmatpush3.bf16.msra.mxu1 %v5940_v53  ;;  %5415 = vmatprep.mubr.msk.f32.mxu1 %vm660_vm1, %v810_v25 }
 0x22f   : > { %v6097_v46 = vpop.eup %6096  ;;  %v786_v51 = vpop.xlane.xlu1 %785  ;;  %v812_v23 = vmul.f32 %v6095_v24, %v6515_v39  ;;  %5945 = vmatprep.subr.bf16.mxu1 %v5944_v5 }
 0x230   : > { %6106 = vrcp.f32 %v786_v51  ;;  %v789_v32 = vpop.xlane.xlu0 %788  ;;  %v814_v37 = vmul.f32 %v6097_v46, %v6517_v54 }
 0x231   : > { %6108 = vrcp.f32 %v789_v32  ;;  %5416 = vmatmul.mubr.msk.f32.gmra.mrb[2].mxu1 %vm660_vm1, %v812_v23 }
 0x232   : > { %v6099_v40 = vpop.eup %6098  ;;  %5418 = vmatprep.mubr.msk.f32.mxu1 %vm660_vm1, %v814_v37  ;;  %5947 = vmatpush3.bf16.msra.mxu1 %v5944_v5  ;;  %v5960_v5 = vpack.c.bf16 %v1400_v4, %v1399_v47 }
 0x233   : > { %v6101_v33 = vpop.eup %6100  ;;  %v792_v31 = vpop.xlane.xlu1 %791  ;;  %v816_v36 = vmul.f32 %v6099_v40, %v6525_v59  ;;  %5957 = vmatprep.subr.bf16.mxu1 %v5956_v2 }
 0x234   : > { %6110 = vrcp.f32 %v792_v31  ;;  %v795_v41 = vpop.xlane.xlu0 %794  ;;  %v818_v39 = vmul.f32 %v6101_v33, %v6527_v62 }
 0x235   : > { %6112 = vrcp.f32 %v795_v41  ;;  %5419 = vmatmul.mubr.msk.f32.gmra.mrb[4].mxu1 %vm660_vm1, %v816_v36 }
 0x236   : > { %v6103_v45 = vpop.eup %6102  ;;  %5421 = vmatprep.mubr.msk.f32.mxu1 %vm660_vm1, %v818_v39 }
 0x237   : > { %v6105_v54 = vpop.eup %6104  ;;  %v798_v49 = vpop.xlane.xlu1 %797  ;;  %v820_v34 = vmul.f32 %v6103_v45, %v6535_v3 }
 0x238   : > { %6114 = vrcp.f32 %v798_v49  ;;  %v801_v52 = vpop.xlane.xlu0 %800  ;;  %v822_v53 = vmul.f32 %v6105_v54, %v6537_v6 }
 0x239   : > { %6116 = vrcp.f32 %v801_v52  ;;  %5422 = vmatmul.mubr.msk.f32.gmra.mrb[6].mxu1 %vm660_vm1, %v820_v34 }
 0x23a   : > { %v6107_v59 = vpop.eup %6106  ;;  %5424 = vmatprep.mubr.msk.f32.mxu1 %vm660_vm1, %v822_v53 }
 0x23b   : > { %v6109_v62 = vpop.eup %6108  ;;  %v804_v55 = vpop.xlane.xlu1 %803  ;;  %v824_v56 = vmul.f32 %v6107_v59, %v6544_v28 }
 0x23c   : > { %6118 = vrcp.f32 %v804_v55  ;;  %v826_v57 = vmul.f32 %v6109_v62, %v6546_v27 }
 0x23d   : > { %5425 = vmatmul.mubr.msk.f32.gmra.mrb[8].mxu1 %vm660_vm1, %v824_v56 }
 0x23e   : > { %v6111_v3 = vpop.eup %6110  ;;  %5427 = vmatprep.mubr.msk.f32.mxu1 %vm660_vm1, %v826_v57 }
 0x23f   : > { %v6113_v38 = vpop.eup %6112  ;;  %v828_v6 = vmul.f32 %v6111_v3, %v6552_v50  ;;  %v1184_v50 = vld [vmem:[%s7896_s2] sm:$0xff] }
 0x240   : > { %v830_v43 = vmul.f32 %v6113_v38, %v6554_v26  ;;  %v1185_v26 = vld [vmem:[%s7896_s2 + $0x8] sm:$0xff] }
 0x241   : > { %5428 = vmatmul.mubr.msk.f32.gmra.mrb[10].mxu1 %vm660_vm1, %v828_v6 }
 0x242   : > { %v6115_v58 = vpop.eup %6114  ;;  %5430 = vmatprep.mubr.msk.f32.mxu1 %vm660_vm1, %v830_v43 }
 0x243   : > { %v6117_v60 = vpop.eup %6116  ;;  %v832_v28 = vmul.f32 %v6115_v58, %v6560_v30  ;;  %v5948_v30 = vpack.c.bf16 %v1185_v26, %v1184_v50  ;;  %v4781_v26 = vld [vmem:[%s7898_s4 + $0x38] sm:$0xff] }
 0x244   : > { %v834_v27 = vmul.f32 %v6117_v60, %v6562_v35  ;;  %v1186_v35 = vld [vmem:[%s7896_s2 + $0x10] sm:$0xff] }
 0x245   : > { %5431 = vmatmul.mubr.msk.f32.gmra.mrb[12].mxu1 %vm660_vm1, %v832_v28  ;;  %5949 = vmatprep.subr.bf16.mxu0 %v5948_v30 }
 0x246   : > { %v6119_v61 = vpop.eup %6118  ;;  %5433 = vmatprep.mubr.msk.f32.mxu1 %vm660_vm1, %v834_v27  ;;  %5951 = vmatpush3.bf16.msra.mxu0 %v5948_v30  ;;  %v4778_v27 = vld [vmem:[%s7898_s4 + $0x20] sm:$0xff] }
 0x247   : > { %v836_v63 = vmul.f32 %v6119_v61, %v6577_v48  ;;  %v1187_v48 = vld [vmem:[%s7896_s2 + $0x18] sm:$0xff]  ;;  %v4779_v61 = vld [vmem:[%s7898_s4 + $0x28] sm:$0xff] }
 0x248   : > { %v5952_v0 = vpack.c.bf16 %v1187_v48, %v1186_v35  ;;  %v5964_v50 = vpack.c.bf16 %v4779_v61, %v4778_v27  ;;  %v4817_v61 = vld [vmem:[%s7895_s1 + $0x30] sm:$0xff] }
 0x249   : > { %5434 = vmatmul.mubr.msk.f32.gmra.mrb[14].mxu1 %vm660_vm1, %v836_v63  ;;  %v4780_v63 = vld [vmem:[%s7898_s4 + $0x30] sm:$0xff] }
 0x24a   : > { %5444 = vmatprep.mubr.msk.f32.mxu1 %vm466_vm0, %v6377_v7  ;;  %5953 = vmatprep.subr.bf16.mxu0 %v5952_v0  ;;  %v5968_v30 = vpack.c.bf16 %v4781_v26, %v4780_v63  ;;  %v4818_v63 = vld [vmem:[%s7895_s1 + $0x38] sm:$0xff] }
 0x24b   : > { %5955 = vmatpush3.bf16.msra.mxu0 %v5952_v0 }
 0x24c   : > { %5965 = vmatprep.subr.bf16.mxu0 %v5964_v50 }
 0x24d   : > { %5445 = vmatmul.mubr.msk.f32.vlgmr.msra.gmra.mrb[16].mxu1 %vm466_vm0, %v6382_v8 }
 0x24e   : > { %5447 = vmatprep.mubr.msk.f32.mxu1 %vm466_vm0, %v6385_v9  ;;  %5959 = vmatpush3.bf16.msra.mxu1 %v5956_v2 }
 0x24f   : > { %5961 = vmatprep.subr.bf16.mxu1 %v5960_v5 }
 0x251   : > { %5448 = vmatmul.mubr.msk.f32.gmra.mrb[18].mxu1 %vm466_vm0, %v6392_v10 }
 0x252   : > { %5450 = vmatprep.mubr.msk.f32.mxu1 %vm466_vm0, %v6395_v11  ;;  %5963 = vmatpush3.bf16.msra.mxu1 %v5960_v5 }
 0x253   : > { %5564 = vmatprep.subr.msk.mxu1 %vm886_vm2, %v6569_v44 }
 0x255   : > { %5451 = vmatmul.mubr.msk.f32.gmra.mrb[20].mxu1 %vm466_vm0, %v6402_v12 }
 0x256   : > { %5453 = vmatprep.mubr.msk.f32.mxu1 %vm466_vm0, %v6405_v13 }
 0x259   : > { %5454 = vmatmul.mubr.msk.f32.gmra.mrb[22].mxu1 %vm466_vm0, %v6412_v14 }
 0x25a   : > { %5456 = vmatprep.mubr.msk.f32.mxu1 %vm466_vm0, %v6415_v15 }
 0x25d   : > { %5457 = vmatmul.mubr.msk.f32.gmra.mrb[24].mxu1 %vm466_vm0, %v6422_v16 }
 0x25e   : > { %5459 = vmatprep.mubr.msk.f32.mxu1 %vm466_vm0, %v6425_v17 }
 0x261   : > { %5460 = vmatmul.mubr.msk.f32.gmra.mrb[26].mxu1 %vm466_vm0, %v6432_v18 }
 0x262   : > { %5462 = vmatprep.mubr.msk.f32.mxu1 %vm466_vm0, %v6435_v19 }
 0x265   : > { %5463 = vmatmul.mubr.msk.f32.gmra.mrb[28].mxu1 %vm466_vm0, %v6442_v20 }
 0x266   : > { %5465 = vmatprep.mubr.msk.f32.mxu1 %vm466_vm0, %v6445_v21 }
 0x269   : > { %5466 = vmatmul.mubr.msk.f32.gmra.mrb[30].mxu1 %vm466_vm0, %v6452_v22 }
 0x300   : > { %v5414_v29 = vpop.f32.mrb[0].mxu1 }
 0x301   : > { %v956_v25 = vpop.f32.mrb[1].mxu1 }
 0x304   : > { %v5417_v24 = vpop.f32.mrb[2].mxu1 }
 0x305   : > { %v6683_v46 = vpop.f32.mrb[3].mxu1 }
 0x308   : > { %v6685_v51 = vpop.f32.mrb[4].mxu1 }
 0x309   : > { %v6687_v23 = vpop.f32.mrb[5].mxu1 }
 0x30c   : > { %v6689_v32 = vpop.f32.mrb[6].mxu1 }
 0x30d   : > { %v6691_v37 = vpop.f32.mrb[7].mxu1 }
 0x310   : > { %v6693_v40 = vpop.f32.mrb[8].mxu1 }
 0x311   : > { %v6695_v33 = vpop.f32.mrb[9].mxu1 }
 0x314   : > { %v6697_v31 = vpop.f32.mrb[10].mxu1 }
 0x315   : > { %v6699_v36 = vpop.f32.mrb[11].mxu1 }
 0x318   : > { %v6701_v41 = vpop.f32.mrb[12].mxu1 }
 0x319   : > { %v6703_v39 = vpop.f32.mrb[13].mxu1 }
 0x31c   : > { %v6705_v45 = vpop.f32.mrb[14].mxu1 }
 0x31d   : > { %v6707_v54 = vpop.f32.mrb[15].mxu1 }
 0x320   : > { %v5446_v49 = vpop.f32.mrb[16].mxu1 }
 0x321   : > { %v1105_v34 = vpop.f32.mrb[17].mxu1 }
 0x322   : > { %5476 = vmatprep.mubr.msk.f32.mxu0 %vm466_vm0, %v1105_v34 }
 0x323   : > { %5477 = vmatmul.mubr.msk.f32.vlgmr.msra.gmra.mrb[16].mxu0 %vm466_vm0, %v5446_v49 }
 0x324   : > { %v5449_v52 = vpop.f32.mrb[18].mxu1  ;;  %5967 = vmatpush3.bf16.msra.mxu0 %v5964_v50 }
 0x325   : > { %v1115_v53 = vpop.f32.mrb[19].mxu1  ;;  %5969 = vmatprep.subr.bf16.mxu0 %v5968_v30 }
 0x326   : > { %5479 = vmatprep.mubr.msk.f32.mxu0 %vm466_vm0, %v1115_v53 }
 0x327   : > { %5480 = vmatmul.mubr.msk.f32.gmra.mrb[18].mxu0 %vm466_vm0, %v5449_v52 }
 0x328   : > { %v5452_v59 = vpop.f32.mrb[20].mxu1  ;;  %5971 = vmatpush3.bf16.msra.mxu0 %v5968_v30 }
 0x329   : > { %v1125_v62 = vpop.f32.mrb[21].mxu1 }
 0x32a   : > { %5482 = vmatprep.mubr.msk.f32.mxu0 %vm466_vm0, %v1125_v62 }
 0x32b   : > { %5483 = vmatmul.mubr.msk.f32.gmra.mrb[20].mxu0 %vm466_vm0, %v5452_v59 }
 0x32c   : > { %v5455_v55 = vpop.f32.mrb[22].mxu1 }
 0x32d   : > { %v1135_v56 = vpop.f32.mrb[23].mxu1 }
 0x32e   : > { %5485 = vmatprep.mubr.msk.f32.mxu0 %vm466_vm0, %v1135_v56 }
 0x32f   : > { %5486 = vmatmul.mubr.msk.f32.gmra.mrb[22].mxu0 %vm466_vm0, %v5455_v55 }
 0x330   : > { %v5458_v57 = vpop.f32.mrb[24].mxu1 }
 0x331   : > { %v1145_v3 = vpop.f32.mrb[25].mxu1 }
 0x332   : > { %5488 = vmatprep.mubr.msk.f32.mxu0 %vm466_vm0, %v1145_v3 }
 0x333   : > { %5489 = vmatmul.mubr.msk.f32.gmra.mrb[24].mxu0 %vm466_vm0, %v5458_v57 }
 0x334   : > { %v5461_v38 = vpop.f32.mrb[26].mxu1 }
 0x335   : > { %v1155_v6 = vpop.f32.mrb[27].mxu1 }
 0x336   : > { %5491 = vmatprep.mubr.msk.f32.mxu0 %vm466_vm0, %v1155_v6 }
 0x337   : > { %5492 = vmatmul.mubr.msk.f32.gmra.mrb[26].mxu0 %vm466_vm0, %v5461_v38 }
 0x338   : > { %v5464_v43 = vpop.f32.mrb[28].mxu1 }
 0x339   : > { %v1165_v58 = vpop.f32.mrb[29].mxu1 }
 0x33a   : > { %5494 = vmatprep.mubr.msk.f32.mxu0 %vm466_vm0, %v1165_v58 }
 0x33b   : > { %5495 = vmatmul.mubr.msk.f32.gmra.mrb[28].mxu0 %vm466_vm0, %v5464_v43 }
 0x33c   : > { %v5467_v60 = vpop.f32.mrb[30].mxu1 }
 0x33d   : > { %v1175_v28 = vpop.f32.mrb[31].mxu1 }
 0x33e   : > { %5497 = vmatprep.mubr.msk.f32.mxu0 %vm466_vm0, %v1175_v28 }
 0x33f   : > { %5498 = vmatmul.mubr.msk.f32.gmra.mrb[30].mxu0 %vm466_vm0, %v5467_v60 }
 0x3f6   : > { %v5478_v35 = vpop.f32.mrb[16].mxu0 }
 0x3f7   : > { %v1382_v48 = vmul.f32 %v5478_v35, %v5414_v29  ;;  %v1302_v0 = vpop.f32.mrb[17].mxu0 }
 0x3f8   : > { %v1381_v1 = vmul.f32 %v1302_v0, %v956_v25 }
 0x3fa   : > { %v5481_v42 = vpop.f32.mrb[18].mxu0  ;;  %5508 = vmatprep.mubr.msk.f32.mxu1 %vm466_vm0, %v1381_v1  ;;  %v5976_v1 = vpack.c.bf16 %v4818_v63, %v4817_v61 }
 0x3fb   : > { %v1384_v47 = vmul.f32 %v5481_v42, %v5417_v24  ;;  %v1312_v2 = vpop.f32.mrb[19].mxu0  ;;  %5509 = vmatmul.mubr.msk.f32.vlgmr.msra.gmra.mrb[32].mxu1 %vm466_vm0, %v1382_v48 }
 0x3fc   : > { %v1383_v4 = vmul.f32 %v1312_v2, %v6683_v46  ;;  %5565 = vmatpush3.msk.msra.mxu1 %vm886_vm2, %v6569_v44 }
 0x3fe   : > { %v5484_v5 = vpop.f32.mrb[20].mxu0  ;;  %5511 = vmatprep.mubr.msk.f32.mxu1 %vm466_vm0, %v1383_v4 }
 0x3ff   : > { %v1386_v49 = vmul.f32 %v5484_v5, %v6685_v51  ;;  %v1322_v29 = vpop.f32.mrb[21].mxu0  ;;  %5512 = vmatmul.mubr.msk.f32.gmra.mrb[34].mxu1 %vm466_vm0, %v1384_v47 }
 0x400   : > { %v1385_v25 = vmul.f32 %v1322_v29, %v6687_v23 }
 0x402   : > { %v5487_v34 = vpop.f32.mrb[22].mxu0  ;;  %5514 = vmatprep.mubr.msk.f32.mxu1 %vm466_vm0, %v1385_v25 }
 0x403   : > { %v1388_v24 = vmul.f32 %v5487_v34, %v6689_v32  ;;  %v1332_v52 = vpop.f32.mrb[23].mxu0  ;;  %5515 = vmatmul.mubr.msk.f32.gmra.mrb[36].mxu1 %vm466_vm0, %v1386_v49 }
 0x404   : > { %v1387_v44 = vmul.f32 %v1332_v52, %v6691_v37 }
 0x406   : > { %v5490_v46 = vpop.f32.mrb[24].mxu0  ;;  %5517 = vmatprep.mubr.msk.f32.mxu1 %vm466_vm0, %v1387_v44 }
 0x407   : > { %v1390_v51 = vmul.f32 %v5490_v46, %v6693_v40  ;;  %v1342_v53 = vpop.f32.mrb[25].mxu0  ;;  %5518 = vmatmul.mubr.msk.f32.gmra.mrb[38].mxu1 %vm466_vm0, %v1388_v24 }
 0x408   : > { %v1389_v23 = vmul.f32 %v1342_v53, %v6695_v33 }
 0x40a   : > { %v5493_v59 = vpop.f32.mrb[26].mxu0  ;;  %5520 = vmatprep.mubr.msk.f32.mxu1 %vm466_vm0, %v1389_v23 }
 0x40b   : > { %v1392_v32 = vmul.f32 %v5493_v59, %v6697_v31  ;;  %v1352_v62 = vpop.f32.mrb[27].mxu0  ;;  %5521 = vmatmul.mubr.msk.f32.gmra.mrb[40].mxu1 %vm466_vm0, %v1390_v51 }
 0x40c   : > { %v1391_v37 = vmul.f32 %v1352_v62, %v6699_v36 }
 0x40e   : > { %v5496_v55 = vpop.f32.mrb[28].mxu0  ;;  %5523 = vmatprep.mubr.msk.f32.mxu1 %vm466_vm0, %v1391_v37 }
 0x40f   : > { %v1394_v40 = vmul.f32 %v5496_v55, %v6701_v41  ;;  %v1362_v56 = vpop.f32.mrb[29].mxu0  ;;  %5524 = vmatmul.mubr.msk.f32.gmra.mrb[42].mxu1 %vm466_vm0, %v1392_v32  ;;  %v4815_v41 = vld [vmem:[%s7895_s1 + $0x20] sm:$0xff] }
 0x410   : > { %v1393_v33 = vmul.f32 %v1362_v56, %v6703_v39  ;;  %v4816_v39 = vld [vmem:[%s7895_s1 + $0x28] sm:$0xff] }
 0x411   : > { %v5972_v38 = vpack.c.bf16 %v4816_v39, %v4815_v41 }
 0x412   : > { %v5499_v57 = vpop.f32.mrb[30].mxu0  ;;  %5526 = vmatprep.mubr.msk.f32.mxu1 %vm466_vm0, %v1393_v33 }
 0x413   : > { %v1396_v31 = vmul.f32 %v5499_v57, %v6705_v45  ;;  %v1372_v3 = vpop.f32.mrb[31].mxu0  ;;  %5527 = vmatmul.mubr.msk.f32.gmra.mrb[44].mxu1 %vm466_vm0, %v1394_v40  ;;  %5973 = vmatprep.subr.bf16.mxu0 %v5972_v38  ;;  %v6777_v45 = vld [vmem:[%s7900_s6] ss:$0 sm:$0xff] }
 0x414   : > { %v1395_v36 = vmul.f32 %v1372_v3, %v6707_v54 }
 0x416   : > { %5529 = vmatprep.mubr.msk.f32.mxu1 %vm466_vm0, %v1395_v36 }
 0x417   : > { %5530 = vmatmul.mubr.msk.f32.gmra.mrb[46].mxu1 %vm466_vm0, %v1396_v31 }
 0x4ce   : > { %v5510_v54 = vpop.f32.mrb[32].mxu1 }
 0x4cf   : > { %v1528_v6 = vadd.f32 %v5510_v54, %v6777_v45  ;;  %v1522_v43 = vpop.f32.mrb[33].mxu1 }
 0x4d0   : > { %v1523_v58 = vadd.f32 %v6777_v45, %v1522_v43 }
 0x4d1   : > { %v1602_v60 = vmul.f32 %v1528_v6, %v6382_v8 }
 0x4d2   : > { %v1601_v28 = vmul.f32 %v1523_v58, %v6377_v7  ;;  %v5513_v27 = vpop.f32.mrb[34].mxu1 }
 0x4d3   : > { %v1538_v50 = vadd.f32 %v5513_v27, %v6777_v45  ;;  %v1532_v26 = vpop.f32.mrb[35].mxu1  ;;  %v6795_v48 = vadd.f32 %v1602_v60, %v6382_v8 }
 0x4d4   : > { %v6791_v30 = vadd.f32 %v1601_v28, %v6377_v7  ;;  %v1533_v35 = vadd.f32 %v6777_v45, %v1532_v26 }
 0x4d5   : > { %v1604_v0 = vmul.f32 %v1538_v50, %v6392_v10 }
 0x4d6   : > { %v1603_v42 = vmul.f32 %v1533_v35, %v6385_v9  ;;  %v5516_v47 = vpop.f32.mrb[36].mxu1  ;;  %5540 = vmatprep.mubr.msk.f32.mxu0 %vm466_vm0, %v6791_v30 }
 0x4d7   : > { %v1548_v2 = vadd.f32 %v5516_v47, %v6777_v45  ;;  %v1542_v4 = vpop.f32.mrb[37].mxu1  ;;  %5541 = vmatmul.mubr.msk.f32.vlgmr.msra.gmra.mrb[32].mxu0 %vm466_vm0, %v6795_v48  ;;  %v6809_v5 = vadd.f32 %v1604_v0, %v6392_v10 }
 0x4d8   : > { %v6805_v7 = vadd.f32 %v1603_v42, %v6385_v9  ;;  %v1543_v8 = vadd.f32 %v6777_v45, %v1542_v4  ;;  %5975 = vmatpush3.bf16.msra.mxu0 %v5972_v38 }
 0x4d9   : > { %v1606_v49 = vmul.f32 %v1548_v2, %v6402_v12  ;;  %5977 = vmatprep.subr.bf16.mxu0 %v5976_v1 }
 0x4da   : > { %v1605_v29 = vmul.f32 %v1543_v8, %v6395_v11  ;;  %v5519_v25 = vpop.f32.mrb[38].mxu1  ;;  %5543 = vmatprep.mubr.msk.f32.mxu0 %vm466_vm0, %v6805_v7 }
 0x4db   : > { %v1558_v34 = vadd.f32 %v5519_v25, %v6777_v45  ;;  %v1552_v24 = vpop.f32.mrb[39].mxu1  ;;  %5544 = vmatmul.mubr.msk.f32.gmra.mrb[34].mxu0 %vm466_vm0, %v6809_v5  ;;  %v6823_v52 = vadd.f32 %v1606_v49, %v6402_v12 }
 0x4dc   : > { %v6819_v9 = vadd.f32 %v1605_v29, %v6395_v11  ;;  %v1553_v10 = vadd.f32 %v6777_v45, %v1552_v24  ;;  %5979 = vmatpush3.bf16.msra.mxu0 %v5976_v1 }
 0x4dd   : > { %v1608_v44 = vmul.f32 %v1558_v34, %v6412_v14 }
 0x4de   : > { %v1607_v46 = vmul.f32 %v1553_v10, %v6405_v13  ;;  %v5522_v51 = vpop.f32.mrb[40].mxu1  ;;  %5546 = vmatprep.mubr.msk.f32.mxu0 %vm466_vm0, %v6819_v9 }
 0x4df   : > { %v1568_v53 = vadd.f32 %v5522_v51, %v6777_v45  ;;  %v1562_v23 = vpop.f32.mrb[41].mxu1  ;;  %5547 = vmatmul.mubr.msk.f32.gmra.mrb[36].mxu0 %vm466_vm0, %v6823_v52  ;;  %v6837_v59 = vadd.f32 %v1608_v44, %v6412_v14 }
 0x4e0   : > { %v6833_v11 = vadd.f32 %v1607_v46, %v6405_v13  ;;  %v1563_v12 = vadd.f32 %v6777_v45, %v1562_v23 }
 0x4e1   : > { %v1610_v32 = vmul.f32 %v1568_v53, %v6422_v16 }
 0x4e2   : > { %v1609_v62 = vmul.f32 %v1563_v12, %v6415_v15  ;;  %v5525_v37 = vpop.f32.mrb[42].mxu1  ;;  %5549 = vmatprep.mubr.msk.f32.mxu0 %vm466_vm0, %v6833_v11 }
 0x4e3   : > { %v1578_v55 = vadd.f32 %v5525_v37, %v6777_v45  ;;  %v1572_v40 = vpop.f32.mrb[43].mxu1  ;;  %5550 = vmatmul.mubr.msk.f32.gmra.mrb[38].mxu0 %vm466_vm0, %v6837_v59  ;;  %v6851_v56 = vadd.f32 %v1610_v32, %v6422_v16 }
 0x4e4   : > { %v6847_v13 = vadd.f32 %v1609_v62, %v6415_v15  ;;  %v1573_v14 = vadd.f32 %v6777_v45, %v1572_v40 }
 0x4e5   : > { %v1612_v33 = vmul.f32 %v1578_v55, %v6432_v18 }
 0x4e6   : > { %v1611_v57 = vmul.f32 %v1573_v14, %v6425_v17  ;;  %v5528_v31 = vpop.f32.mrb[44].mxu1  ;;  %5552 = vmatprep.mubr.msk.f32.mxu0 %vm466_vm0, %v6847_v13 }
 0x4e7   : > { %v1588_v3 = vadd.f32 %v5528_v31, %v6777_v45  ;;  %v1582_v36 = vpop.f32.mrb[45].mxu1  ;;  %5553 = vmatmul.mubr.msk.f32.gmra.mrb[40].mxu0 %vm466_vm0, %v6851_v56  ;;  %v6865_v41 = vadd.f32 %v1612_v33, %v6432_v18 }
 0x4e8   : > { %v6861_v15 = vadd.f32 %v1611_v57, %v6425_v17  ;;  %v1583_v16 = vadd.f32 %v6777_v45, %v1582_v36 }
 0x4e9   : > { %v1614_v39 = vmul.f32 %v1588_v3, %v6442_v20 }
 0x4ea   : > { %v1613_v38 = vmul.f32 %v1583_v16, %v6435_v19  ;;  %v5531_v54 = vpop.f32.mrb[46].mxu1  ;;  %5555 = vmatprep.mubr.msk.f32.mxu0 %vm466_vm0, %v6861_v15 }
 0x4eb   : > { %v1598_v6 = vadd.f32 %v5531_v54, %v6777_v45  ;;  %v1592_v43 = vpop.f32.mrb[47].mxu1  ;;  %5556 = vmatmul.mubr.msk.f32.gmra.mrb[42].mxu0 %vm466_vm0, %v6865_v41  ;;  %v6879_v58 = vadd.f32 %v1614_v39, %v6442_v20 }
 0x4ec   : > { %v6875_v17 = vadd.f32 %v1613_v38, %v6435_v19  ;;  %v1593_v18 = vadd.f32 %v6777_v45, %v1592_v43 }
 0x4ed   : > { %v1616_v60 = vmul.f32 %v1598_v6, %v6452_v22 }
 0x4ee   : > { %v1615_v28 = vmul.f32 %v1593_v18, %v6445_v21  ;;  %5558 = vmatprep.mubr.msk.f32.mxu0 %vm466_vm0, %v6875_v17 }
 0x4ef   : > { %5559 = vmatmul.mubr.msk.f32.gmra.mrb[44].mxu0 %vm466_vm0, %v6879_v58  ;;  %v6891_v19 = vadd.f32 %v1616_v60, %v6452_v22 }
 0x4f0   : > { %v6888_v27 = vadd.f32 %v1615_v28, %v6445_v21 }
 0x4f2   : > { %5561 = vmatprep.mubr.msk.f32.mxu0 %vm466_vm0, %v6888_v27 }
 0x4f3   : > { %5562 = vmatmul.mubr.msk.f32.gmra.mrb[46].mxu0 %vm466_vm0, %v6891_v19 }
 0x4f4   : > { %5598 = vmatprep.mubr.msk.f32.mxu0 %vm466_vm0, %v6791_v30 }
 0x4f7   : > { %5599 = vmatmul.mubr.msk.f32.vlgmr.msra.gmra.mrb[48].mxu0 %vm466_vm0, %v6795_v48 }
 0x4f8   : > { %5601 = vmatprep.mubr.msk.f32.mxu0 %vm466_vm0, %v6805_v7 }
 0x4fb   : > { %5602 = vmatmul.mubr.msk.f32.gmra.mrb[50].mxu0 %vm466_vm0, %v6809_v5 }
 0x4fc   : > { %5604 = vmatprep.mubr.msk.f32.mxu0 %vm466_vm0, %v6819_v9 }
 0x4ff   : > { %5605 = vmatmul.mubr.msk.f32.gmra.mrb[52].mxu0 %vm466_vm0, %v6823_v52 }
 0x500   : > { %5607 = vmatprep.mubr.msk.f32.mxu0 %vm466_vm0, %v6833_v11 }
 0x503   : > { %5608 = vmatmul.mubr.msk.f32.gmra.mrb[54].mxu0 %vm466_vm0, %v6837_v59 }
 0x504   : > { %5610 = vmatprep.mubr.msk.f32.mxu0 %vm466_vm0, %v6847_v13 }
 0x507   : > { %5611 = vmatmul.mubr.msk.f32.gmra.mrb[56].mxu0 %vm466_vm0, %v6851_v56 }
 0x508   : > { %5613 = vmatprep.mubr.msk.f32.mxu0 %vm466_vm0, %v6861_v15 }
 0x50b   : > { %5614 = vmatmul.mubr.msk.f32.gmra.mrb[58].mxu0 %vm466_vm0, %v6865_v41 }
 0x50c   : > { %5616 = vmatprep.mubr.msk.f32.mxu0 %vm466_vm0, %v6875_v17 }
 0x50f   : > { %5617 = vmatmul.mubr.msk.f32.gmra.mrb[60].mxu0 %vm466_vm0, %v6879_v58 }
 0x510   : > { %5619 = vmatprep.mubr.msk.f32.mxu0 %vm466_vm0, %v6888_v27 }
 0x513   : > { %5620 = vmatmul.mubr.msk.f32.gmra.mrb[62].mxu0 %vm466_vm0, %v6891_v19 }
 0x5aa   : > { %v6929_v20 = vpop.f32.mrb[32].mxu0 }
 0x5ab   : > { %v6931_v21 = vpop.f32.mrb[33].mxu0  ;;  %v1834_v22 = vsel %vm660_vm1, %v6929_v20, -inf }
 0x5ac   : > { %1835 = vmax.xlane.f32.xlu1 %v1834_v22  ;;  %v1831_v45 = vsel %vm660_vm1, %v6931_v21, -inf }
 0x5ad   : > { %1832 = vmax.xlane.f32.xlu0 %v1831_v45 }
 0x5ae   : > { %v6937_v61 = vpop.f32.mrb[34].mxu0 }
 0x5af   : > { %v6939_v63 = vpop.f32.mrb[35].mxu0  ;;  %v1840_v50 = vsel %vm660_vm1, %v6937_v61, -inf }
 0x5b0   : > { %1841 = vmax.xlane.f32.xlu1 %v1840_v50  ;;  %v1837_v26 = vsel %vm660_vm1, %v6939_v63, -inf }
 0x5b1   : > { %1838 = vmax.xlane.f32.xlu0 %v1837_v26 }
 0x5b2   : > { %v6945_v35 = vpop.f32.mrb[36].mxu0 }
 0x5b3   : > { %v6947_v0 = vpop.f32.mrb[37].mxu0  ;;  %v1846_v1 = vsel %vm660_vm1, %v6945_v35, -inf }
 0x5b4   : > { %1847 = vmax.xlane.f32.xlu1 %v1846_v1  ;;  %v1843_v42 = vsel %vm660_vm1, %v6947_v0, -inf }
 0x5b5   : > { %1844 = vmax.xlane.f32.xlu0 %v1843_v42 }
 0x5b6   : > { %v6953_v47 = vpop.f32.mrb[38].mxu0 }
 0x5b7   : > { %v6955_v2 = vpop.f32.mrb[39].mxu0  ;;  %v1852_v4 = vsel %vm660_vm1, %v6953_v47, -inf }
 0x5b8   : > { %1853 = vmax.xlane.f32.xlu1 %v1852_v4  ;;  %v1849_v8 = vsel %vm660_vm1, %v6955_v2, -inf }
 0x5b9   : > { %1850 = vmax.xlane.f32.xlu0 %v1849_v8 }
 0x5ba   : > { %v6961_v49 = vpop.f32.mrb[40].mxu0 }
 0x5bb   : > { %v6963_v29 = vpop.f32.mrb[41].mxu0  ;;  %v1858_v25 = vsel %vm660_vm1, %v6961_v49, -inf }
 0x5bc   : > { %1859 = vmax.xlane.f32.xlu1 %v1858_v25  ;;  %v1855_v34 = vsel %vm660_vm1, %v6963_v29, -inf }
 0x5bd   : > { %1856 = vmax.xlane.f32.xlu0 %v1855_v34 }
 0x5be   : > { %v6969_v24 = vpop.f32.mrb[42].mxu0 }
 0x5bf   : > { %v6971_v10 = vpop.f32.mrb[43].mxu0  ;;  %v1864_v44 = vsel %vm660_vm1, %v6969_v24, -inf }
 0x5c0   : > { %1865 = vmax.xlane.f32.xlu1 %v1864_v44  ;;  %v1861_v46 = vsel %vm660_vm1, %v6971_v10, -inf }
 0x5c1   : > { %1862 = vmax.xlane.f32.xlu0 %v1861_v46 }
 0x5c2   : > { %v6977_v51 = vpop.f32.mrb[44].mxu0 }
 0x5c3   : > { %v6979_v53 = vpop.f32.mrb[45].mxu0  ;;  %v1870_v23 = vsel %vm660_vm1, %v6977_v51, -inf }
 0x5c4   : > { %1871 = vmax.xlane.f32.xlu1 %v1870_v23  ;;  %v1867_v12 = vsel %vm660_vm1, %v6979_v53, -inf }
 0x5c5   : > { %1868 = vmax.xlane.f32.xlu0 %v1867_v12 }
 0x5c6   : > { %v6985_v32 = vpop.f32.mrb[46].mxu0 }
 0x5c7   : > { %v6987_v62 = vpop.f32.mrb[47].mxu0  ;;  %v1876_v37 = vsel %vm660_vm1, %v6985_v32, -inf }
 0x5c8   : > { %1877 = vmax.xlane.f32.xlu1 %v1876_v37  ;;  %v1873_v55 = vsel %vm660_vm1, %v6987_v62, -inf }
 0x5c9   : > { %1874 = vmax.xlane.f32.xlu0 %v1873_v55 }
 0x5ca   : > { %v6993_v40 = vpop.f32.mrb[48].mxu0 }
 0x5cb   : > { %v6995_v14 = vpop.f32.mrb[49].mxu0 }
 0x5ce   : > { %v6997_v33 = vpop.f32.mrb[50].mxu0 }
 0x5cf   : > { %v6999_v57 = vpop.f32.mrb[51].mxu0 }
 0x5d2   : > { %v7001_v31 = vpop.f32.mrb[52].mxu0 }
 0x5d3   : > { %v7003_v3 = vpop.f32.mrb[53].mxu0 }
 0x5d6   : > { %v7005_v36 = vpop.f32.mrb[54].mxu0 }
 0x5d7   : > { %v7007_v16 = vpop.f32.mrb[55].mxu0 }
 0x5da   : > { %v7009_v39 = vpop.f32.mrb[56].mxu0 }
 0x5db   : > { %v7011_v38 = vpop.f32.mrb[57].mxu0 }
 0x5de   : > { %v7013_v54 = vpop.f32.mrb[58].mxu0 }
 0x5df   : > { %v7015_v6 = vpop.f32.mrb[59].mxu0 }
 0x5e2   : > { %v7017_v43 = vpop.f32.mrb[60].mxu0 }
 0x5e3   : > { %v7019_v18 = vpop.f32.mrb[61].mxu0 }
 0x5e6   : > { %v7021_v60 = vpop.f32.mrb[62].mxu0 }
 0x5e7   : > { %v7023_v28 = vpop.f32.mrb[63].mxu0 }
 0x639   : > { %v1836_v22 = vpop.xlane.xlu1 %1835 }
 0x63a   : > { %v1880_v45 = vsub.f32 %v6929_v20, %v1836_v22  ;;  %v1833_v50 = vpop.xlane.xlu0 %1832 }
 0x63b   : > { %v1879_v26 = vsub.f32 %v6931_v21, %v1833_v50 }
 0x63c   : > { %v1897_v1 = vmul.f32 1.442695, %v1880_v45 }
 0x63d   : > { %v1895_v42 = vmul.f32 1.442695, %v1879_v26  ;;  %v1842_v4 = vpop.xlane.xlu1 %1841 }
 0x63e   : > { %6120 = vpow2.f32 %v1897_v1  ;;  %v1882_v8 = vsub.f32 %v6937_v61, %v1842_v4  ;;  %v1839_v25 = vpop.xlane.xlu0 %1838 }
 0x63f   : > { %6122 = vpow2.f32 %v1895_v42  ;;  %v1881_v34 = vsub.f32 %v6939_v63, %v1839_v25 }
 0x640   : > { %v1901_v44 = vmul.f32 1.442695, %v1882_v8 }
 0x641   : > { %v1899_v46 = vmul.f32 1.442695, %v1881_v34  ;;  %v1848_v23 = vpop.xlane.xlu1 %1847 }
 0x642   : > { %6124 = vpow2.f32 %v1901_v44  ;;  %v1884_v12 = vsub.f32 %v6945_v35, %v1848_v23  ;;  %v1845_v20 = vpop.xlane.xlu0 %1844 }
 0x643   : > { %6126 = vpow2.f32 %v1899_v46  ;;  %v1883_v21 = vsub.f32 %v6947_v0, %v1845_v20 }
 0x644   : > { %v1905_v37 = vmul.f32 1.442695, %v1884_v12 }
 0x645   : > { %v1903_v55 = vmul.f32 1.442695, %v1883_v21  ;;  %v1854_v22 = vpop.xlane.xlu1 %1853 }
 0x646   : > { %6128 = vpow2.f32 %v1905_v37  ;;  %v1886_v61 = vsub.f32 %v6953_v47, %v1854_v22  ;;  %v1851_v45 = vpop.xlane.xlu0 %1850 }
 0x647   : > { %6130 = vpow2.f32 %v1903_v55  ;;  %v1885_v63 = vsub.f32 %v6955_v2, %v1851_v45 }
 0x648   : > { %v7033_v50 = vpop.eup %6120  ;;  %v1909_v26 = vmul.f32 1.442695, %v1886_v61 }
 0x649   : > { %v7035_v1 = vpop.eup %6122  ;;  %v1907_v35 = vmul.f32 1.442695, %v1885_v63  ;;  %v1860_v42 = vpop.xlane.xlu1 %1859  ;;  %v1930_v0 = vsel %vm660_vm1, %v7033_v50, 0.0 }
 0x64a   : > { %6132 = vpow2.f32 %v1909_v26  ;;  %v1888_v4 = vsub.f32 %v6961_v49, %v1860_v42  ;;  %v1857_v8 = vpop.xlane.xlu0 %1856  ;;  %1931 = vadd.xlane.f32.xlu1 %v1930_v0  ;;  %v1927_v47 = vsel %vm660_vm1, %v7035_v1, 0.0 }
 0x64b   : > { %6134 = vpow2.f32 %v1907_v35  ;;  %v1887_v2 = vsub.f32 %v6963_v29, %v1857_v8  ;;  %1928 = vadd.xlane.f32.xlu0 %v1927_v47 }
 0x64c   : > { %v7043_v25 = vpop.eup %6124  ;;  %v1913_v34 = vmul.f32 1.442695, %v1888_v4 }
 0x64d   : > { %v7045_v44 = vpop.eup %6126  ;;  %v1911_v46 = vmul.f32 1.442695, %v1887_v2  ;;  %v1866_v23 = vpop.xlane.xlu1 %1865  ;;  %v1936_v12 = vsel %vm660_vm1, %v7043_v25, 0.0 }
 0x64e   : > { %6136 = vpow2.f32 %v1913_v34  ;;  %v1890_v49 = vsub.f32 %v6969_v24, %v1866_v23  ;;  %v1863_v20 = vpop.xlane.xlu0 %1862  ;;  %1937 = vadd.xlane.f32.xlu1 %v1936_v12  ;;  %v1933_v21 = vsel %vm660_vm1, %v7045_v44, 0.0 }
 0x64f   : > { %6138 = vpow2.f32 %v1911_v46  ;;  %v1889_v29 = vsub.f32 %v6971_v10, %v1863_v20  ;;  %1934 = vadd.xlane.f32.xlu0 %v1933_v21 }
 0x650   : > { %v7053_v37 = vpop.eup %6128  ;;  %v1917_v55 = vmul.f32 1.442695, %v1890_v49 }
 0x651   : > { %v7055_v22 = vpop.eup %6130  ;;  %v1915_v61 = vmul.f32 1.442695, %v1889_v29  ;;  %v1872_v45 = vpop.xlane.xlu1 %1871  ;;  %v1942_v63 = vsel %vm660_vm1, %v7053_v37, 0.0 }
 0x652   : > { %6140 = vpow2.f32 %v1917_v55  ;;  %v1892_v24 = vsub.f32 %v6977_v51, %v1872_v45  ;;  %v1869_v26 = vpop.xlane.xlu0 %1868  ;;  %1943 = vadd.xlane.f32.xlu1 %v1942_v63  ;;  %v1939_v35 = vsel %vm660_vm1, %v7055_v22, 0.0 }
 0x653   : > { %6142 = vpow2.f32 %v1915_v61  ;;  %v1891_v10 = vsub.f32 %v6979_v53, %v1869_v26  ;;  %1940 = vadd.xlane.f32.xlu0 %v1939_v35 }
 0x654   : > { %v7063_v42 = vpop.eup %6132  ;;  %v1921_v0 = vmul.f32 1.442695, %v1892_v24 }
 0x655   : > { %v7065_v4 = vpop.eup %6134  ;;  %v1919_v8 = vmul.f32 1.442695, %v1891_v10  ;;  %v1878_v47 = vpop.xlane.xlu1 %1877  ;;  %v1948_v2 = vsel %vm660_vm1, %v7063_v42, 0.0 }
 0x656   : > { %6144 = vpow2.f32 %v1921_v0  ;;  %v1894_v51 = vsub.f32 %v6985_v32, %v1878_v47  ;;  %1949 = vadd.xlane.f32.xlu1 %v1948_v2  ;;  %v1875_v34 = vpop.xlane.xlu0 %1874  ;;  %v1945_v46 = vsel %vm660_vm1, %v7065_v4, 0.0  ;;  %v4835_v47 = vld [vmem:[%s7896_s2 + $0x20] sm:$0xff]  ;;  %v4836_v2 = vld [vmem:[%s7896_s2 + $0x28] sm:$0xff] }
 0x657   : > { %6146 = vpow2.f32 %v1919_v8  ;;  %v1893_v53 = vsub.f32 %v6987_v62, %v1875_v34  ;;  %1946 = vadd.xlane.f32.xlu0 %v1945_v46 }
 0x658   : > { %v7073_v23 = vpop.eup %6136  ;;  %v1925_v12 = vmul.f32 1.442695, %v1894_v51  ;;  %v5980_v51 = vpack.c.bf16 %v4836_v2, %v4835_v47 }
 0x659   : > { %v7075_v49 = vpop.eup %6138  ;;  %v1923_v20 = vmul.f32 1.442695, %v1893_v53  ;;  %v1954_v21 = vsel %vm660_vm1, %v7073_v23, 0.0 }
 0x65a   : > { %6148 = vpow2.f32 %v1925_v12  ;;  %1955 = vadd.xlane.f32.xlu1 %v1954_v21  ;;  %v1951_v32 = vsel %vm660_vm1, %v7075_v49, 0.0  ;;  %5981 = vmatprep.subr.bf16.mxu1 %v5980_v51 }
 0x65b   : > { %6150 = vpow2.f32 %v1923_v20  ;;  %1952 = vadd.xlane.f32.xlu0 %v1951_v32 }
 0x65c   : > { %v7081_v29 = vpop.eup %6140 }
 0x65d   : > { %v7083_v62 = vpop.eup %6142  ;;  %v1960_v55 = vsel %vm660_vm1, %v7081_v29, 0.0 }
 0x65e   : > { %1961 = vadd.xlane.f32.xlu1 %v1960_v55  ;;  %v1957_v61 = vsel %vm660_vm1, %v7083_v62, 0.0  ;;  %v4837_v55 = vld [vmem:[%s7896_s2 + $0x30] sm:$0xff] }
 0x65f   : > { %1958 = vadd.xlane.f32.xlu0 %v1957_v61  ;;  %v4838_v61 = vld [vmem:[%s7896_s2 + $0x38] sm:$0xff] }
 0x660   : > { %v7089_v45 = vpop.eup %6144  ;;  %v5984_v2 = vpack.c.bf16 %v4838_v61, %v4837_v55 }
 0x661   : > { %v7091_v63 = vpop.eup %6146  ;;  %v1966_v24 = vsel %vm660_vm1, %v7089_v45, 0.0 }
 0x662   : > { %1967 = vadd.xlane.f32.xlu1 %v1966_v24  ;;  %v1963_v26 = vsel %vm660_vm1, %v7091_v63, 0.0 }
 0x663   : > { %1964 = vadd.xlane.f32.xlu0 %v1963_v26 }
 0x664   : > { %v7097_v35 = vpop.eup %6148 }
 0x665   : > { %v7099_v10 = vpop.eup %6150  ;;  %v1972_v0 = vsel %vm660_vm1, %v7097_v35, 0.0 }
 0x666   : > { %1973 = vadd.xlane.f32.xlu1 %v1972_v0  ;;  %v1969_v8 = vsel %vm660_vm1, %v7099_v10, 0.0 }
 0x667   : > { %1970 = vadd.xlane.f32.xlu0 %v1969_v8 }
 0x6d7   : > { %v1932_v34 = vpop.xlane.xlu1 %1931 }
 0x6d8   : > { %6152 = vrcp.f32 %v1932_v34  ;;  %v1929_v46 = vpop.xlane.xlu0 %1928 }
 0x6d9   : > { %6154 = vrcp.f32 %v1929_v46 }
 0x6db   : > { %v1938_v53 = vpop.xlane.xlu1 %1937 }
 0x6dc   : > { %6156 = vrcp.f32 %v1938_v53  ;;  %v1935_v12 = vpop.xlane.xlu0 %1934 }
 0x6dd   : > { %6158 = vrcp.f32 %v1935_v12 }
 0x6df   : > { %v1944_v20 = vpop.xlane.xlu1 %1943 }
 0x6e0   : > { %6160 = vrcp.f32 %v1944_v20  ;;  %v1941_v21 = vpop.xlane.xlu0 %1940 }
 0x6e1   : > { %6162 = vrcp.f32 %v1941_v21 }
 0x6e2   : > { %v6153_v32 = vpop.eup %6152 }
 0x6e3   : > { %v6155_v24 = vpop.eup %6154  ;;  %v1950_v26 = vpop.xlane.xlu1 %1949  ;;  %v1978_v47 = vmul.f32 %v6153_v32, %v7033_v50 }
 0x6e4   : > { %6164 = vrcp.f32 %v1950_v26  ;;  %v1947_v0 = vpop.xlane.xlu0 %1946  ;;  %v1976_v8 = vmul.f32 %v6155_v24, %v7035_v1 }
 0x6e5   : > { %6166 = vrcp.f32 %v1947_v0 }
 0x6e6   : > { %v6157_v34 = vpop.eup %6156  ;;  %5566 = vmatprep.mubr.msk.f32.mxu1 %vm660_vm1, %v1976_v8 }
 0x6e7   : > { %v6159_v46 = vpop.eup %6158  ;;  %v1956_v53 = vpop.xlane.xlu1 %1955  ;;  %5567 = vmatmul.mubr.msk.f32.vlgmr.msra.gmra.mrb[48].mxu1 %vm660_vm1, %v1978_v47  ;;  %v1982_v21 = vmul.f32 %v6157_v34, %v7043_v25 }
 0x6e8   : > { %6168 = vrcp.f32 %v1956_v53  ;;  %5983 = vmatpush3.bf16.msra.mxu1 %v5980_v51  ;;  %v1953_v12 = vpop.xlane.xlu0 %1952  ;;  %v1980_v20 = vmul.f32 %v6159_v46, %v7045_v44 }
 0x6e9   : > { %6170 = vrcp.f32 %v1953_v12  ;;  %5985 = vmatprep.subr.bf16.mxu1 %v5984_v2 }
 0x6ea   : > { %v6161_v1 = vpop.eup %6160  ;;  %5569 = vmatprep.mubr.msk.f32.mxu1 %vm660_vm1, %v1980_v20 }
 0x6eb   : > { %v6163_v50 = vpop.eup %6162  ;;  %v1962_v32 = vpop.xlane.xlu1 %1961  ;;  %5570 = vmatmul.mubr.msk.f32.gmra.mrb[50].mxu1 %vm660_vm1, %v1982_v21  ;;  %v1986_v51 = vmul.f32 %v6161_v1, %v7053_v37 }
 0x6ec   : > { %6172 = vrcp.f32 %v1962_v32  ;;  %v1959_v55 = vpop.xlane.xlu0 %1958  ;;  %v1984_v61 = vmul.f32 %v6163_v50, %v7055_v22  ;;  %5987 = vmatpush3.bf16.msra.mxu1 %v5984_v2 }
 0x6ed   : > { %6174 = vrcp.f32 %v1959_v55 }
 0x6ee   : > { %v6165_v44 = vpop.eup %6164  ;;  %5572 = vmatprep.mubr.msk.f32.mxu1 %vm660_vm1, %v1984_v61 }
 0x6ef   : > { %v6167_v25 = vpop.eup %6166  ;;  %v1968_v24 = vpop.xlane.xlu1 %1967  ;;  %5573 = vmatmul.mubr.msk.f32.gmra.mrb[52].mxu1 %vm660_vm1, %v1986_v51  ;;  %v1990_v8 = vmul.f32 %v6165_v44, %v7063_v42 }
 0x6f0   : > { %6176 = vrcp.f32 %v1968_v24  ;;  %v1965_v26 = vpop.xlane.xlu0 %1964  ;;  %v1988_v0 = vmul.f32 %v6167_v25, %v7065_v4 }
 0x6f1   : > { %6178 = vrcp.f32 %v1965_v26 }
 0x6f2   : > { %v6169_v47 = vpop.eup %6168  ;;  %5575 = vmatprep.mubr.msk.f32.mxu1 %vm660_vm1, %v1988_v0 }
 0x6f3   : > { %v6171_v22 = vpop.eup %6170  ;;  %v1974_v2 = vpop.xlane.xlu1 %1973  ;;  %5576 = vmatmul.mubr.msk.f32.gmra.mrb[54].mxu1 %vm660_vm1, %v1990_v8  ;;  %v1994_v46 = vmul.f32 %v6169_v47, %v7073_v23 }
 0x6f4   : > { %6180 = vrcp.f32 %v1974_v2  ;;  %v1971_v37 = vpop.xlane.xlu0 %1970  ;;  %v1992_v34 = vmul.f32 %v6171_v22, %v7075_v49 }
 0x6f5   : > { %6182 = vrcp.f32 %v1971_v37 }
 0x6f6   : > { %v6173_v53 = vpop.eup %6172  ;;  %5578 = vmatprep.mubr.msk.f32.mxu1 %vm660_vm1, %v1992_v34 }
 0x6f7   : > { %v6175_v4 = vpop.eup %6174  ;;  %5579 = vmatmul.mubr.msk.f32.gmra.mrb[56].mxu1 %vm660_vm1, %v1994_v46  ;;  %v1998_v12 = vmul.f32 %v6173_v53, %v7081_v29 }
 0x6f8   : > { %v1996_v42 = vmul.f32 %v6175_v4, %v7083_v62 }
 0x6fa   : > { %v6177_v20 = vpop.eup %6176  ;;  %5581 = vmatprep.mubr.msk.f32.mxu1 %vm660_vm1, %v1996_v42 }
 0x6fb   : > { %v6179_v21 = vpop.eup %6178  ;;  %5582 = vmatmul.mubr.msk.f32.gmra.mrb[58].mxu1 %vm660_vm1, %v1998_v12  ;;  %v2002_v23 = vmul.f32 %v6177_v20, %v7089_v45 }
 0x6fc   : > { %v2000_v49 = vmul.f32 %v6179_v21, %v7091_v63 }
 0x6fe   : > { %v6181_v1 = vpop.eup %6180  ;;  %5584 = vmatprep.mubr.msk.f32.mxu1 %vm660_vm1, %v2000_v49 }
 0x6ff   : > { %v6183_v50 = vpop.eup %6182  ;;  %5585 = vmatmul.mubr.msk.f32.gmra.mrb[60].mxu1 %vm660_vm1, %v2002_v23  ;;  %v2006_v29 = vmul.f32 %v6181_v1, %v7097_v35 }
 0x700   : > { %v2004_v62 = vmul.f32 %v6183_v50, %v7099_v10 }
 0x702   : > { %5587 = vmatprep.mubr.msk.f32.mxu1 %vm660_vm1, %v2004_v62 }
 0x703   : > { %5588 = vmatmul.mubr.msk.f32.gmra.mrb[62].mxu1 %vm660_vm1, %v2006_v29 }
 0x704   : > { %5630 = vmatprep.mubr.msk.f32.mxu1 %vm466_vm0, %v6995_v14  ;;  %v4856_v14 = vld [vmem:[%s7897_s3 + $0x28] sm:$0xff] }
 0x707   : > { %5631 = vmatmul.mubr.msk.f32.vlgmr.msra.gmra.mrb[64].mxu1 %vm466_vm0, %v6993_v40  ;;  %v4855_v40 = vld [vmem:[%s7897_s3 + $0x20] sm:$0xff] }
 0x708   : > { %5633 = vmatprep.mubr.msk.f32.mxu1 %vm466_vm0, %v6999_v57  ;;  %v4857_v57 = vld [vmem:[%s7897_s3 + $0x30] sm:$0xff] }
 0x70b   : > { %5634 = vmatmul.mubr.msk.f32.gmra.mrb[66].mxu1 %vm466_vm0, %v6997_v33  ;;  %v5988_v33 = vpack.c.bf16 %v4856_v14, %v4855_v40 }
 0x70c   : > { %5636 = vmatprep.mubr.msk.f32.mxu1 %vm466_vm0, %v7003_v3 }
 0x70d   : > { %5989 = vmatprep.subr.bf16.mxu0 %v5988_v33 }
 0x70e   : > { %5991 = vmatpush3.bf16.msra.mxu0 %v5988_v33 }
 0x70f   : > { %5637 = vmatmul.mubr.msk.f32.gmra.mrb[68].mxu1 %vm466_vm0, %v7001_v31  ;;  %v4858_v31 = vld [vmem:[%s7897_s3 + $0x38] sm:$0xff] }
 0x710   : > { %5639 = vmatprep.mubr.msk.f32.mxu1 %vm466_vm0, %v7007_v16  ;;  %v5992_v3 = vpack.c.bf16 %v4858_v31, %v4857_v57  ;;  %v4877_v16 = vld [vmem:[%s7898_s4 + $0x40] sm:$0xff] }
 0x712   : > { %5993 = vmatprep.subr.bf16.mxu0 %v5992_v3 }
 0x713   : > { %5640 = vmatmul.mubr.msk.f32.gmra.mrb[70].mxu1 %vm466_vm0, %v7005_v36  ;;  %5995 = vmatpush3.bf16.msra.mxu0 %v5992_v3  ;;  %v6248_v36 = vld [vmem:[%s7899_s5] sm:$0xf] }
 0x714   : > { %5642 = vmatprep.mubr.msk.f32.mxu1 %vm466_vm0, %v7011_v38  ;;  %5718 = vmatprep.subr.msk.mxu0 %vm886_vm2, %v6248_v36  ;;  %v4879_v38 = vld [vmem:[%s7898_s4 + $0x50] sm:$0xff] }
 0x717   : > { %5643 = vmatmul.mubr.msk.f32.gmra.mrb[72].mxu1 %vm466_vm0, %v7009_v39  ;;  %v4878_v39 = vld [vmem:[%s7898_s4 + $0x48] sm:$0xff] }
 0x718   : > { %5645 = vmatprep.mubr.msk.f32.mxu1 %vm466_vm0, %v7015_v6  ;;  %v4880_v6 = vld [vmem:[%s7898_s4 + $0x58] sm:$0xff] }
 0x71b   : > { %5646 = vmatmul.mubr.msk.f32.gmra.mrb[74].mxu1 %vm466_vm0, %v7013_v54  ;;  %v5996_v54 = vpack.c.bf16 %v4878_v39, %v4877_v16 }
 0x71c   : > { %5648 = vmatprep.mubr.msk.f32.mxu1 %vm466_vm0, %v7019_v18 }
 0x71d   : > { %5997 = vmatprep.subr.bf16.mxu1 %v5996_v54 }
 0x71e   : > { %5999 = vmatpush3.bf16.msra.mxu1 %v5996_v54 }
 0x71f   : > { %5649 = vmatmul.mubr.msk.f32.gmra.mrb[76].mxu1 %vm466_vm0, %v7017_v43  ;;  %v6000_v43 = vpack.c.bf16 %v4880_v6, %v4879_v38 }
 0x720   : > { %5651 = vmatprep.mubr.msk.f32.mxu1 %vm466_vm0, %v7023_v28 }
 0x721   : > { %6001 = vmatprep.subr.bf16.mxu1 %v6000_v43 }
 0x722   : > { %6003 = vmatpush3.bf16.msra.mxu1 %v6000_v43 }
 0x723   : > { %5652 = vmatmul.mubr.msk.f32.gmra.mrb[78].mxu1 %vm466_vm0, %v7021_v60 }
 0x7ba   : > { %v5568_v18 = vpop.f32.mrb[48].mxu1 }
 0x7bb   : > { %v2121_v60 = vpop.f32.mrb[49].mxu1 }
 0x7be   : > { %v5571_v28 = vpop.f32.mrb[50].mxu1 }
 0x7bf   : > { %v2131_v45 = vpop.f32.mrb[51].mxu1 }
 0x7c2   : > { %v5574_v63 = vpop.f32.mrb[52].mxu1 }
 0x7c3   : > { %v2141_v35 = vpop.f32.mrb[53].mxu1 }
 0x7c6   : > { %v5577_v10 = vpop.f32.mrb[54].mxu1 }
 0x7c7   : > { %v2151_v32 = vpop.f32.mrb[55].mxu1 }
 0x7ca   : > { %v5580_v55 = vpop.f32.mrb[56].mxu1 }
 0x7cb   : > { %v2161_v61 = vpop.f32.mrb[57].mxu1 }
 0x7ce   : > { %v5583_v51 = vpop.f32.mrb[58].mxu1 }
 0x7cf   : > { %v2171_v44 = vpop.f32.mrb[59].mxu1 }
 0x7d2   : > { %v5586_v25 = vpop.f32.mrb[60].mxu1 }
 0x7d3   : > { %v2181_v24 = vpop.f32.mrb[61].mxu1 }
 0x7d6   : > { %v5589_v26 = vpop.f32.mrb[62].mxu1 }
 0x7d7   : > { %v2191_v0 = vpop.f32.mrb[63].mxu1 }
 0x7da   : > { %v5632_v8 = vpop.f32.mrb[64].mxu1 }
 0x7db   : > { %v2549_v47 = vmul.f32 %v5632_v8, %v5568_v18  ;;  %v2469_v22 = vpop.f32.mrb[65].mxu1  ;;  %v4914_v18 = vld [vmem:[%s7895_s1 + $0x40] sm:$0xff] }
 0x7dc   : > { %v2548_v2 = vmul.f32 %v2469_v22, %v2121_v60  ;;  %v4915_v60 = vld [vmem:[%s7895_s1 + $0x48] sm:$0xff] }
 0x7de   : > { %v5635_v37 = vpop.f32.mrb[66].mxu1  ;;  %5662 = vmatprep.mubr.msk.f32.mxu0 %vm466_vm0, %v2548_v2 }
 0x7df   : > { %v2551_v34 = vmul.f32 %v5635_v37, %v5571_v28  ;;  %v2479_v46 = vpop.f32.mrb[67].mxu1  ;;  %5663 = vmatmul.mubr.msk.f32.vlgmr.msra.gmra.mrb[64].mxu0 %vm466_vm0, %v2549_v47  ;;  %v6004_v28 = vpack.c.bf16 %v4915_v60, %v4914_v18  ;;  %v7262_v37 = vld [vmem:[%s6374_s23 + $0x18] sm:$0xff] }
 0x7e0   : > { %v2550_v53 = vmul.f32 %v2479_v46, %v2131_v45  ;;  %5719 = vmatpush3.msk.msra.mxu0 %vm886_vm2, %v6248_v36  ;;  %v7235_v45 = vld [vmem:[%s7900_s6 + $0x1] ss:$0 sm:$0xff] }
 0x7e1   : > { %6005 = vmatprep.subr.bf16.mxu1 %v6004_v28 }
 0x7e2   : > { %v5638_v4 = vpop.f32.mrb[68].mxu1  ;;  %5665 = vmatprep.mubr.msk.f32.mxu0 %vm466_vm0, %v2550_v53  ;;  %v7266_v53 = vld [vmem:[%s6374_s23 + $0x10] sm:$0xff] }
 0x7e3   : > { %v2553_v42 = vmul.f32 %v5638_v4, %v5574_v63  ;;  %v2489_v12 = vpop.f32.mrb[69].mxu1  ;;  %5666 = vmatmul.mubr.msk.f32.gmra.mrb[66].mxu0 %vm466_vm0, %v2551_v34 }
 0x7e4   : > { %v2552_v20 = vmul.f32 %v2489_v12, %v2141_v35 }
 0x7e6   : > { %v5641_v21 = vpop.f32.mrb[70].mxu1  ;;  %5668 = vmatprep.mubr.msk.f32.mxu0 %vm466_vm0, %v2552_v20 }
 0x7e7   : > { %v2555_v49 = vmul.f32 %v5641_v21, %v5577_v10  ;;  %v2499_v23 = vpop.f32.mrb[71].mxu1  ;;  %5669 = vmatmul.mubr.msk.f32.gmra.mrb[68].mxu0 %vm466_vm0, %v2553_v42 }
 0x7e8   : > { %v2554_v1 = vmul.f32 %v2499_v23, %v2151_v32 }
 0x7ea   : > { %v5644_v50 = vpop.f32.mrb[72].mxu1  ;;  %5671 = vmatprep.mubr.msk.f32.mxu0 %vm466_vm0, %v2554_v1  ;;  %v7286_v1 = vld [vmem:[%s6374_s23 + $0x20] sm:$0xff] }
 0x7eb   : > { %v2557_v62 = vmul.f32 %v5644_v50, %v5580_v55  ;;  %v2509_v29 = vpop.f32.mrb[73].mxu1  ;;  %5672 = vmatmul.mubr.msk.f32.gmra.mrb[70].mxu0 %vm466_vm0, %v2555_v49  ;;  %v7240_v55 = vld [vmem:[%s6374_s23 + $0x8] sm:$0xff] }
 0x7ec   : > { %v2556_v40 = vmul.f32 %v2509_v29, %v2161_v61  ;;  %v7282_v49 = vld [vmem:[%s6374_s23 + $0x28] sm:$0xff] }
 0x7ee   : > { %v5647_v14 = vpop.f32.mrb[74].mxu1  ;;  %5674 = vmatprep.mubr.msk.f32.mxu0 %vm466_vm0, %v2556_v40 }
 0x7ef   : > { %v2559_v33 = vmul.f32 %v5647_v14, %v5583_v51  ;;  %v2519_v57 = vpop.f32.mrb[75].mxu1  ;;  %5675 = vmatmul.mubr.msk.f32.gmra.mrb[72].mxu0 %vm466_vm0, %v2557_v62  ;;  %v7244_v51 = vld [vmem:[%s6374_s23] sm:$0xff] }
 0x7f0   : > { %v2558_v31 = vmul.f32 %v2519_v57, %v2171_v44 }
 0x7f2   : > { %v5650_v3 = vpop.f32.mrb[76].mxu1  ;;  %5677 = vmatprep.mubr.msk.f32.mxu0 %vm466_vm0, %v2558_v31  ;;  %v7306_v31 = vld [vmem:[%s6374_s23 + $0x30] sm:$0xff] }
 0x7f3   : > { %v2561_v36 = vmul.f32 %v5650_v3, %v5586_v25  ;;  %v2529_v16 = vpop.f32.mrb[77].mxu1  ;;  %5678 = vmatmul.mubr.msk.f32.gmra.mrb[74].mxu0 %vm466_vm0, %v2559_v33  ;;  %v7302_v33 = vld [vmem:[%s6374_s23 + $0x38] sm:$0xff] }
 0x7f4   : > { %v2560_v39 = vmul.f32 %v2529_v16, %v2181_v24  ;;  %v4916_v24 = vld [vmem:[%s7895_s1 + $0x50] sm:$0xff] }
 0x7f6   : > { %v5653_v38 = vpop.f32.mrb[78].mxu1  ;;  %5680 = vmatprep.mubr.msk.f32.mxu0 %vm466_vm0, %v2560_v39 }
 0x7f7   : > { %v2563_v54 = vmul.f32 %v5653_v38, %v5589_v26  ;;  %v2539_v6 = vpop.f32.mrb[79].mxu1  ;;  %5681 = vmatmul.mubr.msk.f32.gmra.mrb[76].mxu0 %vm466_vm0, %v2561_v36  ;;  %v4917_v26 = vld [vmem:[%s7895_s1 + $0x58] sm:$0xff] }
 0x7f8   : > { %v2562_v43 = vmul.f32 %v2539_v6, %v2191_v0  ;;  %v6008_v46 = vpack.c.bf16 %v4917_v26, %v4916_v24 }
 0x7fa   : > { %5683 = vmatprep.mubr.msk.f32.mxu0 %vm466_vm0, %v2562_v43  ;;  %v7326_v43 = vld [vmem:[%s6374_s23 + $0x40] sm:$0xff] }
 0x7fb   : > { %5684 = vmatmul.mubr.msk.f32.gmra.mrb[78].mxu0 %vm466_vm0, %v2563_v54  ;;  %v7322_v54 = vld [vmem:[%s6374_s23 + $0x48] sm:$0xff]  ;;  %7923 = vst [vmem:[#allocation3_spill] sm:$0xff] %v7326_v43 }
 0x8b2   : > { %v5664_v63 = vpop.f32.mrb[64].mxu0 }
 0x8b3   : > { %v2697_v35 = vadd.f32 %v5664_v63, %v7235_v45  ;;  %v2691_v10 = vpop.f32.mrb[65].mxu0 }
 0x8b4   : > { %v2692_v32 = vadd.f32 %v7235_v45, %v2691_v10  ;;  %v7342_v10 = vld [vmem:[%s6374_s23 + $0x58] sm:$0xff] }
 0x8b5   : > { %v2771_v61 = vmul.f32 %v7240_v55, %v2697_v35  ;;  %7926 = vst [vmem:[#allocation6_spill] sm:$0xff] %v7342_v10 }
 0x8b6   : > { %v2770_v44 = vmul.f32 %v7244_v51, %v2692_v32  ;;  %v5667_v25 = vpop.f32.mrb[66].mxu0 }
 0x8b7   : > { %v2707_v0 = vadd.f32 %v5667_v25, %v7235_v45  ;;  %v2701_v8 = vpop.f32.mrb[67].mxu0  ;;  %v7259_v2 = vadd.f32 %v2771_v61, %v6795_v48  ;;  %v7346_v61 = vld [vmem:[%s6374_s23 + $0x50] sm:$0xff] }
 0x8b8   : > { %v7255_v47 = vadd.f32 %v2770_v44, %v6791_v30  ;;  %v2702_v22 = vadd.f32 %v7235_v45, %v2701_v8  ;;  %7927 = vst [vmem:[#allocation7_spill] sm:$0xff] %v7346_v61  ;;  %v7362_v8 = vld [vmem:[%s6374_s23 + $0x68] sm:$0xff] }
 0x8b9   : > { %v2773_v34 = vmul.f32 %v7262_v37, %v2707_v0  ;;  %7930 = vst [vmem:[#allocation10_spill] sm:$0xff] %v7362_v8 }
 0x8ba   : > { %v2772_v4 = vmul.f32 %v7266_v53, %v2702_v22  ;;  %v5670_v42 = vpop.f32.mrb[68].mxu0  ;;  %5694 = vmatprep.mubr.msk.f32.mxu1 %vm466_vm0, %v7255_v47 }
 0x8bb   : > { %v2717_v30 = vadd.f32 %v5670_v42, %v7235_v45  ;;  %v2711_v12 = vpop.f32.mrb[69].mxu0  ;;  %5695 = vmatmul.mubr.msk.f32.vlgmr.msra.gmra.mrb[80].mxu1 %vm466_vm0, %v7259_v2  ;;  %v7279_v21 = vadd.f32 %v2773_v34, %v6809_v5  ;;  %v7366_v34 = vld [vmem:[%s6374_s23 + $0x60] sm:$0xff] }
 0x8bc   : > { %v7275_v48 = vadd.f32 %v2772_v4, %v6805_v7  ;;  %v2712_v20 = vadd.f32 %v7235_v45, %v2711_v12  ;;  %6007 = vmatpush3.bf16.msra.mxu1 %v6004_v28  ;;  %7931 = vst [vmem:[#allocation11_spill] sm:$0xff] %v7366_v34 }
 0x8bd   : > { %v2775_v23 = vmul.f32 %v7282_v49, %v2717_v30  ;;  %6009 = vmatprep.subr.bf16.mxu1 %v6008_v46 }
 0x8be   : > { %v2774_v50 = vmul.f32 %v7286_v1, %v2712_v20  ;;  %v5673_v62 = vpop.f32.mrb[70].mxu0  ;;  %5697 = vmatprep.mubr.msk.f32.mxu1 %vm466_vm0, %v7275_v48  ;;  %v7382_v20 = vld [vmem:[%s6374_s23 + $0x78] sm:$0xff] }
 0x8bf   : > { %v2727_v7 = vadd.f32 %v5673_v62, %v7235_v45  ;;  %v2721_v29 = vpop.f32.mrb[71].mxu0  ;;  %5698 = vmatmul.mubr.msk.f32.gmra.mrb[82].mxu1 %vm466_vm0, %v7279_v21  ;;  %v7299_v14 = vadd.f32 %v2775_v23, %v6823_v52  ;;  %7934 = vst [vmem:[#allocation14_spill] sm:$0xff] %v7382_v20 }
 0x8c0   : > { %v7295_v5 = vadd.f32 %v2774_v50, %v6819_v9  ;;  %v2722_v40 = vadd.f32 %v7235_v45, %v2721_v29  ;;  %6011 = vmatpush3.bf16.msra.mxu1 %v6008_v46  ;;  %v7386_v50 = vld [vmem:[%s6374_s23 + $0x70] sm:$0xff] }
 0x8c1   : > { %v2777_v57 = vmul.f32 %v7302_v33, %v2727_v7  ;;  %7935 = vst [vmem:[#allocation15_spill] sm:$0xff] %v7386_v50 }
 0x8c2   : > { %v2776_v3 = vmul.f32 %v7306_v31, %v2722_v40  ;;  %v5676_v36 = vpop.f32.mrb[72].mxu0  ;;  %5700 = vmatprep.mubr.msk.f32.mxu1 %vm466_vm0, %v7295_v5 }
 0x8c3   : > { %v2737_v9 = vadd.f32 %v5676_v36, %v7235_v45  ;;  %v2731_v16 = vpop.f32.mrb[73].mxu0  ;;  %5701 = vmatmul.mubr.msk.f32.gmra.mrb[84].mxu1 %vm466_vm0, %v7299_v14  ;;  %v7319_v38 = vadd.f32 %v2777_v57, %v6837_v59 }
 0x8c4   : > { %v7315_v52 = vadd.f32 %v2776_v3, %v6833_v11  ;;  %v2732_v39 = vadd.f32 %v7235_v45, %v2731_v16 }
 0x8c5   : > { %v2779_v6 = vmul.f32 %v7322_v54, %v2737_v9 }
 0x8c6   : > { %v2778_v18 = vmul.f32 %v7326_v43, %v2732_v39  ;;  %v5679_v60 = vpop.f32.mrb[74].mxu0  ;;  %5703 = vmatprep.mubr.msk.f32.mxu1 %vm466_vm0, %v7315_v52 }
 0x8c7   : > { %v2747_v11 = vadd.f32 %v5679_v60, %v7235_v45  ;;  %v2741_v28 = vpop.f32.mrb[75].mxu0  ;;  %5704 = vmatmul.mubr.msk.f32.gmra.mrb[86].mxu1 %vm466_vm0, %v7319_v38  ;;  %v7339_v35 = vadd.f32 %v2779_v6, %v6851_v56 }
 0x8c8   : > { %v7335_v59 = vadd.f32 %v2778_v18, %v6847_v13  ;;  %v2742_v63 = vadd.f32 %v7235_v45, %v2741_v28 }
 0x8c9   : > { %7925 = vst [vmem:[#allocation5_spill] sm:$0xff] %v7339_v35  ;;  %v2781_v32 = vmul.f32 %v7342_v10, %v2747_v11 }
 0x8ca   : > { %7924 = vst [vmem:[#allocation4_spill] sm:$0xff] %v7335_v59  ;;  %v2780_v44 = vmul.f32 %v7346_v61, %v2742_v63  ;;  %v5682_v25 = vpop.f32.mrb[76].mxu0  ;;  %5706 = vmatprep.mubr.msk.f32.mxu1 %vm466_vm0, %v7335_v59 }
 0x8cb   : > { %v2757_v13 = vadd.f32 %v5682_v25, %v7235_v45  ;;  %v2751_v24 = vpop.f32.mrb[77].mxu0  ;;  %5707 = vmatmul.mubr.msk.f32.gmra.mrb[88].mxu1 %vm466_vm0, %v7339_v35  ;;  %v7359_v0 = vadd.f32 %v2781_v32, %v6865_v41 }
 0x8cc   : > { %v7355_v56 = vadd.f32 %v2780_v44, %v6861_v15  ;;  %v2752_v26 = vadd.f32 %v7235_v45, %v2751_v24 }
 0x8cd   : > { %7929 = vst [vmem:[#allocation9_spill] sm:$0xff] %v7359_v0  ;;  %v2783_v22 = vmul.f32 %v7362_v8, %v2757_v13 }
 0x8ce   : > { %7928 = vst [vmem:[#allocation8_spill] sm:$0xff] %v7355_v56  ;;  %v2782_v46 = vmul.f32 %v7366_v34, %v2752_v26  ;;  %v5685_v4 = vpop.f32.mrb[78].mxu0  ;;  %5709 = vmatprep.mubr.msk.f32.mxu1 %vm466_vm0, %v7355_v56 }
 0x8cf   : > { %v2767_v15 = vadd.f32 %v5685_v4, %v7235_v45  ;;  %v2761_v42 = vpop.f32.mrb[79].mxu0  ;;  %5710 = vmatmul.mubr.msk.f32.gmra.mrb[90].mxu1 %vm466_vm0, %v7359_v0  ;;  %v7379_v12 = vadd.f32 %v2783_v22, %v6879_v58 }
 0x8d0   : > { %v7375_v41 = vadd.f32 %v2782_v46, %v6875_v17  ;;  %v2762_v30 = vadd.f32 %v7235_v45, %v2761_v42 }
 0x8d1   : > { %7933 = vst [vmem:[#allocation13_spill] sm:$0xff] %v7379_v12  ;;  %v2785_v23 = vmul.f32 %v7382_v20, %v2767_v15 }
 0x8d2   : > { %7932 = vst [vmem:[#allocation12_spill] sm:$0xff] %v7375_v41  ;;  %v2784_v62 = vmul.f32 %v7386_v50, %v2762_v30  ;;  %5712 = vmatprep.mubr.msk.f32.mxu1 %vm466_vm0, %v7375_v41 }
 0x8d3   : > { %5713 = vmatmul.mubr.msk.f32.gmra.mrb[92].mxu1 %vm466_vm0, %v7379_v12  ;;  %v7397_v58 = vadd.f32 %v2785_v23, %v6891_v19 }
 0x8d4   : > { %v7394_v17 = vadd.f32 %v2784_v62, %v6888_v27 }
 0x8d5   : > { %7937 = vst [vmem:[#allocation17_spill] sm:$0xff] %v7397_v58 }
 0x8d6   : > { %7936 = vst [vmem:[#allocation16_spill] sm:$0xff] %v7394_v17  ;;  %5715 = vmatprep.mubr.msk.f32.mxu1 %vm466_vm0, %v7394_v17 }
 0x8d7   : > { %5716 = vmatmul.mubr.msk.f32.gmra.mrb[94].mxu1 %vm466_vm0, %v7397_v58 }
 0x8d8   : > { %5752 = vmatprep.mubr.msk.f32.mxu1 %vm466_vm0, %v7255_v47 }
 0x8db   : > { %5753 = vmatmul.mubr.msk.f32.vlgmr.msra.gmra.mrb[96].mxu1 %vm466_vm0, %v7259_v2 }
 0x8dc   : > { %5755 = vmatprep.mubr.msk.f32.mxu1 %vm466_vm0, %v7275_v48 }
 0x8df   : > { %5756 = vmatmul.mubr.msk.f32.gmra.mrb[98].mxu1 %vm466_vm0, %v7279_v21 }
 0x8e0   : > { %5758 = vmatprep.mubr.msk.f32.mxu1 %vm466_vm0, %v7295_v5 }
 0x8e3   : > { %5759 = vmatmul.mubr.msk.f32.gmra.mrb[100].mxu1 %vm466_vm0, %v7299_v14 }
 0x8e4   : > { %5761 = vmatprep.mubr.msk.f32.mxu1 %vm466_vm0, %v7315_v52 }
 0x8e7   : > { %5762 = vmatmul.mubr.msk.f32.gmra.mrb[102].mxu1 %vm466_vm0, %v7319_v38 }
 0x8e8   : > { %5764 = vmatprep.mubr.msk.f32.mxu1 %vm466_vm0, %v7335_v59 }
 0x8eb   : > { %5765 = vmatmul.mubr.msk.f32.gmra.mrb[104].mxu1 %vm466_vm0, %v7339_v35 }
 0x8ec   : > { %5767 = vmatprep.mubr.msk.f32.mxu1 %vm466_vm0, %v7355_v56 }
 0x8ef   : > { %5768 = vmatmul.mubr.msk.f32.gmra.mrb[106].mxu1 %vm466_vm0, %v7359_v0 }
 0x8f0   : > { %5770 = vmatprep.mubr.msk.f32.mxu1 %vm466_vm0, %v7375_v41 }
 0x8f3   : > { %5771 = vmatmul.mubr.msk.f32.gmra.mrb[108].mxu1 %vm466_vm0, %v7379_v12 }
 0x8f4   : > { %5773 = vmatprep.mubr.msk.f32.mxu1 %vm466_vm0, %v7394_v17 }
 0x8f7   : > { %5774 = vmatmul.mubr.msk.f32.gmra.mrb[110].mxu1 %vm466_vm0, %v7397_v58 }
 0x98e   : > { %v7435_v27 = vpop.f32.mrb[80].mxu1 }
 0x98f   : > { %v7437_v19 = vpop.f32.mrb[81].mxu1  ;;  %v3003_v45 = vsel %vm660_vm1, %v7435_v27, -inf }
 0x990   : > { %3004 = vmax.xlane.f32.xlu1 %v3003_v45  ;;  %v3000_v7 = vsel %vm660_vm1, %v7437_v19, -inf }
 0x991   : > { %3001 = vmax.xlane.f32.xlu0 %v3000_v7 }
 0x992   : > { %v7443_v29 = vpop.f32.mrb[82].mxu1 }
 0x993   : > { %v7445_v40 = vpop.f32.mrb[83].mxu1  ;;  %v3009_v57 = vsel %vm660_vm1, %v7443_v29, -inf }
 0x994   : > { %3010 = vmax.xlane.f32.xlu1 %v3009_v57  ;;  %v3006_v3 = vsel %vm660_vm1, %v7445_v40, -inf }
 0x995   : > { %3007 = vmax.xlane.f32.xlu0 %v3006_v3 }
 0x996   : > { %v7451_v36 = vpop.f32.mrb[84].mxu1 }
 0x997   : > { %v7453_v9 = vpop.f32.mrb[85].mxu1  ;;  %v3015_v16 = vsel %vm660_vm1, %v7451_v36, -inf }
 0x998   : > { %3016 = vmax.xlane.f32.xlu1 %v3015_v16  ;;  %v3012_v39 = vsel %vm660_vm1, %v7453_v9, -inf }
 0x999   : > { %3013 = vmax.xlane.f32.xlu0 %v3012_v39 }
 0x99a   : > { %v7459_v6 = vpop.f32.mrb[86].mxu1 }
 0x99b   : > { %v7461_v18 = vpop.f32.mrb[87].mxu1  ;;  %v3021_v60 = vsel %vm660_vm1, %v7459_v6, -inf }
 0x99c   : > { %3022 = vmax.xlane.f32.xlu1 %v3021_v60  ;;  %v3018_v11 = vsel %vm660_vm1, %v7461_v18, -inf }
 0x99d   : > { %3019 = vmax.xlane.f32.xlu0 %v3018_v11 }
 0x99e   : > { %v7467_v28 = vpop.f32.mrb[88].mxu1 }
 0x99f   : > { %v7469_v63 = vpop.f32.mrb[89].mxu1  ;;  %v3027_v32 = vsel %vm660_vm1, %v7467_v28, -inf }
 0x9a0   : > { %3028 = vmax.xlane.f32.xlu1 %v3027_v32  ;;  %v3024_v44 = vsel %vm660_vm1, %v7469_v63, -inf }
 0x9a1   : > { %3025 = vmax.xlane.f32.xlu0 %v3024_v44 }
 0x9a2   : > { %v7475_v25 = vpop.f32.mrb[90].mxu1 }
 0x9a3   : > { %v7477_v13 = vpop.f32.mrb[91].mxu1  ;;  %v3033_v24 = vsel %vm660_vm1, %v7475_v25, -inf }
 0x9a4   : > { %3034 = vmax.xlane.f32.xlu1 %v3033_v24  ;;  %v3030_v26 = vsel %vm660_vm1, %v7477_v13, -inf }
 0x9a5   : > { %3031 = vmax.xlane.f32.xlu0 %v3030_v26 }
 0x9a6   : > { %v7483_v22 = vpop.f32.mrb[92].mxu1 }
 0x9a7   : > { %v7485_v46 = vpop.f32.mrb[93].mxu1  ;;  %v3039_v4 = vsel %vm660_vm1, %v7483_v22, -inf }
 0x9a8   : > { %3040 = vmax.xlane.f32.xlu1 %v3039_v4  ;;  %v3036_v15 = vsel %vm660_vm1, %v7485_v46, -inf }
 0x9a9   : > { %3037 = vmax.xlane.f32.xlu0 %v3036_v15 }
 0x9aa   : > { %v7491_v42 = vpop.f32.mrb[94].mxu1 }
 0x9ab   : > { %v7493_v30 = vpop.f32.mrb[95].mxu1  ;;  %v3045_v23 = vsel %vm660_vm1, %v7491_v42, -inf }
 0x9ac   : > { %3046 = vmax.xlane.f32.xlu1 %v3045_v23  ;;  %v3042_v62 = vsel %vm660_vm1, %v7493_v30, -inf }
 0x9ad   : > { %3043 = vmax.xlane.f32.xlu0 %v3042_v62 }
 0x9ae   : > { %v7499_v45 = vpop.f32.mrb[96].mxu1 }
 0x9af   : > { %v7501_v7 = vpop.f32.mrb[97].mxu1 }
 0x9b2   : > { %v7503_v57 = vpop.f32.mrb[98].mxu1 }
 0x9b3   : > { %v7505_v3 = vpop.f32.mrb[99].mxu1 }
 0x9b6   : > { %v7507_v16 = vpop.f32.mrb[100].mxu1 }
 0x9b7   : > { %v7509_v39 = vpop.f32.mrb[101].mxu1 }
 0x9ba   : > { %v7511_v60 = vpop.f32.mrb[102].mxu1 }
 0x9bb   : > { %v7513_v11 = vpop.f32.mrb[103].mxu1 }
 0x9be   : > { %v7515_v32 = vpop.f32.mrb[104].mxu1 }
 0x9bf   : > { %v7517_v44 = vpop.f32.mrb[105].mxu1 }
 0x9c2   : > { %v7519_v24 = vpop.f32.mrb[106].mxu1 }
 0x9c3   : > { %v7521_v26 = vpop.f32.mrb[107].mxu1 }
 0x9c6   : > { %v7523_v4 = vpop.f32.mrb[108].mxu1 }
 0x9c7   : > { %v7525_v15 = vpop.f32.mrb[109].mxu1 }
 0x9ca   : > { %v7527_v23 = vpop.f32.mrb[110].mxu1 }
 0x9cb   : > { %v7529_v62 = vpop.f32.mrb[111].mxu1 }
 0xa1d   : > { %v3005_v58 = vpop.xlane.xlu1 %3004 }
 0xa1e   : > { %v3049_v17 = vsub.f32 %v7435_v27, %v3005_v58  ;;  %v3002_v50 = vpop.xlane.xlu0 %3001 }
 0xa1f   : > { %v3048_v20 = vsub.f32 %v7437_v19, %v3002_v50 }
 0xa20   : > { %v3066_v12 = vmul.f32 1.442695, %v3049_v17 }
 0xa21   : > { %v3064_v41 = vmul.f32 1.442695, %v3048_v20  ;;  %v3011_v34 = vpop.xlane.xlu1 %3010 }
 0xa22   : > { %6184 = vpow2.f32 %v3066_v12  ;;  %v3051_v8 = vsub.f32 %v7443_v29, %v3011_v34  ;;  %v3008_v0 = vpop.xlane.xlu0 %3007 }
 0xa23   : > { %6186 = vpow2.f32 %v3064_v41  ;;  %v3050_v56 = vsub.f32 %v7445_v40, %v3008_v0 }
 0xa24   : > { %v3070_v61 = vmul.f32 1.442695, %v3051_v8 }
 0xa25   : > { %v3068_v10 = vmul.f32 1.442695, %v3050_v56  ;;  %v3017_v35 = vpop.xlane.xlu1 %3016 }
 0xa26   : > { %6188 = vpow2.f32 %v3070_v61  ;;  %v3053_v59 = vsub.f32 %v7451_v36, %v3017_v35  ;;  %v3014_v58 = vpop.xlane.xlu0 %3013 }
 0xa27   : > { %6190 = vpow2.f32 %v3068_v10  ;;  %v3052_v50 = vsub.f32 %v7453_v9, %v3014_v58 }
 0xa28   : > { %v3074_v17 = vmul.f32 1.442695, %v3053_v59 }
 0xa29   : > { %v3072_v20 = vmul.f32 1.442695, %v3052_v50  ;;  %v3023_v27 = vpop.xlane.xlu1 %3022 }
 0xa2a   : > { %6192 = vpow2.f32 %v3074_v17  ;;  %v3055_v34 = vsub.f32 %v7459_v6, %v3023_v27  ;;  %v3020_v12 = vpop.xlane.xlu0 %3019 }
 0xa2b   : > { %6194 = vpow2.f32 %v3072_v20  ;;  %v3054_v0 = vsub.f32 %v7461_v18, %v3020_v12 }
 0xa2c   : > { %v7539_v8 = vpop.eup %6184  ;;  %v3078_v56 = vmul.f32 1.442695, %v3055_v34 }
 0xa2d   : > { %v7541_v61 = vpop.eup %6186  ;;  %v3076_v35 = vmul.f32 1.442695, %v3054_v0  ;;  %v3029_v41 = vpop.xlane.xlu1 %3028  ;;  %v3099_v10 = vsel %vm660_vm1, %v7539_v8, 0.0 }
 0xa2e   : > { %6196 = vpow2.f32 %v3078_v56  ;;  %v3057_v59 = vsub.f32 %v7467_v28, %v3029_v41  ;;  %v3026_v19 = vpop.xlane.xlu0 %3025  ;;  %3100 = vadd.xlane.f32.xlu1 %v3099_v10  ;;  %v3096_v29 = vsel %vm660_vm1, %v7541_v61, 0.0 }
 0xa2f   : > { %6198 = vpow2.f32 %v3076_v35  ;;  %v3056_v40 = vsub.f32 %v7469_v63, %v3026_v19  ;;  %3097 = vadd.xlane.f32.xlu0 %v3096_v29 }
 0xa30   : > { %v7549_v36 = vpop.eup %6188  ;;  %v3082_v9 = vmul.f32 1.442695, %v3057_v59 }
 0xa31   : > { %v7551_v6 = vpop.eup %6190  ;;  %v3080_v18 = vmul.f32 1.442695, %v3056_v40  ;;  %v3035_v58 = vpop.xlane.xlu1 %3034  ;;  %v3105_v50 = vsel %vm660_vm1, %v7549_v36, 0.0 }
 0xa32   : > { %6200 = vpow2.f32 %v3082_v9  ;;  %v3059_v28 = vsub.f32 %v7475_v25, %v3035_v58  ;;  %v3032_v17 = vpop.xlane.xlu0 %3031  ;;  %3106 = vadd.xlane.f32.xlu1 %v3105_v50  ;;  %v3102_v20 = vsel %vm660_vm1, %v7551_v6, 0.0 }
 0xa33   : > { %6202 = vpow2.f32 %v3080_v18  ;;  %v3058_v63 = vsub.f32 %v7477_v13, %v3032_v17  ;;  %3103 = vadd.xlane.f32.xlu0 %v3102_v20 }
 0xa34   : > { %v7559_v27 = vpop.eup %6192  ;;  %v3086_v34 = vmul.f32 1.442695, %v3059_v28 }
 0xa35   : > { %v7561_v12 = vpop.eup %6194  ;;  %v3084_v0 = vmul.f32 1.442695, %v3058_v63  ;;  %v3041_v56 = vpop.xlane.xlu1 %3040  ;;  %v3111_v35 = vsel %vm660_vm1, %v7559_v27, 0.0 }
 0xa36   : > { %6204 = vpow2.f32 %v3086_v34  ;;  %v3061_v25 = vsub.f32 %v7483_v22, %v3041_v56  ;;  %v3038_v41 = vpop.xlane.xlu0 %3037  ;;  %3112 = vadd.xlane.f32.xlu1 %v3111_v35  ;;  %v3108_v10 = vsel %vm660_vm1, %v7561_v12, 0.0 }
 0xa37   : > { %6206 = vpow2.f32 %v3084_v0  ;;  %v3060_v13 = vsub.f32 %v7485_v46, %v3038_v41  ;;  %3109 = vadd.xlane.f32.xlu0 %v3108_v10 }
 0xa38   : > { %v7569_v59 = vpop.eup %6196  ;;  %v3090_v19 = vmul.f32 1.442695, %v3061_v25 }
 0xa39   : > { %v7571_v29 = vpop.eup %6198  ;;  %v3088_v40 = vmul.f32 1.442695, %v3060_v13  ;;  %v3047_v9 = vpop.xlane.xlu1 %3046  ;;  %v3117_v18 = vsel %vm660_vm1, %v7569_v59, 0.0 }
 0xa3a   : > { %6208 = vpow2.f32 %v3090_v19  ;;  %v3063_v22 = vsub.f32 %v7491_v42, %v3047_v9  ;;  %3118 = vadd.xlane.f32.xlu1 %v3117_v18  ;;  %v3044_v58 = vpop.xlane.xlu0 %3043  ;;  %v3114_v50 = vsel %vm660_vm1, %v7571_v29, 0.0 }
 0xa3b   : > { %6210 = vpow2.f32 %v3088_v40  ;;  %v3062_v46 = vsub.f32 %v7493_v30, %v3044_v58  ;;  %3115 = vadd.xlane.f32.xlu0 %v3114_v50  ;;  %v4935_v58 = vld [vmem:[%s7896_s2 + $0x48] sm:$0xff] }
 0xa3c   : > { %v7579_v28 = vpop.eup %6200  ;;  %v3094_v17 = vmul.f32 1.442695, %v3063_v22  ;;  %v4934_v22 = vld [vmem:[%s7896_s2 + $0x40] sm:$0xff] }
 0xa3d   : > { %v7581_v20 = vpop.eup %6202  ;;  %v3092_v63 = vmul.f32 1.442695, %v3062_v46  ;;  %v3123_v34 = vsel %vm660_vm1, %v7579_v28, 0.0  ;;  %v6012_v50 = vpack.c.bf16 %v4935_v58, %v4934_v22 }
 0xa3e   : > { %6212 = vpow2.f32 %v3094_v17  ;;  %3124 = vadd.xlane.f32.xlu1 %v3123_v34  ;;  %v3120_v42 = vsel %vm660_vm1, %v7581_v20, 0.0 }
 0xa3f   : > { %6214 = vpow2.f32 %v3092_v63  ;;  %3121 = vadd.xlane.f32.xlu0 %v3120_v42  ;;  %6013 = vmatprep.subr.bf16.mxu0 %v6012_v50 }
 0xa40   : > { %v7587_v0 = vpop.eup %6204 }
 0xa41   : > { %v7589_v30 = vpop.eup %6206  ;;  %v3129_v56 = vsel %vm660_vm1, %v7587_v0, 0.0 }
 0xa42   : > { %3130 = vadd.xlane.f32.xlu1 %v3129_v56  ;;  %v3126_v35 = vsel %vm660_vm1, %v7589_v30, 0.0 }
 0xa43   : > { %3127 = vadd.xlane.f32.xlu0 %v3126_v35 }
 0xa44   : > { %v7595_v25 = vpop.eup %6208 }
 0xa45   : > { %v7597_v41 = vpop.eup %6210  ;;  %v3135_v10 = vsel %vm660_vm1, %v7595_v25, 0.0 }
 0xa46   : > { %3136 = vadd.xlane.f32.xlu1 %v3135_v10  ;;  %v3132_v13 = vsel %vm660_vm1, %v7597_v41, 0.0  ;;  %v4936_v10 = vld [vmem:[%s7896_s2 + $0x50] sm:$0xff] }
 0xa47   : > { %3133 = vadd.xlane.f32.xlu0 %v3132_v13  ;;  %v4937_v13 = vld [vmem:[%s7896_s2 + $0x58] sm:$0xff] }
 0xa48   : > { %v7603_v19 = vpop.eup %6212 }
 0xa49   : > { %v7605_v40 = vpop.eup %6214  ;;  %v3141_v9 = vsel %vm660_vm1, %v7603_v19, 0.0 }
 0xa4a   : > { %3142 = vadd.xlane.f32.xlu1 %v3141_v9  ;;  %v3138_v18 = vsel %vm660_vm1, %v7605_v40, 0.0 }
 0xa4b   : > { %3139 = vadd.xlane.f32.xlu0 %v3138_v18 }
 0xabb   : > { %v3101_v46 = vpop.xlane.xlu1 %3100 }
 0xabc   : > { %6216 = vrcp.f32 %v3101_v46  ;;  %v3098_v17 = vpop.xlane.xlu0 %3097 }
 0xabd   : > { %6218 = vrcp.f32 %v3098_v17  ;;  %v6016_v17 = vpack.c.bf16 %v4937_v13, %v4936_v10 }
 0xabf   : > { %v3107_v63 = vpop.xlane.xlu1 %3106 }
 0xac0   : > { %6220 = vrcp.f32 %v3107_v63  ;;  %v3104_v34 = vpop.xlane.xlu0 %3103 }
 0xac1   : > { %6222 = vrcp.f32 %v3104_v34 }
 0xac3   : > { %v3113_v42 = vpop.xlane.xlu1 %3112 }
 0xac4   : > { %6224 = vrcp.f32 %v3113_v42  ;;  %v3110_v56 = vpop.xlane.xlu0 %3109 }
 0xac5   : > { %6226 = vrcp.f32 %v3110_v56 }
 0xac6   : > { %v6217_v35 = vpop.eup %6216 }
 0xac7   : > { %v6219_v9 = vpop.eup %6218  ;;  %v3119_v18 = vpop.xlane.xlu1 %3118  ;;  %v3147_v46 = vmul.f32 %v6217_v35, %v7539_v8 }
 0xac8   : > { %6228 = vrcp.f32 %v3119_v18  ;;  %v3116_v22 = vpop.xlane.xlu0 %3115  ;;  %v3145_v58 = vmul.f32 %v6219_v9, %v7541_v61 }
 0xac9   : > { %6230 = vrcp.f32 %v3116_v22 }
 0xaca   : > { %v6221_v63 = vpop.eup %6220  ;;  %5720 = vmatprep.mubr.msk.f32.mxu0 %vm660_vm1, %v3145_v58 }
 0xacb   : > { %v6223_v34 = vpop.eup %6222  ;;  %v3125_v42 = vpop.xlane.xlu1 %3124  ;;  %5721 = vmatmul.mubr.msk.f32.vlgmr.msra.gmra.mrb[80].mxu0 %vm660_vm1, %v3147_v46  ;;  %v3151_v18 = vmul.f32 %v6221_v63, %v7549_v36 }
 0xacc   : > { %6232 = vrcp.f32 %v3125_v42  ;;  %6015 = vmatpush3.bf16.msra.mxu0 %v6012_v50  ;;  %v3122_v56 = vpop.xlane.xlu0 %3121  ;;  %v3149_v43 = vmul.f32 %v6223_v34, %v7551_v6 }
 0xacd   : > { %6234 = vrcp.f32 %v3122_v56  ;;  %6017 = vmatprep.subr.bf16.mxu0 %v6016_v17 }
 0xace   : > { %v6225_v61 = vpop.eup %6224  ;;  %5723 = vmatprep.mubr.msk.f32.mxu0 %vm660_vm1, %v3149_v43 }
 0xacf   : > { %v6227_v8 = vpop.eup %6226  ;;  %v3131_v35 = vpop.xlane.xlu1 %3130  ;;  %5724 = vmatmul.mubr.msk.f32.gmra.mrb[82].mxu0 %vm660_vm1, %v3151_v18  ;;  %v3155_v50 = vmul.f32 %v6225_v61, %v7559_v27 }
 0xad0   : > { %6236 = vrcp.f32 %v3131_v35  ;;  %v3128_v10 = vpop.xlane.xlu0 %3127  ;;  %v3153_v13 = vmul.f32 %v6227_v8, %v7561_v12  ;;  %6019 = vmatpush3.bf16.msra.mxu0 %v6016_v17 }
 0xad1   : > { %6238 = vrcp.f32 %v3128_v10 }
 0xad2   : > { %v6229_v6 = vpop.eup %6228  ;;  %5726 = vmatprep.mubr.msk.f32.mxu0 %vm660_vm1, %v3153_v13 }
 0xad3   : > { %v6231_v36 = vpop.eup %6230  ;;  %v3137_v9 = vpop.xlane.xlu1 %3136  ;;  %5727 = vmatmul.mubr.msk.f32.gmra.mrb[84].mxu0 %vm660_vm1, %v3155_v50  ;;  %v3159_v58 = vmul.f32 %v6229_v6, %v7569_v59 }
 0xad4   : > { %6240 = vrcp.f32 %v3137_v9  ;;  %v3134_v43 = vpop.xlane.xlu0 %3133  ;;  %v3157_v22 = vmul.f32 %v6231_v36, %v7571_v29 }
 0xad5   : > { %6242 = vrcp.f32 %v3134_v43 }
 0xad6   : > { %v6233_v46 = vpop.eup %6232  ;;  %5729 = vmatprep.mubr.msk.f32.mxu0 %vm660_vm1, %v3157_v22 }
 0xad7   : > { %v6235_v12 = vpop.eup %6234  ;;  %v3143_v17 = vpop.xlane.xlu1 %3142  ;;  %5730 = vmatmul.mubr.msk.f32.gmra.mrb[86].mxu0 %vm660_vm1, %v3159_v58  ;;  %v3163_v34 = vmul.f32 %v6233_v46, %v7579_v28 }
 0xad8   : > { %6244 = vrcp.f32 %v3143_v17  ;;  %v3140_v27 = vpop.xlane.xlu0 %3139  ;;  %v3161_v63 = vmul.f32 %v6235_v12, %v7581_v20 }
 0xad9   : > { %6246 = vrcp.f32 %v3140_v27 }
 0xada   : > { %v6237_v42 = vpop.eup %6236  ;;  %5732 = vmatprep.mubr.msk.f32.mxu0 %vm660_vm1, %v3161_v63 }
 0xadb   : > { %v6239_v29 = vpop.eup %6238  ;;  %5733 = vmatmul.mubr.msk.f32.gmra.mrb[88].mxu0 %vm660_vm1, %v3163_v34  ;;  %v3167_v56 = vmul.f32 %v6237_v42, %v7587_v0 }
 0xadc   : > { %v3165_v59 = vmul.f32 %v6239_v29, %v7589_v30 }
 0xade   : > { %v6241_v18 = vpop.eup %6240  ;;  %5735 = vmatprep.mubr.msk.f32.mxu0 %vm660_vm1, %v3165_v59 }
 0xadf   : > { %v6243_v61 = vpop.eup %6242  ;;  %5736 = vmatmul.mubr.msk.f32.gmra.mrb[90].mxu0 %vm660_vm1, %v3167_v56  ;;  %v3171_v28 = vmul.f32 %v6241_v18, %v7595_v25 }
 0xae0   : > { %v3169_v20 = vmul.f32 %v6243_v61, %v7597_v41 }
 0xae2   : > { %v6245_v8 = vpop.eup %6244  ;;  %5738 = vmatprep.mubr.msk.f32.mxu0 %vm660_vm1, %v3169_v20 }
 0xae3   : > { %v6247_v35 = vpop.eup %6246  ;;  %5739 = vmatmul.mubr.msk.f32.gmra.mrb[92].mxu0 %vm660_vm1, %v3171_v28  ;;  %v3175_v0 = vmul.f32 %v6245_v8, %v7603_v19 }
 0xae4   : > { %v3173_v30 = vmul.f32 %v6247_v35, %v7605_v40 }
 0xae6   : > { %5741 = vmatprep.mubr.msk.f32.mxu0 %vm660_vm1, %v3173_v30 }
 0xae7   : > { %5742 = vmatmul.mubr.msk.f32.gmra.mrb[94].mxu0 %vm660_vm1, %v3175_v0 }
 0xae8   : > { %5784 = vmatprep.mubr.msk.f32.mxu0 %vm466_vm0, %v7501_v7  ;;  %v4955_v7 = vld [vmem:[%s7897_s3 + $0x48] sm:$0xff] }
 0xaeb   : > { %5785 = vmatmul.mubr.msk.f32.vlgmr.msra.gmra.mrb[96].mxu0 %vm466_vm0, %v7499_v45  ;;  %v4954_v45 = vld [vmem:[%s7897_s3 + $0x40] sm:$0xff] }
 0xaec   : > { %5787 = vmatprep.mubr.msk.f32.mxu0 %vm466_vm0, %v7505_v3  ;;  %v4956_v3 = vld [vmem:[%s7897_s3 + $0x50] sm:$0xff] }
 0xaef   : > { %5788 = vmatmul.mubr.msk.f32.gmra.mrb[98].mxu0 %vm466_vm0, %v7503_v57  ;;  %v6020_v57 = vpack.c.bf16 %v4955_v7, %v4954_v45 }
 0xaf0   : > { %5790 = vmatprep.mubr.msk.f32.mxu0 %vm466_vm0, %v7509_v39 }
 0xaf1   : > { %6021 = vmatprep.subr.bf16.mxu1 %v6020_v57 }
 0xaf2   : > { %6023 = vmatpush3.bf16.msra.mxu1 %v6020_v57 }
 0xaf3   : > { %5791 = vmatmul.mubr.msk.f32.gmra.mrb[100].mxu0 %vm466_vm0, %v7507_v16  ;;  %v4957_v16 = vld [vmem:[%s7897_s3 + $0x58] sm:$0xff] }
 0xaf4   : > { %5793 = vmatprep.mubr.msk.f32.mxu0 %vm466_vm0, %v7513_v11  ;;  %v6024_v39 = vpack.c.bf16 %v4957_v16, %v4956_v3  ;;  %v3972_v11 = vld [vmem:[%s7901_s7 + $0x8] sm:$0xff] }
 0xaf6   : > { %6025 = vmatprep.subr.bf16.mxu1 %v6024_v39 }
 0xaf7   : > { %5794 = vmatmul.mubr.msk.f32.gmra.mrb[102].mxu0 %vm466_vm0, %v7511_v60  ;;  %6027 = vmatpush3.bf16.msra.mxu1 %v6024_v39  ;;  %v3971_v60 = vld [vmem:[%s7901_s7] sm:$0xff] }
 0xaf8   : > { %5796 = vmatprep.mubr.msk.f32.mxu0 %vm466_vm0, %v7517_v44  ;;  %v6028_v44 = vpack.c.bf16 %v3972_v11, %v3971_v60 }
 0xafa   : > { %6029 = vmatprep.subr.bf16.mxu0 %v6028_v44 }
 0xafb   : > { %5797 = vmatmul.mubr.msk.f32.gmra.mrb[104].mxu0 %vm466_vm0, %v7515_v32  ;;  %v3973_v32 = vld [vmem:[%s7901_s7 + $0x10] sm:$0xff] }
 0xafc   : > { %5799 = vmatprep.mubr.msk.f32.mxu0 %vm466_vm0, %v7521_v26  ;;  %6031 = vmatpush3.bf16.msra.mxu0 %v6028_v44 }
 0xaff   : > { %5800 = vmatmul.mubr.msk.f32.gmra.mrb[106].mxu0 %vm466_vm0, %v7519_v24  ;;  %v3974_v24 = vld [vmem:[%s7901_s7 + $0x18] sm:$0xff] }
 0xb00   : > { %5802 = vmatprep.mubr.msk.f32.mxu0 %vm466_vm0, %v7525_v15  ;;  %v6032_v26 = vpack.c.bf16 %v3974_v24, %v3973_v32 }
 0xb02   : > { %6033 = vmatprep.subr.bf16.mxu0 %v6032_v26 }
 0xb03   : > { %5803 = vmatmul.mubr.msk.f32.gmra.mrb[108].mxu0 %vm466_vm0, %v7523_v4 }
 0xb04   : > { %5805 = vmatprep.mubr.msk.f32.mxu0 %vm466_vm0, %v7529_v62  ;;  %6035 = vmatpush3.bf16.msra.mxu0 %v6032_v26 }
 0xb07   : > { %5806 = vmatmul.mubr.msk.f32.gmra.mrb[110].mxu0 %vm466_vm0, %v7527_v23 }
 0xb9e   : > { %v5722_v4 = vpop.f32.mrb[80].mxu0 }
 0xb9f   : > { %v3290_v15 = vpop.f32.mrb[81].mxu0 }
 0xba2   : > { %v5725_v23 = vpop.f32.mrb[82].mxu0 }
 0xba3   : > { %v3300_v62 = vpop.f32.mrb[83].mxu0 }
 0xba6   : > { %v5728_v25 = vpop.f32.mrb[84].mxu0 }
 0xba7   : > { %v3310_v41 = vpop.f32.mrb[85].mxu0 }
 0xbaa   : > { %v5731_v19 = vpop.f32.mrb[86].mxu0 }
 0xbab   : > { %v3320_v40 = vpop.f32.mrb[87].mxu0 }
 0xbae   : > { %v5734_v10 = vpop.f32.mrb[88].mxu0 }
 0xbaf   : > { %v3330_v13 = vpop.f32.mrb[89].mxu0 }
 0xbb2   : > { %v5737_v50 = vpop.f32.mrb[90].mxu0 }
 0xbb3   : > { %v3340_v6 = vpop.f32.mrb[91].mxu0 }
 0xbb6   : > { %v5740_v36 = vpop.f32.mrb[92].mxu0 }
 0xbb7   : > { %v3350_v9 = vpop.f32.mrb[93].mxu0 }
 0xbba   : > { %v5743_v43 = vpop.f32.mrb[94].mxu0 }
 0xbbb   : > { %v3360_v22 = vpop.f32.mrb[95].mxu0 }
 0xbbe   : > { %v5786_v58 = vpop.f32.mrb[96].mxu0 }
 0xbbf   : > { %v3718_v46 = vmul.f32 %v5786_v58, %v5722_v4  ;;  %v3638_v12 = vpop.f32.mrb[97].mxu0 }
 0xbc0   : > { %v3717_v17 = vmul.f32 %v3638_v12, %v3290_v15  ;;  %v4191_v15 = vld [vmem:[%s7903_s9] sm:$0xff] }
 0xbc2   : > { %v5789_v27 = vpop.f32.mrb[98].mxu0  ;;  %5816 = vmatprep.mubr.msk.f32.mxu1 %vm466_vm0, %v3717_v17 }
 0xbc3   : > { %v3720_v63 = vmul.f32 %v5789_v27, %v5725_v23  ;;  %v3648_v34 = vpop.f32.mrb[99].mxu0  ;;  %5817 = vmatmul.mubr.msk.f32.vlgmr.msra.gmra.mrb[112].mxu1 %vm466_vm0, %v3718_v46  ;;  %v4192_v23 = vld [vmem:[%s7903_s9 + $0x8] sm:$0xff] }
 0xbc4   : > { %v3719_v42 = vmul.f32 %v3648_v34, %v3300_v62  ;;  %v4193_v62 = vld [vmem:[%s7903_s9 + $0x10] sm:$0xff] }
 0xbc6   : > { %v5792_v29 = vpop.f32.mrb[100].mxu0  ;;  %5819 = vmatprep.mubr.msk.f32.mxu1 %vm466_vm0, %v3719_v42 }
 0xbc7   : > { %v3722_v59 = vmul.f32 %v5792_v29, %v5728_v25  ;;  %v3658_v56 = vpop.f32.mrb[101].mxu0  ;;  %5820 = vmatmul.mubr.msk.f32.gmra.mrb[114].mxu1 %vm466_vm0, %v3720_v63  ;;  %v6036_v25 = vpack.c.bf16 %v4192_v23, %v4191_v15  ;;  %v7944_v15 = vld [vmem:[#allocation9_spill] sm:$0xff] }
 0xbc8   : > { %v3721_v18 = vmul.f32 %v3658_v56, %v3310_v41  ;;  %v4194_v41 = vld [vmem:[%s7903_s9 + $0x18] sm:$0xff] }
 0xbc9   : > { %6037 = vmatprep.subr.bf16.mxu1 %v6036_v25 }
 0xbca   : > { %v5795_v61 = vpop.f32.mrb[102].mxu0  ;;  %5822 = vmatprep.mubr.msk.f32.mxu1 %vm466_vm0, %v3721_v18  ;;  %6039 = vmatpush3.bf16.msra.mxu1 %v6036_v25 }
 0xbcb   : > { %v3724_v20 = vmul.f32 %v5795_v61, %v5731_v19  ;;  %v3668_v28 = vpop.f32.mrb[103].mxu0  ;;  %5823 = vmatmul.mubr.msk.f32.gmra.mrb[116].mxu1 %vm466_vm0, %v3722_v59  ;;  %v6040_v19 = vpack.c.bf16 %v4194_v41, %v4193_v62  ;;  %v7945_v62 = vld [vmem:[#allocation10_spill] sm:$0xff]  ;;  %v7946_v41 = vld [vmem:[#allocation11_spill] sm:$0xff] }
 0xbcc   : > { %v3723_v8 = vmul.f32 %v3668_v28, %v3320_v40  ;;  %v7742_v40 = vld [vmem:[%s7900_s6 + $0x2] ss:$0 sm:$0xff] }
 0xbcd   : > { %6041 = vmatprep.subr.bf16.mxu1 %v6040_v19 }
 0xbce   : > { %v5798_v35 = vpop.f32.mrb[104].mxu0  ;;  %5825 = vmatprep.mubr.msk.f32.mxu1 %vm466_vm0, %v3723_v8  ;;  %6043 = vmatpush3.bf16.msra.mxu1 %v6040_v19 }
 0xbcf   : > { %v3726_v30 = vmul.f32 %v5798_v35, %v5734_v10  ;;  %v3678_v0 = vpop.f32.mrb[105].mxu0  ;;  %5826 = vmatmul.mubr.msk.f32.gmra.mrb[118].mxu1 %vm466_vm0, %v3724_v20 }
 0xbd0   : > { %v3725_v45 = vmul.f32 %v3678_v0, %v3330_v13 }
 0xbd2   : > { %v5801_v7 = vpop.f32.mrb[106].mxu0  ;;  %5828 = vmatprep.mubr.msk.f32.mxu1 %vm466_vm0, %v3725_v45 }
 0xbd3   : > { %v3728_v57 = vmul.f32 %v5801_v7, %v5737_v50  ;;  %v3688_v3 = vpop.f32.mrb[107].mxu0  ;;  %5829 = vmatmul.mubr.msk.f32.gmra.mrb[120].mxu1 %vm466_vm0, %v3726_v30  ;;  %v7938_v30 = vld [vmem:[#allocation3_spill] sm:$0xff]  ;;  %v7939_v7 = vld [vmem:[#allocation4_spill] sm:$0xff] }
 0xbd4   : > { %v3727_v16 = vmul.f32 %v3688_v3, %v3340_v6  ;;  %v7940_v3 = vld [vmem:[#allocation5_spill] sm:$0xff] }
 0xbd6   : > { %v5804_v39 = vpop.f32.mrb[108].mxu0  ;;  %5831 = vmatprep.mubr.msk.f32.mxu1 %vm466_vm0, %v3727_v16 }
 0xbd7   : > { %v3730_v60 = vmul.f32 %v5804_v39, %v5740_v36  ;;  %v3698_v11 = vpop.f32.mrb[109].mxu0  ;;  %5832 = vmatmul.mubr.msk.f32.gmra.mrb[122].mxu1 %vm466_vm0, %v3728_v57  ;;  %v7941_v39 = vld [vmem:[#allocation6_spill] sm:$0xff] }
 0xbd8   : > { %v3729_v32 = vmul.f32 %v3698_v11, %v3350_v9 }
 0xbda   : > { %v5807_v44 = vpop.f32.mrb[110].mxu0  ;;  %5834 = vmatprep.mubr.msk.f32.mxu1 %vm466_vm0, %v3729_v32 }
 0xbdb   : > { %v3732_v24 = vmul.f32 %v5807_v44, %v5743_v43  ;;  %v3708_v26 = vpop.f32.mrb[111].mxu0  ;;  %5835 = vmatmul.mubr.msk.f32.gmra.mrb[124].mxu1 %vm466_vm0, %v3730_v60  ;;  %v7942_v60 = vld [vmem:[#allocation7_spill] sm:$0xff] }
 0xbdc   : > { %v3731_v4 = vmul.f32 %v3708_v26, %v3360_v22 }
 0xbde   : > { %5837 = vmatprep.mubr.msk.f32.mxu1 %vm466_vm0, %v3731_v4 }
 0xbdf   : > { %5838 = vmatmul.mubr.msk.f32.gmra.mrb[126].mxu1 %vm466_vm0, %v3732_v24  ;;  %v7943_v24 = vld [vmem:[#allocation8_spill] sm:$0xff] }
 0xc96   : > { %v5818_v10 = vpop.f32.mrb[112].mxu1 }
 0xc97   : > { %v3866_v13 = vadd.f32 %v5818_v10, %v7742_v40  ;;  %v3860_v50 = vpop.f32.mrb[113].mxu1 }
 0xc98   : > { %v3861_v6 = vadd.f32 %v7742_v40, %v3860_v50 }
 0xc99   : > { %v3940_v36 = vmul.f32 %v7240_v55, %v3866_v13 }
 0xc9a   : > { %v3939_v9 = vmul.f32 %v7244_v51, %v3861_v6  ;;  %v5821_v43 = vpop.f32.mrb[114].mxu1  ;;  %v7947_v6 = vld [vmem:[#allocation12_spill] sm:$0xff] }
 0xc9b   : > { %v3876_v22 = vadd.f32 %v5821_v43, %v7742_v40  ;;  %v3870_v58 = vpop.f32.mrb[115].mxu1  ;;  %v3956_v17 = vadd.f32 %v3940_v36, %v7259_v2  ;;  %v7948_v43 = vld [vmem:[#allocation13_spill] sm:$0xff] }
 0xc9c   : > { %v3955_v46 = vadd.f32 %v3939_v9, %v7255_v47  ;;  %v3871_v12 = vadd.f32 %v7742_v40, %v3870_v58  ;;  %v7949_v58 = vld [vmem:[#allocation14_spill] sm:$0xff] }
 0xc9d   : > { %v3942_v27 = vmul.f32 %v7262_v37, %v3876_v22 }
 0xc9e   : > { %v3941_v63 = vmul.f32 %v7266_v53, %v3871_v12  ;;  %v5824_v34 = vpop.f32.mrb[116].mxu1  ;;  %5848 = vmatprep.mubr.msk.f32.mxu0 %vm466_vm0, %v3955_v46  ;;  %v7950_v12 = vld [vmem:[#allocation15_spill] sm:$0xff] }
 0xc9f   : > { %v3886_v55 = vadd.f32 %v5824_v34, %v7742_v40  ;;  %v3880_v51 = vpop.f32.mrb[117].mxu1  ;;  %5849 = vmatmul.mubr.msk.f32.vlgmr.msra.gmra.mrb[112].mxu0 %vm466_vm0, %v3956_v17  ;;  %v3958_v29 = vadd.f32 %v3942_v27, %v7279_v21  ;;  %v7951_v27 = vld [vmem:[#allocation16_spill] sm:$0xff]  ;;  %v7952_v34 = vld [vmem:[#allocation17_spill] sm:$0xff] }
 0xca0   : > { %v3957_v42 = vadd.f32 %v3941_v63, %v7275_v48  ;;  %v3881_v47 = vadd.f32 %v7742_v40, %v3880_v51  ;;  %v4412_v51 = vld [vmem:[%s7905_s11 + $0x8] sm:$0xff] }
 0xca1   : > { %v3944_v2 = vmul.f32 %v7282_v49, %v3886_v55 }
 0xca2   : > { %v3943_v37 = vmul.f32 %v7286_v1, %v3881_v47  ;;  %v5827_v59 = vpop.f32.mrb[118].mxu1  ;;  %5851 = vmatprep.mubr.msk.f32.mxu0 %vm466_vm0, %v3957_v42  ;;  %v4976_v47 = vld [vmem:[%s7902_s8] ss:$0 sm:$0xff] }
 0xca3   : > { %v3896_v53 = vadd.f32 %v5827_v59, %v7742_v40  ;;  %v3890_v56 = vpop.f32.mrb[119].mxu1  ;;  %5852 = vmatmul.mubr.msk.f32.gmra.mrb[114].mxu0 %vm466_vm0, %v3958_v29  ;;  %v3960_v61 = vadd.f32 %v3944_v2, %v7299_v14 }
 0xca4   : > { %v3959_v18 = vadd.f32 %v3943_v37, %v7295_v5  ;;  %v3891_v48 = vadd.f32 %v7742_v40, %v3890_v56 }
 0xca5   : > { %v3946_v21 = vmul.f32 %v7302_v33, %v3896_v53 }
 0xca6   : > { %v3945_v49 = vmul.f32 %v7306_v31, %v3891_v48  ;;  %v5830_v20 = vpop.f32.mrb[120].mxu1  ;;  %5854 = vmatprep.mubr.msk.f32.mxu0 %vm466_vm0, %v3959_v18 }
 0xca7   : > { %v3906_v1 = vadd.f32 %v5830_v20, %v7742_v40  ;;  %v3900_v28 = vpop.f32.mrb[121].mxu1  ;;  %5855 = vmatmul.mubr.msk.f32.gmra.mrb[116].mxu0 %vm466_vm0, %v3960_v61  ;;  %v3962_v35 = vadd.f32 %v3946_v21, %v7319_v38 }
 0xca8   : > { %v3961_v8 = vadd.f32 %v3945_v49, %v7315_v52  ;;  %v3901_v5 = vadd.f32 %v7742_v40, %v3900_v28 }
 0xca9   : > { %v3948_v14 = vmul.f32 %v7322_v54, %v3906_v1 }
 0xcaa   : > { %v3947_v33 = vmul.f32 %v7938_v30, %v3901_v5  ;;  %v5833_v0 = vpop.f32.mrb[122].mxu1  ;;  %5857 = vmatprep.mubr.msk.f32.mxu0 %vm466_vm0, %v3961_v8 }
 0xcab   : > { %v3916_v31 = vadd.f32 %v5833_v0, %v7742_v40  ;;  %v3910_v45 = vpop.f32.mrb[123].mxu1  ;;  %5858 = vmatmul.mubr.msk.f32.gmra.mrb[118].mxu0 %vm466_vm0, %v3962_v35  ;;  %v3964_v16 = vadd.f32 %v3948_v14, %v7940_v3 }
 0xcac   : > { %v3963_v57 = vadd.f32 %v3947_v33, %v7939_v7  ;;  %v3911_v52 = vadd.f32 %v7742_v40, %v3910_v45 }
 0xcad   : > { %v3950_v38 = vmul.f32 %v7941_v39, %v3916_v31 }
 0xcae   : > { %v3949_v54 = vmul.f32 %v7942_v60, %v3911_v52  ;;  %v5836_v11 = vpop.f32.mrb[124].mxu1  ;;  %5860 = vmatprep.mubr.msk.f32.mxu0 %vm466_vm0, %v3963_v57 }
 0xcaf   : > { %v3926_v32 = vadd.f32 %v5836_v11, %v7742_v40  ;;  %v3920_v44 = vpop.f32.mrb[125].mxu1  ;;  %5861 = vmatmul.mubr.msk.f32.gmra.mrb[120].mxu0 %vm466_vm0, %v3964_v16  ;;  %v3966_v23 = vadd.f32 %v3950_v38, %v7944_v15 }
 0xcb0   : > { %v3965_v26 = vadd.f32 %v3949_v54, %v7943_v24  ;;  %v3921_v4 = vadd.f32 %v7742_v40, %v3920_v44 }
 0xcb1   : > { %v3952_v25 = vmul.f32 %v7945_v62, %v3926_v32 }
 0xcb2   : > { %v3951_v19 = vmul.f32 %v7946_v41, %v3921_v4  ;;  %v5839_v10 = vpop.f32.mrb[126].mxu1  ;;  %5863 = vmatprep.mubr.msk.f32.mxu0 %vm466_vm0, %v3965_v26 }
 0xcb3   : > { %v3936_v13 = vadd.f32 %v5839_v10, %v7742_v40  ;;  %v3930_v50 = vpop.f32.mrb[127].mxu1  ;;  %5864 = vmatmul.mubr.msk.f32.gmra.mrb[122].mxu0 %vm466_vm0, %v3966_v23  ;;  %v3968_v22 = vadd.f32 %v3952_v25, %v7948_v43 }
 0xcb4   : > { %v3967_v36 = vadd.f32 %v3951_v19, %v7947_v6  ;;  %v3931_v9 = vadd.f32 %v7742_v40, %v3930_v50  ;;  %v4411_v40 = vld [vmem:[%s7905_s11] sm:$0xff] }
 0xcb5   : > { %v3954_v46 = vmul.f32 %v7949_v58, %v3936_v13  ;;  %v6044_v42 = vpack.c.bf16 %v4412_v51, %v4411_v40 }
 0xcb6   : > { %v3953_v17 = vmul.f32 %v7950_v12, %v3931_v9  ;;  %5866 = vmatprep.mubr.msk.f32.mxu0 %vm466_vm0, %v3967_v36  ;;  %v4993_v36 = vld [vmem:[%s7904_s10] ss:$0 sm:$0xff] }
 0xcb7   : > { %5867 = vmatmul.mubr.msk.f32.gmra.mrb[124].mxu0 %vm466_vm0, %v3968_v22  ;;  %v3970_v55 = vadd.f32 %v3954_v46, %v7952_v34  ;;  %6045 = vmatprep.subr.bf16.mxu0 %v6044_v42 }
 0xcb8   : > { %v3969_v63 = vadd.f32 %v3953_v17, %v7951_v27  ;;  %6047 = vmatpush3.bf16.msra.mxu0 %v6044_v42 }
 0xcba   : > { %5869 = vmatprep.mubr.msk.f32.mxu0 %vm466_vm0, %v3969_v63 }
 0xcbb   : > { %5870 = vmatmul.mubr.msk.f32.gmra.mrb[126].mxu0 %vm466_vm0, %v3970_v55 }
 0xd72   : > { %v5850_v29 = vpop.f32.mrb[112].mxu0 }
 0xd73   : > { %v4102_v2 = vadd.f32 %v5850_v29, %v4976_v47  ;;  %v4096_v37 = vpop.f32.mrb[113].mxu0 }
 0xd74   : > { %v4097_v59 = vadd.f32 %v4976_v47, %v4096_v37 }
 0xd75   : > { %v4176_v18 = vmax.f32 %v4102_v2, 0.0 }
 0xd76   : > { %v4175_v53 = vmax.f32 %v4097_v59, 0.0  ;;  %v5853_v56 = vpop.f32.mrb[114].mxu0 }
 0xd77   : > { %v4112_v48 = vadd.f32 %v5853_v56, %v4976_v47  ;;  %v4106_v61 = vpop.f32.mrb[115].mxu0 }
 0xd78   : > { %v4107_v21 = vadd.f32 %v4976_v47, %v4106_v61  ;;  %5880 = vmatprep.mubr.msk.f32.mxu1 %vm466_vm0, %v4175_v53 }
 0xd79   : > { %5881 = vmatmul.mubr.msk.f32.vlgmr.msra.gmra.mrb[128].mxu1 %vm466_vm0, %v4176_v18  ;;  %v4178_v1 = vmax.f32 %v4112_v48, 0.0 }
 0xd7a   : > { %v4177_v49 = vmax.f32 %v4107_v21, 0.0  ;;  %v5856_v20 = vpop.f32.mrb[116].mxu0 }
 0xd7b   : > { %v4122_v28 = vadd.f32 %v5856_v20, %v4976_v47  ;;  %v4116_v8 = vpop.f32.mrb[117].mxu0 }
 0xd7c   : > { %v4117_v5 = vadd.f32 %v4976_v47, %v4116_v8  ;;  %5883 = vmatprep.mubr.msk.f32.mxu1 %vm466_vm0, %v4177_v49 }
 0xd7d   : > { %5884 = vmatmul.mubr.msk.f32.gmra.mrb[130].mxu1 %vm466_vm0, %v4178_v1  ;;  %v4180_v30 = vmax.f32 %v4122_v28, 0.0 }
 0xd7e   : > { %v4179_v35 = vmax.f32 %v4117_v5, 0.0  ;;  %v5859_v14 = vpop.f32.mrb[118].mxu0 }
 0xd7f   : > { %v4132_v33 = vadd.f32 %v5859_v14, %v4976_v47  ;;  %v4126_v0 = vpop.f32.mrb[119].mxu0 }
 0xd80   : > { %v4127_v31 = vadd.f32 %v4976_v47, %v4126_v0  ;;  %5886 = vmatprep.mubr.msk.f32.mxu1 %vm466_vm0, %v4179_v35 }
 0xd81   : > { %5887 = vmatmul.mubr.msk.f32.gmra.mrb[132].mxu1 %vm466_vm0, %v4180_v30  ;;  %v4182_v57 = vmax.f32 %v4132_v33, 0.0 }
 0xd82   : > { %v4181_v45 = vmax.f32 %v4127_v31, 0.0  ;;  %v5862_v7 = vpop.f32.mrb[120].mxu0 }
 0xd83   : > { %v4142_v52 = vadd.f32 %v5862_v7, %v4976_v47  ;;  %v4136_v3 = vpop.f32.mrb[121].mxu0 }
 0xd84   : > { %v4137_v16 = vadd.f32 %v4976_v47, %v4136_v3  ;;  %5889 = vmatprep.mubr.msk.f32.mxu1 %vm466_vm0, %v4181_v45 }
 0xd85   : > { %5890 = vmatmul.mubr.msk.f32.gmra.mrb[134].mxu1 %vm466_vm0, %v4182_v57  ;;  %v4184_v60 = vmax.f32 %v4142_v52, 0.0 }
 0xd86   : > { %v4183_v39 = vmax.f32 %v4137_v16, 0.0  ;;  %v5865_v38 = vpop.f32.mrb[122].mxu0 }
 0xd87   : > { %v4152_v54 = vadd.f32 %v5865_v38, %v4976_v47  ;;  %v4146_v11 = vpop.f32.mrb[123].mxu0 }
 0xd88   : > { %v4147_v32 = vadd.f32 %v4976_v47, %v4146_v11  ;;  %5892 = vmatprep.mubr.msk.f32.mxu1 %vm466_vm0, %v4183_v39 }
 0xd89   : > { %5893 = vmatmul.mubr.msk.f32.gmra.mrb[136].mxu1 %vm466_vm0, %v4184_v60  ;;  %v4186_v26 = vmax.f32 %v4152_v54, 0.0 }
 0xd8a   : > { %v4185_v44 = vmax.f32 %v4147_v32, 0.0  ;;  %v5868_v24 = vpop.f32.mrb[124].mxu0  ;;  %v5010_v32 = vld [vmem:[#allocation2] ss:$0 sm:$0xff] }
 0xd8b   : > { %v4162_v4 = vadd.f32 %v5868_v24, %v4976_v47  ;;  %v4156_v15 = vpop.f32.mrb[125].mxu0 }
 0xd8c   : > { %v4157_v23 = vadd.f32 %v4976_v47, %v4156_v15  ;;  %5895 = vmatprep.mubr.msk.f32.mxu1 %vm466_vm0, %v4185_v44 }
 0xd8d   : > { %5896 = vmatmul.mubr.msk.f32.gmra.mrb[138].mxu1 %vm466_vm0, %v4186_v26  ;;  %v4188_v41 = vmax.f32 %v4162_v4, 0.0 }
 0xd8e   : > { %v4187_v62 = vmax.f32 %v4157_v23, 0.0  ;;  %v5871_v25 = vpop.f32.mrb[126].mxu0 }
 0xd8f   : > { %v4172_v19 = vadd.f32 %v5871_v25, %v4976_v47  ;;  %v4166_v10 = vpop.f32.mrb[127].mxu0 }
 0xd90   : > { %v4167_v13 = vadd.f32 %v4976_v47, %v4166_v10  ;;  %5898 = vmatprep.mubr.msk.f32.mxu1 %vm466_vm0, %v4187_v62 }
 0xd91   : > { %5899 = vmatmul.mubr.msk.f32.gmra.mrb[140].mxu1 %vm466_vm0, %v4188_v41  ;;  %v4190_v6 = vmax.f32 %v4172_v19, 0.0 }
 0xd92   : > { %v4189_v50 = vmax.f32 %v4167_v13, 0.0 }
 0xd94   : > { %5901 = vmatprep.mubr.msk.f32.mxu1 %vm466_vm0, %v4189_v50 }
 0xd95   : > { %5902 = vmatmul.mubr.msk.f32.gmra.mrb[142].mxu1 %vm466_vm0, %v4190_v6 }
 0xe4c   : > { %v5882_v9 = vpop.f32.mrb[128].mxu1 }
 0xe4d   : > { %v4322_v43 = vadd.f32 %v5882_v9, %v4993_v36  ;;  %v4316_v22 = vpop.f32.mrb[129].mxu1 }
 0xe4e   : > { %v4317_v58 = vadd.f32 %v4993_v36, %v4316_v22 }
 0xe4f   : > { %v4396_v17 = vmax.f32 %v4322_v43, 0.0 }
 0xe50   : > { %v4395_v46 = vmax.f32 %v4317_v58, 0.0  ;;  %v5885_v12 = vpop.f32.mrb[130].mxu1 }
 0xe51   : > { %v4332_v27 = vadd.f32 %v5885_v12, %v4993_v36  ;;  %v4326_v63 = vpop.f32.mrb[131].mxu1 }
 0xe52   : > { %v4327_v34 = vadd.f32 %v4993_v36, %v4326_v63  ;;  %5908 = vmatprep.mubr.msk.f32.mxu0 %vm4420_vm3, %v4395_v46 }
 0xe53   : > { %5909 = vmatmul.mubr.msk.f32.vlgmr.msra.gmra.mrb[128].mxu0 %vm4420_vm3, %v4396_v17  ;;  %v4398_v51 = vmax.f32 %v4332_v27, 0.0 }
 0xe54   : > { %v4397_v55 = vmax.f32 %v4327_v34, 0.0  ;;  %v5888_v40 = vpop.f32.mrb[132].mxu1 }
 0xe55   : > { %v4342_v42 = vadd.f32 %v5888_v40, %v4993_v36  ;;  %v4336_v47 = vpop.f32.mrb[133].mxu1 }
 0xe56   : > { %v4337_v29 = vadd.f32 %v4993_v36, %v4336_v47  ;;  %5911 = vmatprep.mubr.msk.f32.mxu0 %vm4420_vm3, %v4397_v55 }
 0xe57   : > { %5912 = vmatmul.mubr.msk.f32.gmra.mrb[130].mxu0 %vm4420_vm3, %v4398_v51  ;;  %v4400_v59 = vmax.f32 %v4342_v42, 0.0 }
 0xe58   : > { %v4399_v2 = vmax.f32 %v4337_v29, 0.0  ;;  %v5891_v37 = vpop.f32.mrb[134].mxu1 }
 0xe59   : > { %v4352_v53 = vadd.f32 %v5891_v37, %v4993_v36  ;;  %v4346_v56 = vpop.f32.mrb[135].mxu1 }
 0xe5a   : > { %v4347_v18 = vadd.f32 %v4993_v36, %v4346_v56  ;;  %5914 = vmatprep.mubr.msk.f32.mxu0 %vm4420_vm3, %v4399_v2 }
 0xe5b   : > { %5915 = vmatmul.mubr.msk.f32.gmra.mrb[132].mxu0 %vm4420_vm3, %v4400_v59  ;;  %v4402_v21 = vmax.f32 %v4352_v53, 0.0 }
 0xe5c   : > { %v4401_v48 = vmax.f32 %v4347_v18, 0.0  ;;  %v5894_v61 = vpop.f32.mrb[136].mxu1 }
 0xe5d   : > { %v4362_v49 = vadd.f32 %v5894_v61, %v4993_v36  ;;  %v4356_v20 = vpop.f32.mrb[137].mxu1 }
 0xe5e   : > { %v4357_v1 = vadd.f32 %v4993_v36, %v4356_v20  ;;  %5917 = vmatprep.mubr.msk.f32.mxu0 %vm4420_vm3, %v4401_v48 }
 0xe5f   : > { %5918 = vmatmul.mubr.msk.f32.gmra.mrb[134].mxu0 %vm4420_vm3, %v4402_v21  ;;  %v4404_v5 = vmax.f32 %v4362_v49, 0.0 }
 0xe60   : > { %v4403_v28 = vmax.f32 %v4357_v1, 0.0  ;;  %v5897_v8 = vpop.f32.mrb[138].mxu1 }
 0xe61   : > { %v4372_v35 = vadd.f32 %v5897_v8, %v4993_v36  ;;  %v4366_v14 = vpop.f32.mrb[139].mxu1 }
 0xe62   : > { %v4367_v30 = vadd.f32 %v4993_v36, %v4366_v14  ;;  %5920 = vmatprep.mubr.msk.f32.mxu0 %vm4420_vm3, %v4403_v28 }
 0xe63   : > { %5921 = vmatmul.mubr.msk.f32.gmra.mrb[136].mxu0 %vm4420_vm3, %v4404_v5  ;;  %v4406_v31 = vmax.f32 %v4372_v35, 0.0 }
 0xe64   : > { %v4405_v33 = vmax.f32 %v4367_v30, 0.0  ;;  %v5900_v0 = vpop.f32.mrb[140].mxu1 }
 0xe65   : > { %v4382_v45 = vadd.f32 %v5900_v0, %v4993_v36  ;;  %v4376_v7 = vpop.f32.mrb[141].mxu1 }
 0xe66   : > { %v4377_v57 = vadd.f32 %v4993_v36, %v4376_v7  ;;  %5923 = vmatprep.mubr.msk.f32.mxu0 %vm4420_vm3, %v4405_v33 }
 0xe67   : > { %5924 = vmatmul.mubr.msk.f32.gmra.mrb[138].mxu0 %vm4420_vm3, %v4406_v31  ;;  %v4408_v16 = vmax.f32 %v4382_v45, 0.0 }
 0xe68   : > { %v4407_v52 = vmax.f32 %v4377_v57, 0.0  ;;  %v5903_v3 = vpop.f32.mrb[142].mxu1 }
 0xe69   : > { %v4392_v39 = vadd.f32 %v5903_v3, %v4993_v36  ;;  %v4386_v38 = vpop.f32.mrb[143].mxu1 }
 0xe6a   : > { %v4387_v60 = vadd.f32 %v4993_v36, %v4386_v38  ;;  %5926 = vmatprep.mubr.msk.f32.mxu0 %vm4420_vm3, %v4407_v52 }
 0xe6b   : > { %5927 = vmatmul.mubr.msk.f32.gmra.mrb[140].mxu0 %vm4420_vm3, %v4408_v16  ;;  %v4410_v11 = vmax.f32 %v4392_v39, 0.0 }
 0xe6c   : > { %v4409_v54 = vmax.f32 %v4387_v60, 0.0 }
 0xe6e   : > { %5929 = vmatprep.mubr.msk.f32.mxu0 %vm4420_vm3, %v4409_v54 }
 0xe6f   : > { %5930 = vmatmul.mubr.msk.f32.gmra.mrb[142].mxu0 %vm4420_vm3, %v4410_v11 }
 0xf26   : > { %v5910_v44 = vpop.f32.mrb[128].mxu0 }
 0xf27   : > { %v4541_v24 = vadd.f32 %v5910_v44, %v5010_v32  ;;  %v4535_v26 = vpop.f32.mrb[129].mxu0 }
 0xf28   : > { %v4536_v4 = vadd.f32 %v5010_v32, %v4535_v26 }
 0xf29   : > { %4616 = vst.msk [vmem:[%s7857_s16 + $0x8] sm:$0xff] %vm4614_vm4, %v4541_v24 }
 0xf2a   : > { %4615 = vst.msk [vmem:[%s7857_s16] sm:$0xff] %vm4614_vm4, %v4536_v4  ;;  %v5913_v15 = vpop.f32.mrb[130].mxu0 }
 0xf2b   : > { %v4551_v23 = vadd.f32 %v5913_v15, %v5010_v32  ;;  %v4545_v62 = vpop.f32.mrb[131].mxu0 }
 0xf2c   : > { %v4546_v25 = vadd.f32 %v5010_v32, %v4545_v62 }
 0xf2d   : > { %4618 = vst.msk [vmem:[%s7857_s16 + $0x18] sm:$0xff] %vm4614_vm4, %v4551_v23 }
 0xf2e   : > { %4617 = vst.msk [vmem:[%s7857_s16 + $0x10] sm:$0xff] %vm4614_vm4, %v4546_v25  ;;  %v5916_v41 = vpop.f32.mrb[132].mxu0 }
 0xf2f   : > { %v4561_v19 = vadd.f32 %v5916_v41, %v5010_v32  ;;  %v4555_v10 = vpop.f32.mrb[133].mxu0 }
 0xf30   : > { %v4556_v13 = vadd.f32 %v5010_v32, %v4555_v10 }
 0xf31   : > { %4620 = vst.msk [vmem:[%s7857_s16 + $0x28] sm:$0xff] %vm4614_vm4, %v4561_v19 }
 0xf32   : > { %4619 = vst.msk [vmem:[%s7857_s16 + $0x20] sm:$0xff] %vm4614_vm4, %v4556_v13  ;;  %v5919_v50 = vpop.f32.mrb[134].mxu0 }
 0xf33   : > { %v4571_v6 = vadd.f32 %v5919_v50, %v5010_v32  ;;  %v4565_v36 = vpop.f32.mrb[135].mxu0 }
 0xf34   : > { %v4566_v9 = vadd.f32 %v5010_v32, %v4565_v36 }
 0xf35   : > { %4622 = vst.msk [vmem:[%s7857_s16 + $0x38] sm:$0xff] %vm4614_vm4, %v4571_v6 }
 0xf36   : > { %4621 = vst.msk [vmem:[%s7857_s16 + $0x30] sm:$0xff] %vm4614_vm4, %v4566_v9  ;;  %v5922_v43 = vpop.f32.mrb[136].mxu0 }
 0xf37   : > { %v4581_v22 = vadd.f32 %v5922_v43, %v5010_v32  ;;  %v4575_v58 = vpop.f32.mrb[137].mxu0 }
 0xf38   : > { %v4576_v46 = vadd.f32 %v5010_v32, %v4575_v58 }
 0xf39   : > { %4624 = vst.msk [vmem:[%s7857_s16 + $0x48] sm:$0xff] %vm4614_vm4, %v4581_v22 }
 0xf3a   : > { %4623 = vst.msk [vmem:[%s7857_s16 + $0x40] sm:$0xff] %vm4614_vm4, %v4576_v46  ;;  %v5925_v12 = vpop.f32.mrb[138].mxu0 }
 0xf3b   : > { %v4591_v17 = vadd.f32 %v5925_v12, %v5010_v32  ;;  %v4585_v27 = vpop.f32.mrb[139].mxu0 }
 0xf3c   : > { %v4586_v63 = vadd.f32 %v5010_v32, %v4585_v27 }
 0xf3d   : > { %4626 = vst.msk [vmem:[%s7857_s16 + $0x58] sm:$0xff] %vm4614_vm4, %v4591_v17 }
 0xf3e   : > { %4625 = vst.msk [vmem:[%s7857_s16 + $0x50] sm:$0xff] %vm4614_vm4, %v4586_v63  ;;  %v5928_v34 = vpop.f32.mrb[140].mxu0 }
 0xf3f   : > { %v4601_v55 = vadd.f32 %v5928_v34, %v5010_v32  ;;  %v4595_v40 = vpop.f32.mrb[141].mxu0 }
 0xf40   : > { %v4596_v51 = vadd.f32 %v5010_v32, %v4595_v40 }
 0xf41   : > { %4628 = vst.msk [vmem:[%s7857_s16 + $0x68] sm:$0xff] %vm4614_vm4, %v4601_v55 }
 0xf42   : > { %4627 = vst.msk [vmem:[%s7857_s16 + $0x60] sm:$0xff] %vm4614_vm4, %v4596_v51  ;;  %v5931_v42 = vpop.f32.mrb[142].mxu0 }
 0xf43   : > { %v4611_v47 = vadd.f32 %v5931_v42, %v5010_v32  ;;  %v4605_v29 = vpop.f32.mrb[143].mxu0 }
 0xf44   : > { %v4606_v2 = vadd.f32 %v5010_v32, %v4605_v29 }
 0xf45   : > { %4630 = vst.msk [vmem:[%s7857_s16 + $0x78] sm:$0xff] %vm4614_vm4, %v4611_v47 }
 0xf46   : > { %4629 = vst.msk [vmem:[%s7857_s16 + $0x70] sm:$0xff] %vm4614_vm4, %v4606_v2 }
 0xf47 PF: > { %s25_s27 = sadd.s32 1, %s6271_s27  }
 0xf48   : > { %p22_p4 = scmp.ge.s32.totalorder %s25_s27, 5  }
 0xf4a   :  { %24 = sbr.rel (!%p22_p4) target bundleno = 3 (0x3), region = 112 }

</bundles_post_ra>
